<compile_context>
chip_gen: v5e
topology: v5e:2x2
jax: 0.10.0
libtpu: 0.0.40
codegen_flags: <defaults>
</compile_context>

<pallas_src>
import jax
import jax.numpy as jnp
from jax.experimental import pallas as pl
from jax.experimental.pallas import tpu as pltpu

NEG_SLOPE = 0.01  # F.leaky_relu default


def _leaky_relu(x):
    return jnp.where(x >= 0, x, NEG_SLOPE * x)


def autodecoder_kernel(x_ref, encp_ref, w1x_ref, w2_ref, b2_ref, w3_ref, b3_ref,
                       o_ref):
    """One (batch, point-tile) block of the fused 3-layer pointwise MLP + residual.

    x_ref:    (1, P, Tn)  f32   point coords (fc1 input + residual), lane-dense
    encp_ref: (1, C1, 1)  f32   per-batch encoding projection  w1_e @ enc + b1
    w1x_ref:  (C1, P)     f32   coordinate half of fc1 (VPU path)
    w2_ref:   (C2, C1)    bf16
    b2_ref:   (C2, 1)     f32
    w3_ref:   (P, C2)     bf16
    b3_ref:   (P, 1)      f32
    o_ref:    (1, P, Tn)  f32
    """
    x = x_ref[0]                                    # (P, Tn) f32
    w1x = w1x_ref[...]                              # (C1, P) f32
    P = x.shape[0]

    # fc1 on the VPU: K = point_dim = 3 is far too small for the MXU, so do it
    # as 3 f32 broadcast multiply-adds, seeded with the per-batch encoding
    # projection (bias + encoding term already folded in).
    h = encp_ref[0]                                 # (C1, 1) broadcasts on lanes
    for p in range(P):                              # static, unrolled
        h = h + w1x[:, p:p + 1] * x[p:p + 1, :]     # (C1,1)*(1,Tn) -> (C1,Tn)
    h = _leaky_relu(h)

    # fc2 on the MXU: (C2,C1) @ (C1,Tn) -> (C2,Tn), bf16 in / f32 accumulate.
    h = jnp.dot(w2_ref[...], h.astype(jnp.bfloat16),
                preferred_element_type=jnp.float32) + b2_ref[...]
    h = _leaky_relu(h)

    # fc3 on the MXU: (P,C2) @ (C2,Tn) -> (P,Tn); residual add in f32.
    y = jnp.dot(w3_ref[...], h.astype(jnp.bfloat16),
                preferred_element_type=jnp.float32) + b3_ref[...]
    o_ref[0] = x + y


def auto_decoder_forward(X, encoding, params, *, tile_n=None):
    """X: (B, P, N) f32, encoding: (B, E) f32 -> (B, P, N) f32."""
    X = X.astype(jnp.float32)
    B, P, N = X.shape
    w1, b1, w2, b2, w3, b3 = params                 # channels-first PyTorch forms
    C1 = w1.shape[0]                                # 128
    C2 = w2.shape[0]                                # 64

    # ---- split fc1 and precompute the per-batch encoding projection ----
    # torch.cat([X, enc], 1): coordinate channels come FIRST (columns 0..P-1).
    w1_x = w1[:, :P].astype(jnp.float32)            # (C1, P)  stays f32 (VPU path)
    w1_e = w1[:, P:]                                # (C1, E)
    enc_proj = (encoding.astype(jnp.float32) @ w1_e.T
                + b1[None, :])[:, :, None].astype(jnp.float32)   # (B, C1, 1)

    # ---- bf16 MXU weights, f32 biases ----
    w2_b = w2.astype(jnp.bfloat16)
    w3_b = w3.astype(jnp.bfloat16)
    b2c = b2[:, None].astype(jnp.float32)           # (C2, 1)
    b3c = b3[:, None].astype(jnp.float32)           # (P, 1)

    # ---- large, lane-aligned point tiles; no padding of X ----
    if tile_n is None:
        tile_n = min(8192, pl.cdiv(N, 128) * 128)   # demo N=1000 -> 1024
    n_tiles = pl.cdiv(N, tile_n)
    grid = (B, n_tiles)

    flops = 2 * B * N * (P * C1 + C1 * C2 + C2 * P)
    bytes_accessed = int(
        X.size * 4 * 2                               # X read + out write
        + enc_proj.size * 4
        + w1_x.size * 4 + (w2_b.size + w3_b.size) * 2
        + (b2c.size + b3c.size) * 4)
    cost = pl.CostEstimate(flops=int(flops), transcendentals=0,
                           bytes_accessed=bytes_accessed)

    # VMEM budget: ~816 B/point live (h1+h2 f32 intermediates + double-buffered
    # X/out tiles) + ~50 KiB resident weights.  Request headroom for bigger
    # user tiles, but stay under v7x's 64 MiB physical VMEM.
    est_vmem = 816 * tile_n + (1 << 20)
    vmem_limit = int(min(max(2 * est_vmem, 32 << 20), 56 << 20))

    out = pl.pallas_call(
        autodecoder_kernel,
        out_shape=jax.ShapeDtypeStruct((B, P, N), jnp.float32),
        grid_spec=pltpu.PrefetchScalarGridSpec(
            num_scalar_prefetch=0,
            grid=grid,
            in_specs=[
                pl.BlockSpec((1, P, tile_n), lambda b, n: (b, 0, n)),   # X tile
                pl.BlockSpec((1, C1, 1),     lambda b, n: (b, 0, 0)),   # enc_proj
                pl.BlockSpec((C1, P),        lambda b, n: (0, 0)),      # w1_x
                pl.BlockSpec((C2, C1),       lambda b, n: (0, 0)),      # w2
                pl.BlockSpec((C2, 1),        lambda b, n: (0, 0)),      # b2
                pl.BlockSpec((P, C2),        lambda b, n: (0, 0)),      # w3
                pl.BlockSpec((P, 1),         lambda b, n: (0, 0)),      # b3
            ],
            out_specs=pl.BlockSpec((1, P, tile_n), lambda b, n: (b, 0, n)),
        ),
        compiler_params=pltpu.CompilerParams(
            dimension_semantics=("parallel", "parallel"),
            vmem_limit_bytes=vmem_limit),
        cost_estimate=cost,
    )(X, enc_proj, w1_x, w2_b, b2c, w3_b, b3c)

    return out


def make_params(key, encoding_size, point_dim):
    """Deterministic init matching the PyTorch Conv1d(kernel=1) layer shapes.

    PyTorch Conv1d weight is (Cout, Cin, 1); we keep the squeezed channels-first
    matmul form (Cout, Cin) and 1-D biases (Cout,).
    """
    c_in = encoding_size + point_dim
    shapes = [(128, c_in), (128,), (64, 128), (64,), (point_dim, 64), (point_dim,)]
    keys = jax.random.split(key, len(shapes))
    params = []
    for k, s in zip(keys, shapes):
        if len(s) == 2:
            bound = 1.0 / jnp.sqrt(s[1])             # fan_in = Cin
            params.append(jax.random.uniform(k, s, jnp.float32, -bound, bound))
        else:
            params.append(jax.random.uniform(k, s, jnp.float32, -0.1, 0.1))
    return tuple(params)


def reference_forward(X, encoding, params):
    """Pure-JAX f32 reference matching the PyTorch forward exactly."""
    w1, b1, w2, b2, w3, b3 = params
    B, P, N = X.shape
    enc = jnp.broadcast_to(encoding[:, :, None], (B, encoding.shape[1], N))
    X_enc = jnp.concatenate([X, enc], axis=1)                      # (B, Cin, N)
    h = jnp.einsum('oc,bcn->bon', w1, X_enc) + b1[None, :, None]   # (B, 128, N)
    h = jnp.where(h >= 0, h, NEG_SLOPE * h)
    h = jnp.einsum('oc,bcn->bon', w2, h) + b2[None, :, None]       # (B, 64, N)
    h = jnp.where(h >= 0, h, NEG_SLOPE * h)
    y = jnp.einsum('oc,bcn->bon', w3, h) + b3[None, :, None]       # (B, P, N)
    return X + y


if __name__ == "__main__":
    # Small shapes consistent with the module: batch=2, point_dim=3,
    # encoding_size=32 (constructor arg), num_points=1000 (ragged N handled by
    # Pallas edge-block masking; auto tile_n=1024 -> grid (2, 1)).
    B, P, E, N = 2, 3, 32, 1000

    key = jax.random.PRNGKey(0)
    kx, ke, kp = jax.random.split(key, 3)
    X = jax.random.normal(kx, (B, P, N), jnp.float32)
    encoding = jax.random.normal(ke, (B, E), jnp.float32)
    params = make_params(kp, encoding_size=E, point_dim=P)

    out = auto_decoder_forward(X, encoding, params)
    out = jax.block_until_ready(out)

    ref = reference_forward(X, encoding, params)
    assert out.shape == (B, P, N)
    # fc1/residual are exact f32; fc2/fc3 use bf16 MXU inputs with f32
    # accumulation vs the pure-f32 reference: loosened tolerance.
    assert jnp.allclose(out, ref, atol=5e-2, rtol=5e-2), "mismatch vs reference"

    print("KERNEL_OK")
</pallas_src>

<mosaic_0001>
module attributes {stable_mosaic.version = 11 : i64} {
  func.func @autodecoder_kernel(%arg0: i32, %arg1: i32, %arg2: memref<1x3x1024xf32, #tpu.memory_space<vmem>>, %arg3: memref<1x128x1xf32, #tpu.memory_space<vmem>>, %arg4: memref<128x3xf32, #tpu.memory_space<vmem>>, %arg5: memref<64x128xbf16, #tpu.memory_space<vmem>>, %arg6: memref<64x1xf32, #tpu.memory_space<vmem>>, %arg7: memref<3x64xbf16, #tpu.memory_space<vmem>>, %arg8: memref<3x1xf32, #tpu.memory_space<vmem>>, %arg9: memref<1x3x1024xf32, #tpu.memory_space<vmem>>) attributes {dimension_semantics = [#tpu.dimension_semantics<parallel>, #tpu.dimension_semantics<parallel>], iteration_bounds = array<i64: 2, 1>, scalar_prefetch = 0 : i64, scratch_operands = 0 : i64, tpu.core_type = #tpu.core_type<tc>, window_params = [{transform_indices = @transform_0, window_bounds = array<i64: 1, 3, 1024>}, {transform_indices = @transform_1, window_bounds = array<i64: 1, 128, 1>}, {pipeline_mode = #tpu.pipeline_mode<synchronous>, transform_indices = @transform_2, window_bounds = array<i64: 128, 3>}, {pipeline_mode = #tpu.pipeline_mode<synchronous>, transform_indices = @transform_3, window_bounds = array<i64: 64, 128>}, {pipeline_mode = #tpu.pipeline_mode<synchronous>, transform_indices = @transform_4, window_bounds = array<i64: 64, 1>}, {pipeline_mode = #tpu.pipeline_mode<synchronous>, transform_indices = @transform_5, window_bounds = array<i64: 3, 64>}, {pipeline_mode = #tpu.pipeline_mode<synchronous>, transform_indices = @transform_6, window_bounds = array<i64: 3, 1>}, {transform_indices = @transform_7, window_bounds = array<i64: 1, 3, 1024>}]} {
    %c0 = arith.constant 0 : index
    %c0_0 = arith.constant 0 : index
    %c0_1 = arith.constant 0 : index
    %0 = vector.load %arg2[%c0, %c0_0, %c0_1] : memref<1x3x1024xf32, #tpu.memory_space<vmem>>, vector<1x3x1024xf32>
    %1 = vector.shape_cast %0 : vector<1x3x1024xf32> to vector<3x1024xf32>
    %c0_2 = arith.constant 0 : index
    %c0_3 = arith.constant 0 : index
    %2 = vector.load %arg4[%c0_2, %c0_3] : memref<128x3xf32, #tpu.memory_space<vmem>>, vector<128x3xf32>
    %c0_4 = arith.constant 0 : index
    %c0_5 = arith.constant 0 : index
    %c0_6 = arith.constant 0 : index
    %3 = vector.load %arg3[%c0_4, %c0_5, %c0_6] : memref<1x128x1xf32, #tpu.memory_space<vmem>>, vector<1x128x1xf32>
    %4 = vector.shape_cast %3 : vector<1x128x1xf32> to vector<128x1xf32>
    %5 = vector.extract_strided_slice %2 {offsets = [0, 0], sizes = [128, 1], strides = [1, 1]} : vector<128x3xf32> to vector<128x1xf32>
    %6 = vector.extract_strided_slice %1 {offsets = [0, 0], sizes = [1, 1024], strides = [1, 1]} : vector<3x1024xf32> to vector<1x1024xf32>
    %7 = vector.broadcast %5 : vector<128x1xf32> to vector<128x1024xf32>
    %8 = vector.broadcast %6 : vector<1x1024xf32> to vector<128x1024xf32>
    %9 = arith.mulf %7, %8 : vector<128x1024xf32>
    %10 = vector.broadcast %4 : vector<128x1xf32> to vector<128x1024xf32>
    %11 = arith.addf %10, %9 : vector<128x1024xf32>
    %12 = vector.extract_strided_slice %2 {offsets = [0, 1], sizes = [128, 1], strides = [1, 1]} : vector<128x3xf32> to vector<128x1xf32>
    %13 = vector.extract_strided_slice %1 {offsets = [1, 0], sizes = [1, 1024], strides = [1, 1]} : vector<3x1024xf32> to vector<1x1024xf32>
    %14 = vector.broadcast %12 : vector<128x1xf32> to vector<128x1024xf32>
    %15 = vector.broadcast %13 : vector<1x1024xf32> to vector<128x1024xf32>
    %16 = arith.mulf %14, %15 : vector<128x1024xf32>
    %17 = arith.addf %11, %16 : vector<128x1024xf32>
    %18 = vector.extract_strided_slice %2 {offsets = [0, 2], sizes = [128, 1], strides = [1, 1]} : vector<128x3xf32> to vector<128x1xf32>
    %19 = vector.extract_strided_slice %1 {offsets = [2, 0], sizes = [1, 1024], strides = [1, 1]} : vector<3x1024xf32> to vector<1x1024xf32>
    %20 = vector.broadcast %18 : vector<128x1xf32> to vector<128x1024xf32>
    %21 = vector.broadcast %19 : vector<1x1024xf32> to vector<128x1024xf32>
    %22 = arith.mulf %20, %21 : vector<128x1024xf32>
    %23 = arith.addf %17, %22 : vector<128x1024xf32>
    %cst = arith.constant 0.000000e+00 : f32
    %24 = vector.broadcast %cst : f32 to vector<128x1024xf32>
    %25 = arith.cmpf oge, %23, %24 : vector<128x1024xf32>
    %cst_7 = arith.constant 0.00999999977 : f32
    %26 = vector.broadcast %cst_7 : f32 to vector<128x1024xf32>
    %27 = arith.mulf %26, %23 : vector<128x1024xf32>
    %28 = arith.select %25, %23, %27 : vector<128x1024xi1>, vector<128x1024xf32>
    %c0_8 = arith.constant 0 : index
    %c0_9 = arith.constant 0 : index
    %29 = vector.load %arg5[%c0_8, %c0_9] : memref<64x128xbf16, #tpu.memory_space<vmem>>, vector<64x128xbf16>
    %30 = arith.truncf %28 : vector<128x1024xf32> to vector<128x1024xbf16>
    %cst_10 = arith.constant dense<0.000000e+00> : vector<64x1024xf32>
    %31 = tpu.matmul %29, %30, %cst_10 {dimension_numbers = #tpu.dot_dimension_numbers<[1], [0], [0], [1], [0, 0, 1, 1], [], []>} : vector<64x128xbf16>, vector<128x1024xbf16>, vector<64x1024xf32> -> vector<64x1024xf32>
    %c0_11 = arith.constant 0 : index
    %c0_12 = arith.constant 0 : index
    %32 = vector.load %arg6[%c0_11, %c0_12] : memref<64x1xf32, #tpu.memory_space<vmem>>, vector<64x1xf32>
    %33 = vector.broadcast %32 : vector<64x1xf32> to vector<64x1024xf32>
    %34 = arith.addf %31, %33 : vector<64x1024xf32>
    %cst_13 = arith.constant 0.000000e+00 : f32
    %35 = vector.broadcast %cst_13 : f32 to vector<64x1024xf32>
    %36 = arith.cmpf oge, %34, %35 : vector<64x1024xf32>
    %cst_14 = arith.constant 0.00999999977 : f32
    %37 = vector.broadcast %cst_14 : f32 to vector<64x1024xf32>
    %38 = arith.mulf %37, %34 : vector<64x1024xf32>
    %39 = arith.select %36, %34, %38 : vector<64x1024xi1>, vector<64x1024xf32>
    %c0_15 = arith.constant 0 : index
    %c0_16 = arith.constant 0 : index
    %40 = vector.load %arg7[%c0_15, %c0_16] : memref<3x64xbf16, #tpu.memory_space<vmem>>, vector<3x64xbf16>
    %41 = arith.truncf %39 : vector<64x1024xf32> to vector<64x1024xbf16>
    %cst_17 = arith.constant dense<0.000000e+00> : vector<3x1024xf32>
    %42 = tpu.matmul %40, %41, %cst_17 {dimension_numbers = #tpu.dot_dimension_numbers<[1], [0], [0], [1], [0, 0, 1, 1], [], []>} : vector<3x64xbf16>, vector<64x1024xbf16>, vector<3x1024xf32> -> vector<3x1024xf32>
    %c0_18 = arith.constant 0 : index
    %c0_19 = arith.constant 0 : index
    %43 = vector.load %arg8[%c0_18, %c0_19] : memref<3x1xf32, #tpu.memory_space<vmem>>, vector<3x1xf32>
    %44 = vector.broadcast %43 : vector<3x1xf32> to vector<3x1024xf32>
    %45 = arith.addf %42, %44 : vector<3x1024xf32>
    %46 = arith.addf %1, %45 : vector<3x1024xf32>
    %c0_20 = arith.constant 0 : index
    %c0_21 = arith.constant 0 : index
    %c0_22 = arith.constant 0 : index
    %47 = vector.load %arg9[%c0_20, %c0_21, %c0_22] : memref<1x3x1024xf32, #tpu.memory_space<vmem>>, vector<1x3x1024xf32>
    %48 = vector.shape_cast %47 : vector<1x3x1024xf32> to vector<3x1024xf32>
    %49 = vector.shape_cast %46 : vector<3x1024xf32> to vector<1x3x1024xf32>
    tpu.vector_store %arg9[%c0_20, %c0_21, %c0_22], %49 {strides = array<i32>} : memref<1x3x1024xf32, #tpu.memory_space<vmem>>, vector<1x3x1024xf32>,
    return
  }
  func.func @transform_0(%arg0: i32, %arg1: i32) -> (i32, i32, i32) {
    %c0_i32 = arith.constant 0 : i32
    %c0_i32_0 = arith.constant 0 : i32
    return %arg0, %c0_i32, %arg1 : i32, i32, i32
  }
  func.func @transform_1(%arg0: i32, %arg1: i32) -> (i32, i32, i32) {
    %c0_i32 = arith.constant 0 : i32
    %c0_i32_0 = arith.constant 0 : i32
    %c0_i32_1 = arith.constant 0 : i32
    return %arg0, %c0_i32, %c0_i32_0 : i32, i32, i32
  }
  func.func @transform_2(%arg0: i32, %arg1: i32) -> (i32, i32) {
    %c0_i32 = arith.constant 0 : i32
    %c0_i32_0 = arith.constant 0 : i32
    %c0_i32_1 = arith.constant 0 : i32
    return %c0_i32, %c0_i32_0 : i32, i32
  }
  func.func @transform_3(%arg0: i32, %arg1: i32) -> (i32, i32) {
    %c0_i32 = arith.constant 0 : i32
    %c0_i32_0 = arith.constant 0 : i32
    %c0_i32_1 = arith.constant 0 : i32
    return %c0_i32, %c0_i32_0 : i32, i32
  }
  func.func @transform_4(%arg0: i32, %arg1: i32) -> (i32, i32) {
    %c0_i32 = arith.constant 0 : i32
    %c0_i32_0 = arith.constant 0 : i32
    %c0_i32_1 = arith.constant 0 : i32
    return %c0_i32, %c0_i32_0 : i32, i32
  }
  func.func @transform_5(%arg0: i32, %arg1: i32) -> (i32, i32) {
    %c0_i32 = arith.constant 0 : i32
    %c0_i32_0 = arith.constant 0 : i32
    %c0_i32_1 = arith.constant 0 : i32
    return %c0_i32, %c0_i32_0 : i32, i32
  }
  func.func @transform_6(%arg0: i32, %arg1: i32) -> (i32, i32) {
    %c0_i32 = arith.constant 0 : i32
    %c0_i32_0 = arith.constant 0 : i32
    %c0_i32_1 = arith.constant 0 : i32
    return %c0_i32, %c0_i32_0 : i32, i32
  }
  func.func @transform_7(%arg0: i32, %arg1: i32) -> (i32, i32, i32) {
    %c0_i32 = arith.constant 0 : i32
    %c0_i32_0 = arith.constant 0 : i32
    return %arg0, %c0_i32, %arg1 : i32, i32, i32
  }
}

</mosaic_0001>

<bundles_post_ra>
// kernel: tpu_custom_call.1
= control target key start
LH: loop header
LB: loop body
LE: loop exit
PB: predicated region body
PF: predicated region fallthrough
CT: control target
= control target key end

     0   :  { %s2921_s24 = smov 0   ;;  %s2923_s25 = smov 0   ;;  %s5170_s0 = inlined_call_operand.vmem [shape: f32[2,3,1000], index: 0, kind: input, shape index: {}]   ;;  %s5171_s1 = inlined_call_operand.vmem [shape: f32[2,128,1], index: 1, kind: input, shape index: {}]   ;;  %s5172_s2 = inlined_call_operand.vmem [shape: f32[128,3], index: 2, kind: input, shape index: {}]   ;;  %s5173_s3 = inlined_call_operand.vmem [shape: bf16[64,128], index: 3, kind: input, shape index: {}]   ;;  %s5174_s4 = inlined_call_operand.vmem [shape: f32[64,1], index: 4, kind: input, shape index: {}]   ;;  %s5175_s5 = inlined_call_operand.vmem [shape: bf16[3,64], index: 5, kind: input, shape index: {}]   ;;  %s5176_s6 = inlined_call_operand.vmem [shape: f32[3,1], index: 6, kind: input, shape index: {}]   ;;  %s5177_s7 = inlined_call_operand.vmem [shape: f32[2,3,1000], index: 7, kind: output, shape index: {}]  }
   0x1   :  { %s2925_s26 = smov 0  }
   0x2 LB: > { %s29_s27 = sadd.s32 1, %s2872_s25  ;;  %p2738_p0 = scmp.ge.s32.totalorder %s2876_s26, 1  ;;  %s2876_s26 = sphi %s2925_s26, %s17_s26   ;;  %s2872_s25 = sphi %s2923_s25, %s5602_s25   ;;  %s2868_s24 = sphi %s2921_s24, %s5601_s24  }
   0x3   : > { %p31_p1 = scmp.ge.s32.totalorder %s29_s27, 2  ;;  %p268_p2 = scmp.lt.s32.totalorder %s2876_s26, 3 }
   0x5   : > { %s5604_s27 = smov (%p31_p1, %s29_s27), 0  ;;  %p269_p3 = pnand %p2738_p0, %p268_p2 }
   0x7   : > { %272 = sbr.rel (%p269_p3) target bundleno = 816 (0x330), region = 48 }
   0xc   : > { %v357_v0 = vld [vmem:[%s5172_s2 + $0x70] sm:$0xff]  ;;  %p314_p4 = scmp.lt.s32.totalorder %s2868_s24, 1  ;;  %v5186_v1 = vmov 1   ;;  %v5180_v2 = vmov 0   ;;  %v2957_v4 = vld [vmem:[%s5172_s2 + $0x78] sm:$0xff]  ;;  %v355_v6 = vld [vmem:[%s5172_s2 + $0x60] sm:$0xff] }
   0xd   : > { %2807 = vset.pattern.permute.xlu2 %v5186_v1  ;;  %2805 = vset.pattern.permute.xlu0 %v5180_v2  ;;  %v5178_v7 = vmov 2   ;;  %v356_v8 = vld [vmem:[%s5172_s2 + $0x68] sm:$0xff]  ;;  %v353_v9 = vld [vmem:[%s5172_s2 + $0x50] sm:$0xff]  ;;  %v351_v13 = vld [vmem:[%s5172_s2 + $0x40] sm:$0xff] }
   0xe   : > { %876 = vperm.xlu2 %2807, %v357_v0   ;;  %447 = vperm.xlu0 %2805, %v357_v0   ;;  %s5606_s24 = smov (!%p314_p4, %s2868_s24), 1  ;;  %v354_v14 = vld [vmem:[%s5172_s2 + $0x58] sm:$0xff]  ;;  %v2988_v15 = vld [vmem:[%s5172_s2 + $0x30] sm:$0xff]  ;;  %v3000_v18 = vld [vmem:[%s5172_s2 + $0x20] sm:$0xff] }
   0xf   : > { %2806 = vset.pattern.permute.xlu1 %v5180_v2  ;;  %s2772_s30 = sshll.u32 %s5606_s24, 7  ;;  %v3007_v19 = vld [vmem:[%s5172_s2 + $0x10] sm:$0xff]  ;;  %v352_v20 = vld [vmem:[%s5172_s2 + $0x48] sm:$0xff]  ;;  %v3022_v24 = vld [vmem:[%s5172_s2] sm:$0xff]  ;;  %s2771_s17 = sshll.u32 %s5606_s24, 5 }
  0x10   : > { %s2951_s10 = scalar_lea.vmem %s5171_s1, %s2772_s30  ;;  %5342 = vst [vmem:[#allocation2_spill] sm:$0xff] %v3022_v24  ;;  %v350_v26 = vld [vmem:[%s5172_s2 + $0x38] sm:$0xff]  ;;  %s3044_s20 = scalar_lea.vmem %s5170_s0, %s2771_s17 }
  0x11   : > { %v373_v3 = vld [vmem:[%s2951_s10 + $0x70] sm:$0xff]  ;;  %v374_v5 = vld [vmem:[%s2951_s10 + $0x78] sm:$0xff]  ;;  %v372_v10 = vld [vmem:[%s2951_s10 + $0x68] sm:$0xff]  ;;  %s5147_s23 = scalar_lea.vmem %s5177_s7, %s2771_s17 }
  0x12   : > { %683 = vperm.xlu1 %2806, %v373_v3   ;;  %v371_v11 = vld [vmem:[%s2951_s10 + $0x60] sm:$0xff]  ;;  %v370_v12 = vld [vmem:[%s2951_s10 + $0x58] sm:$0xff]  ;;  %v369_v16 = vld [vmem:[%s2951_s10 + $0x50] sm:$0xff] }
  0x13   : > { %v366_v17 = vld [vmem:[%s2951_s10 + $0x38] sm:$0xff]  ;;  %v368_v21 = vld [vmem:[%s2951_s10 + $0x48] sm:$0xff]  ;;  %v367_v23 = vld [vmem:[%s2951_s10 + $0x40] sm:$0xff] }
  0x14   : > { %v362_v22 = vld [vmem:[%s2951_s10 + $0x18] sm:$0xff]  ;;  %v365_v28 = vld [vmem:[%s2951_s10 + $0x30] sm:$0xff]  ;;  %v339_v29 = vld [vmem:[%s3044_s20] sm:$0x77] }
  0x15   : > { %v340_v30 = vld [vmem:[%s3044_s20 + $0x8] sm:$0x77]  ;;  %v3050_v31 = vld [vmem:[%s3044_s20 + $0x10] sm:$0x77]  ;;  %v459_v33 = vperm.slane %v339_v29, 0  ;;  %v460_v34 = vperm.slane %v339_v29, 4 }
  0x16   : > { %880 = vperm.xlu2 %2807, %v2957_v4   ;;  %452 = vperm.xlu0 %2805, %v2957_v4   ;;  %v461_v35 = vperm.slane %v340_v30, 0  ;;  %v462_v36 = vperm.slane %v340_v30, 4  ;;  %v463_v37 = vperm.slane %v3050_v31, 0  ;;  %v883_v38 = vperm.slane %v339_v29, 1 }
  0x17   : > { %v884_v39 = vperm.slane %v339_v29, 5  ;;  %v885_v40 = vperm.slane %v340_v30, 1  ;;  %v886_v41 = vperm.slane %v340_v30, 5  ;;  %v1227_v42 = vperm.slane %v339_v29, 2 }
  0x18   : > { %v1228_v43 = vperm.slane %v339_v29, 6  ;;  %v1229_v44 = vperm.slane %v340_v30, 2  ;;  %v1230_v45 = vperm.slane %v340_v30, 6  ;;  %v3057_v46 = vperm.slane %v459_v33, 0 }
  0x19   : > { %v3059_v47 = vperm.slane %v460_v34, 0  ;;  %v3061_v48 = vperm.slane %v461_v35, 0  ;;  %v3063_v49 = vperm.slane %v462_v36, 0  ;;  %v3065_v50 = vperm.slane %v463_v37, 0 }
  0x1a   : > { %688 = vperm.xlu1 %2806, %v374_v5   ;;  %v887_v51 = vperm.slane %v3050_v31, 1  ;;  %v3068_v52 = vperm.slane %v883_v38, 1  ;;  %v3070_v53 = vperm.slane %v884_v39, 1  ;;  %v3072_v54 = vperm.slane %v885_v40, 1  ;;  %v3146_v40 = vld [vmem:[%s5172_s2 + $0x28] sm:$0xff] }
  0x1b   : > { %5343 = vst [vmem:[#allocation3_spill] sm:$0xff] %v3065_v50  ;;  %v3074_v55 = vperm.slane %v886_v41, 1  ;;  %v3078_v57 = vperm.slane %v1227_v42, 2  ;;  %v3080_v58 = vperm.slane %v1228_v43, 2  ;;  %v3082_v59 = vperm.slane %v1229_v44, 2 }
  0x1c   : > { %v3084_v60 = vperm.slane %v1230_v45, 2  ;;  %v464_v36 = vperm.slane %v3050_v31, 4  ;;  %v1231_v37 = vperm.slane %v3050_v31, 2 }
  0x1d   : > { %5344 = vst [vmem:[#allocation4_spill] sm:$0xff] %v3074_v55 }
  0x1e   : > { %2808 = vset.pattern.permute.xlu2 %v5178_v7  ;;  %437 = vperm.xlu0 %2805, %v355_v6   ;;  %5345 = vst [vmem:[#allocation5_spill] sm:$0xff] %v3078_v57 }
  0x1f   : > { %1220 = vperm.xlu2 %2808, %v357_v0   ;;  %5346 = vst [vmem:[#allocation6_spill] sm:$0xff] %v3080_v58 }
  0x20   : > { %5347 = vst [vmem:[#allocation7_spill] sm:$0xff] %v3082_v59 }
  0x21   : > { %5348 = vst [vmem:[#allocation8_spill] sm:$0xff] %v3084_v60 }
  0x22   : > { %442 = vperm.xlu1 %2806, %v356_v8  }
  0x26   : > { %427 = vperm.xlu0 %2805, %v353_v9  }
  0x27   : > { %2809 = vset.pattern.permute.xlu2 %v5180_v2 }
  0x28   : > { %678 = vperm.xlu2 %2809, %v372_v10  }
  0x2a   : > { %673 = vperm.xlu1 %2806, %v371_v11  }
  0x2e   : > { %668 = vperm.xlu0 %2805, %v370_v12  }
  0x30   : > { %2811 = vset.pattern.permute.xlu2 %v5186_v1 }
  0x31   : > { %872 = vperm.xlu2 %2811, %v356_v8  }
  0x32   : > { %2810 = vset.pattern.permute.xlu1 %v5186_v1 }
  0x33   : > { %868 = vperm.xlu1 %2810, %v355_v6  }
  0x36   : > { %417 = vperm.xlu0 %2805, %v351_v13  }
  0x39   : > { %2813 = vset.pattern.permute.xlu2 %v5178_v7 }
  0x3a   : > { %1212 = vperm.xlu2 %2813, %v355_v6  }
  0x3b   : > { %2812 = vset.pattern.permute.xlu1 %v5180_v2 }
  0x3c   : > { %432 = vperm.xlu1 %2812, %v354_v14  }
  0x3e   : > { %407 = vperm.xlu0 %2805, %v2988_v15  }
  0x42   : > { %2815 = vset.pattern.permute.xlu2 %v5180_v2 }
  0x43   : > { %663 = vperm.xlu2 %2815, %v369_v16  }
  0x44   : > { %2814 = vset.pattern.permute.xlu1 %v5178_v7 }
  0x45   : > { %1216 = vperm.xlu1 %2814, %v356_v8  }
  0x46   : > { %648 = vperm.xlu0 %2805, %v366_v17   ;;  %v3124_v17 = vld [vmem:[%s5172_s2 + $0x18] sm:$0xff] }
  0x4b   : > { %2817 = vset.pattern.permute.xlu2 %v5186_v1 }
  0x4c   : > { %864 = vperm.xlu2 %2817, %v354_v14  }
  0x4d   : > { %2816 = vset.pattern.permute.xlu1 %v5186_v1 }
  0x4e   : > { %397 = vperm.xlu0 %2805, %v3000_v18   ;;  %860 = vperm.xlu1 %2816, %v353_v9  }
  0x54   : > { %2819 = vset.pattern.permute.xlu2 %v5178_v7 }
  0x55   : > { %1204 = vperm.xlu2 %2819, %v353_v9  }
  0x56   : > { %387 = vperm.xlu0 %2805, %v3007_v19   ;;  %2818 = vset.pattern.permute.xlu1 %v5180_v2 }
  0x57   : > { %422 = vperm.xlu1 %2818, %v352_v20  }
  0x5d   : > { %2820 = vset.pattern.permute.xlu2 %v5180_v2 }
  0x5e   : > { %658 = vperm.xlu2 %2820, %v368_v21   ;;  %628 = vperm.xlu0 %2805, %v362_v22  }
  0x5f   : > { %653 = vperm.xlu1 %2818, %v367_v23  }
  0x66   : > { %2822 = vset.pattern.permute.xlu2 %v5186_v1  ;;  %377 = vperm.xlu0 %2805, %v3022_v24  }
  0x67   : > { %856 = vperm.xlu2 %2822, %v352_v20   ;;  %2821 = vset.pattern.permute.xlu1 %v5186_v1 }
  0x68   : > { %v3027_v25 = vpop.permute.xlu2 %876  ;;  %852 = vperm.xlu1 %2821, %v351_v13  }
  0x69   : > { %v1019_v6 = vmul.f32 %v3068_v52, %v3027_v25  ;;  %v1020_v8 = vmul.f32 %v3070_v53, %v3027_v25  ;;  %v1021_v9 = vmul.f32 %v3072_v54, %v3027_v25  ;;  %v1022_v10 = vmul.f32 %v3074_v55, %v3027_v25 }
  0x6e   : > { %2840 = vset.pattern.permute.xlu0 %v5178_v7 }
  0x6f   : > { %2824 = vset.pattern.permute.xlu2 %v5178_v7  ;;  %1224 = vperm.xlu0 %2840, %v2957_v4   ;;  %v3097_v4 = vperm.slane %v887_v51, 1 }
  0x70   : > { %1196 = vperm.xlu2 %2824, %v351_v13   ;;  %v3035_v27 = vpop.permute.xlu2 %880  ;;  %2823 = vset.pattern.permute.xlu1 %v5180_v2 }
  0x71   : > { %412 = vperm.xlu1 %2823, %v350_v26   ;;  %5350 = vst [vmem:[#allocation10_spill] sm:$0xff] %v3097_v4 }
  0x77   : > { %1208 = vperm.xlu0 %2840, %v354_v14  }
  0x78   : > { %2826 = vset.pattern.permute.xlu2 %v5180_v2 }
  0x79   : > { %643 = vperm.xlu2 %2826, %v365_v28   ;;  %v3053_v32 = vpop.permute.xlu2 %1220  ;;  %2825 = vset.pattern.permute.xlu1 %v5178_v7  ;;  %v1023_v28 = vmul.f32 %v3097_v4, %v3027_v25 }
  0x7a   : > { %1200 = vperm.xlu1 %2825, %v352_v20   ;;  %v1363_v12 = vmul.f32 %v3078_v57, %v3053_v32  ;;  %v1364_v13 = vmul.f32 %v3080_v58, %v3053_v32  ;;  %v1365_v14 = vmul.f32 %v3082_v59, %v3053_v32  ;;  %v1366_v16 = vmul.f32 %v3084_v60, %v3053_v32 }
  0x7f   : > { %1192 = vperm.xlu0 %2840, %v350_v26  }
  0x80   : > { %v3076_v56 = vpop.permute.xlu0 %447 }
  0x81   : > { %2828 = vset.pattern.permute.xlu2 %v5186_v1  ;;  %v595_v62 = vmul.f32 %v3057_v46, %v3076_v56  ;;  %v596_v63 = vmul.f32 %v3059_v47, %v3076_v56  ;;  %v597_v0 = vmul.f32 %v3061_v48, %v3076_v56  ;;  %v598_v3 = vmul.f32 %v3063_v49, %v3076_v56 }
  0x82   : > { %848 = vperm.xlu2 %2828, %v350_v26   ;;  %v3087_v61 = vpop.permute.xlu2 %678  ;;  %2827 = vset.pattern.permute.xlu1 %v5186_v1  ;;  %v599_v5 = vmul.f32 %v3065_v50, %v3076_v56 }
  0x83   : > { %5349 = vst [vmem:[#allocation9_spill] sm:$0xff] %v3087_v61  ;;  %844 = vperm.xlu1 %2827, %v2988_v15  }
  0x84   : > { %v3111_v11 = vpop.permute.xlu1 %683 }
  0x85   : > { %v803_v20 = vadd.f32 %v3111_v11, %v595_v62  ;;  %v804_v21 = vadd.f32 %v3111_v11, %v596_v63  ;;  %v805_v22 = vadd.f32 %v3111_v11, %v597_v0  ;;  %v806_v23 = vadd.f32 %v3111_v11, %v598_v3 }
  0x86   : > { %v807_v26 = vadd.f32 %v3111_v11, %v599_v5  ;;  %v3164_v0 = vperm.slane %v464_v36, 0  ;;  %v888_v3 = vperm.slane %v3050_v31, 5  ;;  %v3167_v5 = vperm.slane %v1231_v37, 2  ;;  %v363_v36 = vld [vmem:[%s2951_s10 + $0x20] sm:$0xff] }
  0x87   : > { %1176 = vperm.xlu0 %2840, %v3124_v17   ;;  %v1147_v30 = vadd.f32 %v1019_v6, %v803_v20  ;;  %v1148_v33 = vadd.f32 %v1020_v8, %v804_v21  ;;  %v1149_v34 = vadd.f32 %v1021_v9, %v805_v22  ;;  %v1150_v35 = vadd.f32 %v1022_v10, %v806_v23 }
  0x88   : > { %v3134_v29 = vpop.permute.xlu0 %452  ;;  %v1151_v63 = vadd.f32 %v1023_v28, %v807_v26  ;;  %5352 = vst [vmem:[#allocation12_spill] sm:$0xff] %v3164_v0  ;;  %v1028_v10 = vmul.f32 %v3070_v53, %v3035_v27  ;;  %v1030_v20 = vmul.f32 %v3074_v55, %v3035_v27  ;;  %v3194_v28 = vperm.slane %v888_v3, 1 }
  0x89   : > { %v603_v38 = vmul.f32 %v3057_v46, %v3134_v29  ;;  %v604_v39 = vmul.f32 %v3059_v47, %v3134_v29  ;;  %v3148_v41 = vadd.f32 %v1363_v12, %v1147_v30  ;;  %v3150_v42 = vadd.f32 %v1364_v13, %v1148_v33  ;;  %5353 = vst [vmem:[#allocation13_spill] sm:$0xff] %v3167_v5  ;;  %v342_v13 = vld [vmem:[%s3044_s20 + $0x18] sm:$0x77]  ;;  %v364_v30 = vld [vmem:[%s2951_s10 + $0x28] sm:$0xff] }
  0x8a   : > { %2830 = vset.pattern.permute.xlu2 %v5178_v7  ;;  %v3152_v43 = vadd.f32 %v1365_v14, %v1149_v34  ;;  %v3154_v44 = vadd.f32 %v1366_v16, %v1150_v35  ;;  %v605_v51 = vmul.f32 %v3061_v48, %v3134_v29  ;;  %v606_v62 = vmul.f32 %v3063_v49, %v3134_v29 }
  0x8b   : > { %1188 = vperm.xlu2 %2830, %v2988_v15   ;;  %v3157_v45 = vpop.permute.xlu2 %872  ;;  %2829 = vset.pattern.permute.xlu1 %v5180_v2  ;;  %v1027_v15 = vmul.f32 %v3068_v52, %v3035_v27  ;;  %v1029_v12 = vmul.f32 %v3072_v54, %v3035_v27  ;;  %v607_v21 = vmul.f32 %v3065_v50, %v3134_v29  ;;  %v465_v35 = vperm.slane %v342_v13, 0 }
  0x8c   : > { %5351 = vst [vmem:[#allocation11_spill] sm:$0xff] %v3157_v45  ;;  %v3169_v6 = vpop.permute.xlu1 %688  ;;  %402 = vperm.xlu1 %2829, %v3146_v40   ;;  %v1232_v37 = vperm.slane %v3050_v31, 6  ;;  %v1024_v31 = vmul.f32 %v3194_v28, %v3027_v25  ;;  %v890_v7 = vperm.slane %v342_v13, 5  ;;  %vm1619_vm0 = vcmp.ge.f32.partialorder %v3148_v41, 0.0 }
  0x8d   : > { %v811_v8 = vadd.f32 %v3169_v6, %v603_v38  ;;  %v812_v9 = vadd.f32 %v3169_v6, %v604_v39  ;;  %v813_v14 = vadd.f32 %v3169_v6, %v605_v51  ;;  %v814_v16 = vadd.f32 %v3169_v6, %v606_v62  ;;  %5357 = vst [vmem:[#allocation17_spill] sm:$0xff] %v3194_v28 }
  0x8e   : > { %v815_v38 = vadd.f32 %v3169_v6, %v607_v21  ;;  %v1367_v39 = vmul.f32 %v3167_v5, %v3053_v32  ;;  %v600_v51 = vmul.f32 %v3164_v0, %v3076_v56  ;;  %vm1620_vm1 = vcmp.ge.f32.partialorder %v3150_v42, 0.0 }
  0x8f   : > { %1164 = vperm.xlu0 %2840, %v3022_v24   ;;  %v3190_v23 = vadd.f32 %v1027_v15, %v811_v8  ;;  %v3192_v26 = vadd.f32 %v1028_v10, %v812_v9  ;;  %v3197_v33 = vadd.f32 %v1029_v12, %v813_v14  ;;  %v3199_v34 = vadd.f32 %v1030_v20, %v814_v16 }
  0x90   : > { %v3188_v22 = vpop.permute.xlu0 %437  ;;  %v1031_v15 = vmul.f32 %v3097_v4, %v3035_v27  ;;  %v3217_v8 = vperm.slane %v465_v35, 0  ;;  %v3219_v9 = vperm.slane %v1232_v37, 2  ;;  %v3223_v12 = vadd.f32 %v1367_v39, %v1151_v63 }
  0x91   : > { %5354 = vst [vmem:[#allocation14_spill] sm:$0xff] %v3188_v22  ;;  %v808_v14 = vadd.f32 %v3111_v11, %v600_v51  ;;  %v466_v16 = vperm.slane %v342_v13, 4  ;;  %v889_v20 = vperm.slane %v342_v13, 1  ;;  %v1032_v63 = vmul.f32 %v3194_v28, %v3035_v27 }
  0x92   : > { %5355 = vst [vmem:[#allocation15_spill] sm:$0xff] %v3190_v23  ;;  %v3221_v10 = vadd.f32 %v1031_v15, %v815_v38  ;;  %v1368_v38 = vmul.f32 %v3219_v9, %v3053_v32  ;;  %v601_v39 = vmul.f32 %v3217_v8, %v3076_v56  ;;  %vm1621_vm2 = vcmp.ge.f32.partialorder %v3152_v43, 0.0 }
  0x93   : > { %5356 = vst [vmem:[#allocation16_spill] sm:$0xff] %v3192_v26  ;;  %2831 = vset.pattern.permute.xlu2 %v5180_v2  ;;  %v1152_v35 = vadd.f32 %v1024_v31, %v808_v14  ;;  %v3238_v51 = vperm.slane %v466_v16, 0  ;;  %v3240_v15 = vperm.slane %v889_v20, 1  ;;  %v1234_v20 = vperm.slane %v342_v13, 6 }
  0x94   : > { %5358 = vst [vmem:[#allocation18_spill] sm:$0xff] %v3197_v33  ;;  %638 = vperm.xlu2 %2831, %v364_v30   ;;  %v3209_v62 = vpop.permute.xlu2 %1212  ;;  %v3211_v3 = vpop.permute.xlu1 %442  ;;  %633 = vperm.xlu1 %2829, %v363_v36   ;;  %v1233_v30 = vperm.slane %v342_v13, 2  ;;  %v608_v36 = vmul.f32 %v3164_v0, %v3134_v29  ;;  %v809_v16 = vadd.f32 %v3111_v11, %v601_v39  ;;  %v3257_v0 = vperm.slane %v890_v7, 1 }
  0x95   : > { %5359 = vst [vmem:[#allocation19_spill] sm:$0xff] %v3199_v34  ;;  %v3253_v28 = vadd.f32 %v1368_v38, %v1152_v35  ;;  %v3267_v35 = vperm.slane %v1234_v20, 2  ;;  %v609_v13 = vmul.f32 %v3217_v8, %v3134_v29  ;;  %v1747_v7 = vmul.f32 0.01, %v3148_v41 }
  0x96   : > { %5360 = vst [vmem:[#allocation20_spill] sm:$0xff] %v3209_v62  ;;  %v816_v37 = vadd.f32 %v3169_v6, %v608_v36  ;;  %v1026_v39 = vmul.f32 %v3257_v0, %v3027_v25  ;;  %vm1622_vm3 = vcmp.ge.f32.partialorder %v3154_v44, 0.0  ;;  %v1349_v5 = vmul.f32 %v3082_v59, %v3209_v62 }
  0x97   : > { %5361 = vst [vmem:[#allocation21_spill] sm:$0xff] %v3211_v3  ;;  %2848 = vset.pattern.permute.xlu0 %v5180_v2  ;;  %v3243_v2 = vperm.slane %v1233_v30, 2  ;;  %vm1623_vm4 = vcmp.ge.f32.partialorder %v3223_v12, 0.0  ;;  %vm1624_vm5 = vcmp.ge.f32.partialorder %v3253_v28, 0.0 }
  0x98   : > { %5362 = vst [vmem:[#allocation22_spill] sm:$0xff] %v3217_v8  ;;  %v3227_v21 = vpop.permute.xlu0 %427  ;;  %v3251_v36 = vadd.f32 %v1032_v63, %v816_v37  ;;  %v602_v37 = vmul.f32 %v3238_v51, %v3076_v56  ;;  %v1033_v56 = vmul.f32 %v3240_v15, %v3035_v27  ;;  %v5375_v8 = vmov 2  }
  0x99   : > { %5363 = vst [vmem:[#allocation23_spill] sm:$0xff] %v3219_v9  ;;  %v1034_v9 = vmul.f32 %v3257_v0, %v3035_v27 }
  0x9a   : > { %5364 = vst [vmem:[#allocation24_spill] sm:$0xff] %v3221_v10  ;;  %v1025_v10 = vmul.f32 %v3240_v15, %v3027_v25  ;;  %v810_v38 = vadd.f32 %v3111_v11, %v602_v37  ;;  %v1750_v11 = vmul.f32 0.01, %v3154_v44  ;;  %v5377_v25 = vmov 0  }
  0x9b   : > { %5365 = vst [vmem:[#allocation25_spill] sm:$0xff] %v3227_v21 }
  0x9c   : > { %5366 = vst [vmem:[#allocation26_spill] sm:$0xff] %v3238_v51  ;;  %2833 = vset.pattern.permute.xlu2 %v5186_v1  ;;  %v3245_v31 = vpop.permute.xlu1 %673  ;;  %2832 = vset.pattern.permute.xlu1 %v5186_v1  ;;  %v1369_v1 = vmul.f32 %v3243_v2, %v3053_v32  ;;  %v1153_v63 = vadd.f32 %v1025_v10, %v809_v16  ;;  %v1748_v10 = vmul.f32 0.01, %v3150_v42  ;;  %v1749_v16 = vmul.f32 0.01, %v3152_v43 }
  0x9d   : > { %5367 = vst [vmem:[#allocation27_spill] sm:$0xff] %v3240_v15  ;;  %840 = vperm.xlu2 %2833, %v3146_v40   ;;  %v3249_v14 = vpop.permute.xlu2 %663  ;;  %836 = vperm.xlu1 %2832, %v3000_v18   ;;  %v1154_v37 = vadd.f32 %v1026_v39, %v810_v38  ;;  %v1012_v15 = vmul.f32 %v3070_v53, %v3157_v45 }
  0x9e   : > { %5368 = vst [vmem:[#allocation28_spill] sm:$0xff] %v3243_v2  ;;  %v3280_v20 = vadd.f32 %v1369_v1, %v1153_v63  ;;  %v1370_v63 = vmul.f32 %v3267_v35, %v3053_v32  ;;  %v3309_v39 = vsel %vm1620_vm1, %v3150_v42, %v1748_v10  ;;  %v1011_v32 = vmul.f32 %v3068_v52, %v3157_v45 }
  0x9f   : > { %5369 = vst [vmem:[#allocation29_spill] sm:$0xff] %v3245_v31  ;;  %v579_v42 = vmul.f32 %v3057_v46, %v3188_v22  ;;  %v1013_v10 = vmul.f32 %v3072_v54, %v3157_v45 }
  0xa0   : > { %5370 = vst [vmem:[#allocation30_spill] sm:$0xff] %v3249_v14  ;;  %v3259_v30 = vpop.permute.xlu0 %668  ;;  %vm1625_vm6 = vcmp.ge.f32.partialorder %v3280_v20, 0.0 }
  0xa1   : > { %5371 = vst [vmem:[#allocation31_spill] sm:$0xff] %v3251_v36  ;;  %v817_v36 = vadd.f32 %v3169_v6, %v609_v13  ;;  %v787_v26 = vadd.f32 %v3245_v31, %v579_v42  ;;  %v1350_v42 = vmul.f32 %v3084_v60, %v3209_v62 }
  0xa2   : > { %5372 = vst [vmem:[#allocation32_spill] sm:$0xff] %v3257_v0 }
  0xa3   : > { %5373 = vst [vmem:[#allocation33_spill] sm:$0xff] %v3259_v30  ;;  %v3294_v1 = vadd.f32 %v1033_v56, %v817_v36  ;;  %v3312_v36 = vsel %vm1621_vm2, %v3152_v43, %v1749_v16  ;;  %v3315_v56 = vsel %vm1622_vm3, %v3154_v44, %v1750_v11  ;;  %v580_v43 = vmul.f32 %v3059_v47, %v3188_v22  ;;  %v361_v16 = vld [vmem:[%s2951_s10 + $0x10] sm:$0xff] }
  0xa4   : > { %5374 = vst [vmem:[#allocation34_spill] sm:$0xff] %v3267_v35  ;;  %v581_v44 = vmul.f32 %v3061_v48, %v3188_v22  ;;  %v587_v11 = vmul.f32 %v3057_v46, %v3211_v3  ;;  %v589_v35 = vmul.f32 %v3061_v48, %v3211_v3 }
  0xa5   : > { %2835 = vset.pattern.permute.xlu2 %v5375_v8  ;;  %v3286_v2 = vpop.permute.xlu1 %868  ;;  %2834 = vset.pattern.permute.xlu1 %v5377_v25  ;;  %5379 = vst [vmem:[#allocation37_spill] sm:$0xff] %v3294_v1  ;;  %v588_v1 = vmul.f32 %v3059_v47, %v3211_v3 }
  0xa6   : > { %5376 = vst [vmem:[#allocation35_spill] sm:$0xff] %v3286_v2  ;;  %1180 = vperm.xlu2 %2835, %v3000_v18   ;;  %v3290_v13 = vpop.permute.xlu2 %864  ;;  %392 = vperm.xlu1 %2834, %v3124_v17   ;;  %v3304_v18 = vsel %vm1619_vm0, %v3148_v41, %v1747_v7  ;;  %v610_v41 = vmul.f32 %v3238_v51, %v3134_v29 }
  0xa7   : > { %5378 = vst [vmem:[#allocation36_spill] sm:$0xff] %v3290_v13  ;;  %v3323_v7 = vadd.f32 %v1370_v63, %v1154_v37  ;;  %v582_v29 = vmul.f32 %v3063_v49, %v3188_v22  ;;  %v1014_v37 = vmul.f32 %v3074_v55, %v3157_v45  ;;  %v1347_v51 = vmul.f32 %v3078_v57, %v3209_v62 }
  0xa8   : > { %v3299_v38 = vpop.permute.xlu0 %417  ;;  %5381 = vst [vmem:[#allocation39_spill] sm:$0xff] %v3304_v18  ;;  %v818_v63 = vadd.f32 %v3169_v6, %v610_v41  ;;  %v1004_v6 = vmul.f32 %v3070_v53, %v3286_v2  ;;  %v1348_v41 = vmul.f32 %v3080_v58, %v3209_v62  ;;  %v1005_v0 = vmul.f32 %v3072_v54, %v3286_v2 }
  0xa9   : > { %5380 = vst [vmem:[#allocation38_spill] sm:$0xff] %v3299_v38  ;;  %v1006_v18 = vmul.f32 %v3074_v55, %v3286_v2  ;;  %v795_v23 = vadd.f32 %v3087_v61, %v587_v11  ;;  %v796_v24 = vadd.f32 %v3087_v61, %v588_v1  ;;  %v789_v4 = vadd.f32 %v3245_v31, %v581_v44 }
  0xaa   : > { %5382 = vst [vmem:[#allocation40_spill] sm:$0xff] %v3309_v39  ;;  %v3367_v34 = vadd.f32 %v1034_v9, %v818_v63  ;;  %v797_v9 = vadd.f32 %v3087_v61, %v589_v35  ;;  %v790_v63 = vadd.f32 %v3245_v31, %v582_v29  ;;  %v563_v45 = vmul.f32 %v3057_v46, %v3227_v21 }
  0xab   : > { %5383 = vst [vmem:[#allocation41_spill] sm:$0xff] %v3312_v36  ;;  %v590_v36 = vmul.f32 %v3063_v49, %v3211_v3  ;;  %v1133_v11 = vadd.f32 %v1005_v0, %v789_v4  ;;  %v1751_v1 = vmul.f32 0.01, %v3223_v12  ;;  %v564_v44 = vmul.f32 %v3059_v47, %v3227_v21 }
  0xac   : > { %5384 = vst [vmem:[#allocation42_spill] sm:$0xff] %v3315_v56  ;;  %v1003_v56 = vmul.f32 %v3068_v52, %v3286_v2  ;;  %v565_v35 = vmul.f32 %v3061_v48, %v3227_v21  ;;  %v1141_v4 = vadd.f32 %v1013_v10, %v797_v9  ;;  %v1752_v0 = vmul.f32 0.01, %v3253_v28 }
  0xad   : > { %5387 = vst [vmem:[#allocation45_spill] sm:$0xff] %v3367_v34  ;;  %v996_v10 = vmul.f32 %v3070_v53, %v3290_v13  ;;  %vm1626_vm11 = vcmp.ge.f32.partialorder %v3323_v7, 0.0 }
  0xae   : > { %2837 = vset.pattern.permute.xlu2 %v5377_v25  ;;  %v3358_v39 = vpop.permute.xlu1 %432  ;;  %2836 = vset.pattern.permute.xlu1 %v5375_v8  ;;  %v1131_v34 = vadd.f32 %v1003_v56, %v787_v26  ;;  %v566_v26 = vmul.f32 %v3063_v49, %v3227_v21  ;;  %v1140_v56 = vadd.f32 %v1012_v15, %v796_v24 }
  0xaf   : > { %5385 = vst [vmem:[#allocation43_spill] sm:$0xff] %v3358_v39  ;;  %623 = vperm.xlu2 %2837, %v361_v16   ;;  %v3361_v27 = vpop.permute.xlu2 %1204  ;;  %1184 = vperm.xlu1 %2836, %v3146_v40   ;;  %v788_v16 = vadd.f32 %v3245_v31, %v580_v43  ;;  %v798_v40 = vadd.f32 %v3087_v61, %v590_v36 }
  0xb0   : > { %5386 = vst [vmem:[#allocation44_spill] sm:$0xff] %v3361_v27  ;;  %v3369_v33 = vpop.permute.xlu0 %407  ;;  %v1134_v43 = vadd.f32 %v1006_v18, %v790_v63  ;;  %v1139_v36 = vadd.f32 %v1011_v32, %v795_v23  ;;  %v1475_v18 = vadd.f32 %v1347_v51, %v1131_v34  ;;  %v1477_v63 = vadd.f32 %v1349_v5, %v1133_v11 }
  0xb1   : > { %5388 = vst [vmem:[#allocation46_spill] sm:$0xff] %v3369_v33  ;;  %v1132_v2 = vadd.f32 %v1004_v6, %v788_v16  ;;  %v1142_v6 = vadd.f32 %v1014_v37, %v798_v40  ;;  %v5389_v16 = vmov 1   ;;  %v3398_v31 = vadd.f32 %v3249_v14, %v563_v45 }
  0xb2   : > { %v1478_v62 = vadd.f32 %v1350_v42, %v1134_v43  ;;  %v3401_v21 = vsel %vm1623_vm4, %v3223_v12, %v1751_v1  ;;  %v3413_v5 = vadd.f32 %v3249_v14, %v565_v35  ;;  %v3416_v45 = vadd.f32 %v3249_v14, %v566_v26 }
  0xb3   : > { %v1476_v29 = vadd.f32 %v1348_v41, %v1132_v2  ;;  %5390 = vst [vmem:[#allocation47_spill] sm:$0xff] %v3401_v21  ;;  %v3410_v2 = vadd.f32 %v3249_v14, %v564_v44  ;;  %v3423_v12 = vmul.f32 %v3068_v52, %v3290_v13  ;;  %v1753_v51 = vmul.f32 0.01, %v3280_v20 }
  0xb4   : > { %v1731_v15 = vmul.f32 0.01, %v1475_v18  ;;  %v3436_v37 = vmul.f32 %v3072_v54, %v3290_v13  ;;  %vm1603_vm7 = vcmp.ge.f32.partialorder %v1475_v18, 0.0  ;;  %v1733_v41 = vmul.f32 0.01, %v1477_v63 }
  0xb5   : > { %v1732_v32 = vmul.f32 0.01, %v1476_v29  ;;  %vm1604_vm8 = vcmp.ge.f32.partialorder %v1476_v29, 0.0  ;;  %v1734_v9 = vmul.f32 0.01, %v1478_v62  ;;  %vm1605_vm9 = vcmp.ge.f32.partialorder %v1477_v63, 0.0 }
  0xb6   : > { %vm1606_vm10 = vcmp.ge.f32.partialorder %v1478_v62, 0.0  ;;  %v3442_v40 = vmul.f32 %v3074_v55, %v3290_v13  ;;  %v571_v43 = vmul.f32 %v3057_v46, %v3358_v39  ;;  %v3453_v1 = vsel %vm1625_vm6, %v3280_v20, %v1753_v51  ;;  %v3466_v13 = vld [vmem:[%s5172_s2 + $0x8] sm:$0xff] }
  0xb7   : > { %2839 = vset.pattern.permute.xlu2 %v5389_v16  ;;  %v3403_v23 = vpop.permute.xlu1 %1216  ;;  %2838 = vset.pattern.permute.xlu1 %v5389_v16  ;;  %5395 = vst [vmem:[#allocation52_spill] sm:$0xff] %v3453_v1  ;;  %v3455_v44 = vsel %vm1603_vm7, %v1475_v18, %v1731_v15  ;;  %v3457_v35 = vsel %vm1604_vm8, %v1476_v29, %v1732_v32 }
  0xb8   : > { %5391 = vst [vmem:[#allocation48_spill] sm:$0xff] %v3403_v23  ;;  %v3405_v24 = vpop.permute.xlu0 %648  ;;  %832 = vperm.xlu2 %2839, %v3124_v17   ;;  %828 = vperm.xlu1 %2838, %v3007_v19   ;;  %v3419_v34 = vpop.permute.xlu2 %658  ;;  %v3428_v17 = vsel %vm1624_vm5, %v3253_v28, %v1752_v0  ;;  %v1355_v28 = vmul.f32 %v3078_v57, %v3403_v23 }
  0xb9   : > { %5392 = vst [vmem:[#allocation49_spill] sm:$0xff] %v3405_v24  ;;  %v1356_v42 = vmul.f32 %v3080_v58, %v3403_v23  ;;  %v1357_v11 = vmul.f32 %v3082_v59, %v3403_v23  ;;  %v1358_v26 = vmul.f32 %v3084_v60, %v3403_v23  ;;  %v572_v0 = vmul.f32 %v3059_v47, %v3358_v39  ;;  %v359_v23 = vld [vmem:[%s2951_s10] sm:$0xff] }
  0xba   : > { %5393 = vst [vmem:[#allocation50_spill] sm:$0xff] %v3419_v34  ;;  %v3468_v14 = vsel %vm1605_vm9, %v1477_v63, %v1733_v41  ;;  %v573_v20 = vmul.f32 %v3061_v48, %v3358_v39  ;;  %v574_v18 = vmul.f32 %v3063_v49, %v3358_v39  ;;  %v1483_v51 = vadd.f32 %v1355_v28, %v1139_v36 }
  0xbb   : > { %5394 = vst [vmem:[#allocation51_spill] sm:$0xff] %v3428_v17  ;;  %v3470_v17 = vsel %vm1606_vm10, %v1478_v62, %v1734_v9  ;;  %v1331_v15 = vmul.f32 %v3078_v57, %v3361_v27  ;;  %v1332_v63 = vmul.f32 %v3080_v58, %v3361_v27  ;;  %v1333_v62 = vmul.f32 %v3082_v59, %v3361_v27 }
  0xbc   : > { %v1484_v9 = vadd.f32 %v1356_v42, %v1140_v56  ;;  %v1485_v39 = vadd.f32 %v1357_v11, %v1141_v4  ;;  %v779_v36 = vadd.f32 %v3259_v30, %v571_v43  ;;  %v1486_v28 = vadd.f32 %v1358_v26, %v1142_v6 }
  0xbd   : > { %v780_v1 = vadd.f32 %v3259_v30, %v572_v0  ;;  %v1334_v21 = vmul.f32 %v3084_v60, %v3361_v27  ;;  %v3499_v24 = vmul.f32 %v3057_v46, %v3299_v38  ;;  %v782_v56 = vadd.f32 %v3259_v30, %v574_v18 }
  0xbe   : > { %v3505_v4 = vmul.f32 %v3059_v47, %v3299_v38  ;;  %v3509_v6 = vmul.f32 %v3061_v48, %v3299_v38  ;;  %v1739_v42 = vmul.f32 0.01, %v1483_v51  ;;  %v1754_v26 = vmul.f32 0.01, %v3323_v7 }
  0xbf   : > { %5399 = vst [vmem:[#allocation56_spill] sm:$0xff] %v3499_v24  ;;  %vm1611_vm12 = vcmp.ge.f32.partialorder %v1483_v51, 0.0  ;;  %v1740_v0 = vmul.f32 0.01, %v1484_v9  ;;  %vm1612_vm13 = vcmp.ge.f32.partialorder %v1484_v9, 0.0  ;;  %vm1613_vm14 = vcmp.ge.f32.partialorder %v1485_v39, 0.0 }
  0xc0   : > { %v3476_v29 = vpop.permute.xlu0 %397  ;;  %2842 = vset.pattern.permute.xlu2 %v5375_v8  ;;  %v3485_v32 = vpop.permute.xlu1 %860  ;;  %2841 = vset.pattern.permute.xlu1 %v5377_v25  ;;  %5400 = vst [vmem:[#allocation57_spill] sm:$0xff] %v3505_v4  ;;  %v1742_v27 = vmul.f32 0.01, %v1486_v28  ;;  %v360_v8 = vld [vmem:[%s2951_s10 + $0x8] sm:$0xff]  ;;  %vm1614_vm15 = vcmp.ge.f32.partialorder %v1486_v28, 0.0  ;;  %v3525_v4 = vadd.f32 %v996_v10, %v780_v1  ;;  %v3529_v24 = vmul.f32 %v3063_v49, %v3299_v38 }
  0xc1   : > { %5396 = vst [vmem:[#allocation53_spill] sm:$0xff] %v3476_v29  ;;  %v3488_v41 = vpop.permute.xlu2 %856  ;;  %1172 = vperm.xlu2 %2842, %v3007_v19   ;;  %382 = vperm.xlu1 %2841, %v3466_v13   ;;  %v781_v19 = vadd.f32 %v3259_v30, %v573_v20  ;;  %v987_v11 = vmul.f32 %v3068_v52, %v3485_v32  ;;  %v1741_v20 = vmul.f32 0.01, %v1485_v39 }
  0xc2   : > { %5397 = vst [vmem:[#allocation54_spill] sm:$0xff] %v3485_v32  ;;  %v988_v43 = vmul.f32 %v3070_v53, %v3485_v32  ;;  %v989_v18 = vmul.f32 %v3072_v54, %v3485_v32  ;;  %v990_v30 = vmul.f32 %v3074_v55, %v3485_v32  ;;  %v3533_v59 = vsel %vm1611_vm12, %v1483_v51, %v1739_v42 }
  0xc3   : > { %5398 = vst [vmem:[#allocation55_spill] sm:$0xff] %v3488_v41  ;;  %v1115_v58 = vadd.f32 %v987_v11, %v3398_v31  ;;  %v3538_v57 = vadd.f32 %v3436_v37, %v781_v19  ;;  %v3545_v10 = vsel %vm1613_vm14, %v1485_v39, %v1741_v20  ;;  %v3549_v51 = vadd.f32 %v3442_v40, %v782_v56 }
  0xc4   : > { %5401 = vst [vmem:[#allocation58_spill] sm:$0xff] %v3509_v6  ;;  %v3523_v6 = vadd.f32 %v3423_v12, %v779_v36  ;;  %v1116_v32 = vadd.f32 %v988_v43, %v3410_v2  ;;  %v3542_v12 = vsel %vm1612_vm13, %v1484_v9, %v1740_v0  ;;  %v1117_v1 = vadd.f32 %v989_v18, %v3413_v5 }
  0xc5   : > { %v3556_v2 = vsel %vm1614_vm15, %v1486_v28, %v1742_v27  ;;  %v1118_v37 = vadd.f32 %v990_v30, %v3416_v45  ;;  %v3562_v39 = vsel %vm1626_vm11, %v3323_v7, %v1754_v26  ;;  %v3568_v40 = vmul.f32 %v3057_v46, %v3369_v33 }
  0xc6   : > { %5405 = vst [vmem:[#allocation62_spill] sm:$0xff] %v3562_v39  ;;  %v591_v27 = vmul.f32 %v3065_v50, %v3211_v3  ;;  %v1460_v45 = vadd.f32 %v1332_v63, %v1116_v32  ;;  %v1461_v28 = vadd.f32 %v1333_v62, %v1117_v1  ;;  %v979_v19 = vmul.f32 %v3068_v52, %v3488_v41  ;;  %v5406_v32 = vld [vmem:[#allocation11_spill] sm:$0xff] }
  0xc7   : > { %v3586_v56 = vmul.f32 %v3061_v48, %v3369_v33  ;;  %v1462_v42 = vadd.f32 %v1334_v21, %v1118_v37  ;;  %v980_v11 = vmul.f32 %v3070_v53, %v3488_v41  ;;  %v981_v43 = vmul.f32 %v3072_v54, %v3488_v41  ;;  %v5407_v21 = vld [vmem:[#allocation10_spill] sm:$0xff] }
  0xc8   : > { %v3531_v60 = vpop.permute.xlu0 %387  ;;  %v583_v63 = vmul.f32 %v3065_v50, %v3188_v22  ;;  %v799_v62 = vadd.f32 %v3087_v61, %v591_v27  ;;  %v1015_v26 = vmul.f32 %v5407_v21, %v5406_v32  ;;  %v1716_v18 = vmul.f32 0.01, %v1460_v45  ;;  %v5417_v22 = vld [vmem:[#allocation35_spill] sm:$0xff] }
  0xc9   : > { %5402 = vst [vmem:[#allocation59_spill] sm:$0xff] %v3531_v60  ;;  %2843 = vset.pattern.permute.xlu2 %v5377_v25  ;;  %v3551_v36 = vpop.permute.xlu1 %422  ;;  %613 = vperm.xlu1 %2841, %v359_v23   ;;  %v1459_v23 = vadd.f32 %v1331_v15, %v1115_v58  ;;  %v982_v58 = vmul.f32 %v3074_v55, %v3488_v41  ;;  %vm1588_vm1 = vcmp.ge.f32.partialorder %v1460_v45, 0.0  ;;  %v1717_v9 = vmul.f32 0.01, %v1461_v28  ;;  %v5411_v41 = vld [vmem:[#allocation2_spill] sm:$0xff] }
  0xca   : > { %5403 = vst [vmem:[#allocation60_spill] sm:$0xff] %v3551_v36  ;;  %v3553_v31 = vpop.permute.xlu2 %1196  ;;  %618 = vperm.xlu2 %2843, %v360_v8   ;;  %v3572_v8 = vmul.f32 %v3059_v47, %v3369_v33  ;;  %v3596_v15 = vmul.f32 %v3063_v49, %v3369_v33  ;;  %v555_v1 = vmul.f32 %v3057_v46, %v3551_v36  ;;  %vm1589_vm2 = vcmp.ge.f32.partialorder %v1461_v28, 0.0 }
  0xcb   : > { %5404 = vst [vmem:[#allocation61_spill] sm:$0xff] %v3553_v31  ;;  %v1715_v20 = vmul.f32 0.01, %v1459_v23  ;;  %v556_v37 = vmul.f32 %v3059_v47, %v3551_v36  ;;  %vm1587_vm0 = vcmp.ge.f32.partialorder %v1459_v23, 0.0  ;;  %v557_v7 = vmul.f32 %v3061_v48, %v3551_v36 }
  0xcc   : > { %v1718_v30 = vmul.f32 0.01, %v1462_v42  ;;  %v558_v5 = vmul.f32 %v3063_v49, %v3551_v36  ;;  %v3619_v33 = vmul.f32 %v3057_v46, %v3476_v29  ;;  %vm1590_vm3 = vcmp.ge.f32.partialorder %v1462_v42, 0.0 }
  0xcd   : > { %v3625_v38 = vmul.f32 %v3059_v47, %v3476_v29  ;;  %v3633_v36 = vmul.f32 %v3063_v49, %v3476_v29  ;;  %v3638_v32 = vsel %vm1587_vm0, %v1459_v23, %v1715_v20  ;;  %v763_v61 = vadd.f32 %v3419_v34, %v555_v1 }
  0xce   : > { %5410 = vst [vmem:[#allocation65_spill] sm:$0xff] %v3619_v33  ;;  %v764_v39 = vadd.f32 %v3419_v34, %v556_v37  ;;  %v765_v3 = vadd.f32 %v3419_v34, %v557_v7  ;;  %v3654_v23 = vsel %vm1590_vm3, %v1462_v42, %v1718_v30  ;;  %v5422_v37 = vld [vmem:[#allocation8_spill] sm:$0xff]  ;;  %v5424_v30 = vld [vmem:[#allocation29_spill] sm:$0xff] }
  0xcf   : > { %5412 = vst [vmem:[#allocation2_spill] sm:$0xff] %v3625_v38  ;;  %v791_v42 = vadd.f32 %v5424_v30, %v583_v63  ;;  %v5431_v63 = vld [vmem:[#allocation20_spill] sm:$0xff]  ;;  %v5432_v30 = vld [vmem:[#allocation13_spill] sm:$0xff] }
  0xd0   : > { %v3603_v0 = vpop.permute.xlu0 %628  ;;  %5414 = vst [vmem:[#allocation67_spill] sm:$0xff] %v3633_v36  ;;  %v1007_v36 = vmul.f32 %v5407_v21, %v5417_v22  ;;  %v3672_v22 = vadd.f32 %v979_v19, %v763_v61  ;;  %v3674_v38 = vadd.f32 %v980_v11, %v764_v39  ;;  %v5433_v61 = vld [vmem:[#allocation56_spill] sm:$0xff]  ;;  %v5434_v19 = vld [vmem:[#allocation57_spill] sm:$0xff] }
  0xd1   : > { %5408 = vst [vmem:[#allocation63_spill] sm:$0xff] %v3603_v0  ;;  %v3611_v27 = vpop.permute.xlu1 %653  ;;  %2844 = vset.pattern.permute.xlu1 %v5389_v16  ;;  %v3645_v0 = vsel %vm1589_vm2, %v1461_v28, %v1717_v9  ;;  %v766_v9 = vadd.f32 %v3419_v34, %v558_v5  ;;  %v5421_v28 = vld [vmem:[#allocation7_spill] sm:$0xff]  ;;  %v3678_v5 = vmul.f32 %v3061_v48, %v3531_v60 }
  0xd2   : > { %5409 = vst [vmem:[#allocation64_spill] sm:$0xff] %v3611_v27  ;;  %2845 = vset.pattern.permute.xlu2 %v5389_v16  ;;  %820 = vperm.xlu1 %2844, %v5411_v41   ;;  %v3629_v16 = vmul.f32 %v3061_v48, %v3476_v29  ;;  %v3641_v41 = vsel %vm1588_vm1, %v1460_v45, %v1716_v18  ;;  %v5419_v45 = vld [vmem:[#allocation5_spill] sm:$0xff]  ;;  %v5420_v18 = vld [vmem:[#allocation6_spill] sm:$0xff] }
  0xd3   : > { %824 = vperm.xlu2 %2845, %v3466_v13   ;;  %v3635_v50 = vpop.permute.xlu2 %643  ;;  %v3650_v29 = vmul.f32 %v3057_v46, %v3531_v60  ;;  %5418 = vst [vmem:[#allocation70_spill] sm:$0xff] %v3654_v23  ;;  %v1315_v20 = vmul.f32 %v5419_v45, %v3553_v31  ;;  %v1316_v1 = vmul.f32 %v5420_v18, %v3553_v31 }
  0xd4   : > { %5413 = vst [vmem:[#allocation66_spill] sm:$0xff] %v3629_v16  ;;  %v1317_v7 = vmul.f32 %v5421_v28, %v3553_v31  ;;  %v1318_v16 = vmul.f32 %v5422_v37, %v3553_v31  ;;  %v3682_v34 = vmul.f32 %v3063_v49, %v3531_v60  ;;  %v3684_v31 = vadd.f32 %v981_v43, %v765_v3 }
  0xd5   : > { %5415 = vst [vmem:[#allocation68_spill] sm:$0xff] %v3635_v50  ;;  %v1135_v33 = vadd.f32 %v1007_v36, %v791_v42  ;;  %v1351_v23 = vmul.f32 %v5432_v30, %v5431_v63  ;;  %v755_v39 = vadd.f32 %v3611_v27, %v5433_v61  ;;  %v756_v11 = vadd.f32 %v3611_v27, %v5434_v19 }
  0xd6   : > { %5416 = vst [vmem:[#allocation69_spill] sm:$0xff] %v3650_v29  ;;  %v3667_v29 = vmul.f32 %v3059_v47, %v3531_v60  ;;  %v5437_v3 = vmov 2   ;;  %v758_v36 = vadd.f32 %v3611_v27, %v3529_v24  ;;  %v3705_v43 = vadd.f32 %v3635_v50, %v3568_v40 }
  0xd7   : > { %5426 = vst [vmem:[#allocation7_spill] sm:$0xff] %v3672_v22  ;;  %v3696_v22 = vadd.f32 %v982_v58, %v766_v9  ;;  %v3735_v42 = vadd.f32 %v1351_v23, %v1135_v33 }
  0xd8   : > { %5423 = vst [vmem:[#allocation5_spill] sm:$0xff] %v3667_v29  ;;  %v3670_v21 = vpop.permute.xlu0 %377  ;;  %v3686_v29 = vadd.f32 %v1015_v26, %v799_v62  ;;  %v3709_v62 = vadd.f32 %v3635_v50, %v3572_v8  ;;  %v3725_v8 = vadd.f32 %v3635_v50, %v3586_v56 }
  0xd9   : > { %5425 = vst [vmem:[#allocation6_spill] sm:$0xff] %v3670_v21  ;;  %v3733_v9 = vmul.f32 %v3057_v46, %v3670_v21  ;;  %v3743_v56 = vmul.f32 %v3059_v47, %v3670_v21  ;;  %v3751_v33 = vmul.f32 %v3063_v49, %v3670_v21 }
  0xda   : > { %5427 = vst [vmem:[#allocation8_spill] sm:$0xff] %v3674_v38  ;;  %v5435_v38 = vld [vmem:[#allocation58_spill] sm:$0xff]  ;;  %v3698_v60 = vpop.permute.xlu1 %852  ;;  %2846 = vset.pattern.permute.xlu1 %v5437_v3 }
  0xdb   : > { %5428 = vst [vmem:[#allocation71_spill] sm:$0xff] %v3678_v5  ;;  %v757_v5 = vadd.f32 %v3611_v27, %v5435_v38  ;;  %2847 = vset.pattern.permute.xlu2 %v5377_v25  ;;  %1168 = vperm.xlu1 %2846, %v3466_v13   ;;  %v971_v58 = vmul.f32 %v3068_v52, %v3698_v60 }
  0xdc   : > { %5429 = vst [vmem:[#allocation72_spill] sm:$0xff] %v3682_v34  ;;  %v3713_v38 = vpop.permute.xlu2 %848  ;;  %v972_v24 = vmul.f32 %v3070_v53, %v3698_v60  ;;  %v973_v40 = vmul.f32 %v3072_v54, %v3698_v60  ;;  %v974_v26 = vmul.f32 %v3074_v55, %v3698_v60  ;;  %v3729_v13 = vadd.f32 %v3635_v50, %v3596_v15  ;;  %v5451_v50 = vld [vmem:[#allocation16_spill] sm:$0xff] }
  0xdd   : > { %5430 = vst [vmem:[#allocation73_spill] sm:$0xff] %v3686_v29  ;;  %v1099_v61 = vadd.f32 %v971_v58, %v755_v39  ;;  %v3747_v15 = vmul.f32 %v3061_v48, %v3670_v21  ;;  %v5450_v21 = vld [vmem:[#allocation15_spill] sm:$0xff] }
  0xde   : > { %5436 = vst [vmem:[#allocation56_spill] sm:$0xff] %v3698_v60  ;;  %v1100_v19 = vadd.f32 %v972_v24, %v756_v11  ;;  %v1101_v3 = vadd.f32 %v973_v40, %v757_v5  ;;  %v1102_v27 = vadd.f32 %v974_v26, %v758_v36  ;;  %v3739_v60 = vmul.f32 %v3068_v52, %v3713_v38  ;;  %v5447_v26 = vld [vmem:[#allocation48_spill] sm:$0xff] }
  0xdf   : > { %5438 = vst [vmem:[#allocation57_spill] sm:$0xff] %v3713_v38  ;;  %v1443_v23 = vadd.f32 %v1315_v20, %v1099_v61  ;;  %v3755_v5 = vmul.f32 %v3070_v53, %v3713_v38  ;;  %v3759_v11 = vmul.f32 %v3072_v54, %v3713_v38  ;;  %v3765_v40 = vmul.f32 %v3074_v55, %v3713_v38 }
  0xe0   : > { %5439 = vst [vmem:[#allocation58_spill] sm:$0xff] %v3729_v13  ;;  %v1444_v39 = vadd.f32 %v1316_v1, %v1100_v19  ;;  %v1445_v58 = vadd.f32 %v1317_v7, %v1101_v3  ;;  %v1446_v24 = vadd.f32 %v1318_v16, %v1102_v27  ;;  %v3769_v20 = vmul.f32 %v5432_v30, %v5447_v26  ;;  %v5459_v13 = vld [vmem:[#allocation42_spill] sm:$0xff] }
  0xe1   : > { %5440 = vst [vmem:[#allocation74_spill] sm:$0xff] %v3733_v9  ;;  %v3761_v36 = vpop.permute.xlu0 %1224  ;;  %vm1571_vm4 = vcmp.ge.f32.partialorder %v1443_v23, 0.0  ;;  %v1699_v16 = vmul.f32 0.01, %v1443_v23  ;;  %v5453_v9 = vld [vmem:[#allocation19_spill] sm:$0xff] }
  0xe2   : > { %5441 = vst [vmem:[#allocation75_spill] sm:$0xff] %v3735_v42  ;;  %v1371_v1 = vmul.f32 %v5419_v45, %v3761_v36  ;;  %v1372_v61 = vmul.f32 %v5420_v18, %v3761_v36  ;;  %v1373_v19 = vmul.f32 %v5421_v28, %v3761_v36  ;;  %v1374_v27 = vmul.f32 %v5422_v37, %v3761_v36 }
  0xe3   : > { %5442 = vst [vmem:[#allocation76_spill] sm:$0xff] %v3743_v56  ;;  %vm1572_vm5 = vcmp.ge.f32.partialorder %v1444_v39, 0.0  ;;  %v1700_v7 = vmul.f32 0.01, %v1444_v39  ;;  %v3779_v3 = vpop.permute.xlu1 %412  ;;  %2849 = vset.pattern.permute.xlu1 %v5377_v25  ;;  %vm1573_vm6 = vcmp.ge.f32.partialorder %v1445_v58, 0.0  ;;  %vm1574_vm11 = vcmp.ge.f32.partialorder %v1446_v24, 0.0 }
  0xe4   : > { %5443 = vst [vmem:[#allocation77_spill] sm:$0xff] %v3747_v15  ;;  %v1499_v38 = vadd.f32 %v1371_v1, %v5450_v21  ;;  %v5452_v15 = vld [vmem:[#allocation18_spill] sm:$0xff]  ;;  %v1502_v26 = vadd.f32 %v1374_v27, %v5453_v9  ;;  %v1701_v34 = vmul.f32 0.01, %v1445_v58 }
  0xe5   : > { %5444 = vst [vmem:[#allocation78_spill] sm:$0xff] %v3751_v33  ;;  %v1500_v33 = vadd.f32 %v1372_v61, %v5451_v50  ;;  %v1501_v56 = vadd.f32 %v1373_v19, %v5452_v15  ;;  %v3786_v63 = vpop.permute.xlu2 %1188  ;;  %v3790_v29 = vsel %vm1572_vm5, %v1444_v39, %v1700_v7  ;;  %v5457_v19 = vld [vmem:[#allocation40_spill] sm:$0xff] }
  0xe6   : > { %5445 = vst [vmem:[#allocation79_spill] sm:$0xff] %v3761_v36  ;;  %vm1627_vm7 = vcmp.ge.f32.partialorder %v1499_v38, 0.0  ;;  %v1755_v30 = vmul.f32 0.01, %v1499_v38  ;;  %vm1630_vm10 = vcmp.ge.f32.partialorder %v1502_v26, 0.0  ;;  %v3792_v61 = vsel %vm1573_vm6, %v1445_v58, %v1701_v34  ;;  %v5458_v36 = vld [vmem:[#allocation41_spill] sm:$0xff] }
  0xe7   : > { %5446 = vst [vmem:[#allocation80_spill] sm:$0xff] %v3765_v40  ;;  %vm1628_vm8 = vcmp.ge.f32.partialorder %v1500_v33, 0.0  ;;  %v1756_v21 = vmul.f32 0.01, %v1500_v33  ;;  %vm1629_vm9 = vcmp.ge.f32.partialorder %v1501_v56, 0.0  ;;  %v3814_v58 = vmul.f32 %v5419_v45, %v3786_v63 }
  0xe8   : > { %5448 = vst [vmem:[#allocation81_spill] sm:$0xff] %v3769_v20  ;;  %v3788_v20 = vsel %vm1571_vm4, %v1443_v23, %v1699_v16  ;;  %v1757_v50 = vmul.f32 0.01, %v1501_v56  ;;  %v1758_v15 = vmul.f32 0.01, %v1502_v26  ;;  %v1883_v1 = vsel %vm1627_vm7, %v1499_v38, %v1755_v30  ;;  %v5456_v23 = vld [vmem:[#allocation39_spill] sm:$0xff] }
  0xe9   : > { %5449 = vst [vmem:[#allocation82_spill] sm:$0xff] %v3779_v3  ;;  %v1884_v9 = vsel %vm1628_vm8, %v1500_v33, %v1756_v21  ;;  %v3794_v25 = vpop.permute.xlu0 %1208  ;;  %v1955_v39 = vpack.c.bf16 %v1883_v1, %v5456_v23  ;;  %v539_v33 = vmul.f32 %v3057_v46, %v3779_v3  ;;  %v5461_v1 = vld [vmem:[#allocation49_spill] sm:$0xff]  ;;  %v5466_v23 = vpack.c.bf16 %v3556_v2, %v3470_v17 }
  0xea   : > { %5454 = vst [vmem:[#allocation15_spill] sm:$0xff] %v3786_v63  ;;  %v1956_v27 = vpack.c.bf16 %v1884_v9, %v5457_v19  ;;  %v1885_v16 = vsel %vm1629_vm9, %v1501_v56, %v1757_v50  ;;  %v1886_v7 = vsel %vm1630_vm10, %v1502_v26, %v1758_v15  ;;  %v1339_v55 = vmul.f32 %v5419_v45, %v3794_v25 }
  0xeb   : > { %5455 = vst [vmem:[#allocation16_spill] sm:$0xff] %v3794_v25  ;;  %v1957_v42 = vpack.c.bf16 %v1885_v16, %v5458_v36  ;;  %v1958_v40 = vpack.c.bf16 %v1886_v7, %v5459_v13  ;;  %v1340_v34 = vmul.f32 %v5420_v18, %v3794_v25  ;;  %2035 = vmatpush.bf16.msra.mxu0 %v1955_v39  ;;  %v1702_v56 = vmul.f32 0.01, %v1446_v24 }
  0xec   : > { %2064 = vmatpush.bf16.msra.mxu1 %v1956_v27  ;;  %v1341_v30 = vmul.f32 %v5421_v28, %v3794_v25  ;;  %v1342_v38 = vmul.f32 %v5422_v37, %v3794_v25  ;;  %v1467_v13 = vadd.f32 %v1339_v55, %v3523_v6  ;;  %v3816_v26 = vpop.permute.xlu1 %1200  ;;  %v5463_v6 = vpack.c.bf16 %v3533_v59, %v3455_v44 }
  0xed   : > { %2093 = vmatpush.bf16.msra.mxu2 %v1957_v42  ;;  %2122 = vmatpush.bf16.msra.mxu3 %v1958_v40  ;;  %v1468_v36 = vadd.f32 %v1340_v34, %v3525_v4  ;;  %5460 = vst [vmem:[#allocation18_spill] sm:$0xff] %v3816_v26  ;;  %v3821_v15 = vsel %vm1574_vm11, %v1446_v24, %v1702_v56  ;;  %v5469_v34 = vld [vmem:[#allocation7_spill] sm:$0xff] }
  0xee   : > { %v1469_v21 = vadd.f32 %v1341_v30, %v3538_v57  ;;  %v1470_v50 = vadd.f32 %v1342_v38, %v3549_v51  ;;  %v747_v42 = vadd.f32 %v5461_v1, %v539_v33  ;;  %v3824_v40 = vpop.permute.xlu2 %638  ;;  %vm1595_vm12 = vcmp.ge.f32.partialorder %v1467_v13, 0.0  ;;  %v5470_v38 = vld [vmem:[#allocation8_spill] sm:$0xff] }
  0xef   : > { %5462 = vst [vmem:[#allocation19_spill] sm:$0xff] %v3824_v40  ;;  %v1723_v55 = vmul.f32 0.01, %v1467_v13  ;;  %vm1596_vm13 = vcmp.ge.f32.partialorder %v1468_v36, 0.0  ;;  %v1724_v4 = vmul.f32 0.01, %v1468_v36  ;;  %2036 = vmatpush.bf16.msra.mxu0 %v5463_v6  ;;  %v5464_v57 = vpack.c.bf16 %v3542_v12, %v3457_v35 }
  0xf0   : > { %vm1597_vm14 = vcmp.ge.f32.partialorder %v1469_v21, 0.0  ;;  %v1725_v51 = vmul.f32 0.01, %v1469_v21  ;;  %vm1598_vm15 = vcmp.ge.f32.partialorder %v1470_v50, 0.0  ;;  %v1726_v24 = vmul.f32 0.01, %v1470_v50 }
  0xf1   : > { %2065 = vmatpush.bf16.msra.mxu1 %v5464_v57  ;;  %v5465_v9 = vpack.c.bf16 %v3545_v10, %v3468_v14  ;;  %2123 = vmatpush.bf16.msra.mxu3 %v5466_v23  ;;  %v1851_v39 = vsel %vm1595_vm12, %v1467_v13, %v1723_v55  ;;  %v1852_v19 = vsel %vm1596_vm13, %v1468_v36, %v1724_v4  ;;  %v3840_v44 = vpop.permute.xlu0 %1192  ;;  %v5468_v10 = vld [vmem:[#allocation70_spill] sm:$0xff] }
  0xf2   : > { %v1323_v59 = vmul.f32 %v5419_v45, %v3816_v26  ;;  %5467 = vst [vmem:[#allocation39_spill] sm:$0xff] %v3840_v44  ;;  %v1939_v35 = vpack.c.bf16 %v1851_v39, %v3638_v32  ;;  %v1940_v12 = vpack.c.bf16 %v1852_v19, %v3641_v41  ;;  %v1853_v27 = vsel %vm1597_vm14, %v1469_v21, %v1725_v51 }
  0xf3   : > { %2094 = vmatpush.bf16.msra.mxu2 %v5465_v9  ;;  %v1854_v16 = vsel %vm1598_vm15, %v1470_v50, %v1726_v24  ;;  %v1941_v14 = vpack.c.bf16 %v1853_v27, %v3645_v0  ;;  %v1324_v2 = vmul.f32 %v5420_v18, %v3816_v26  ;;  %v1325_v30 = vmul.f32 %v5421_v28, %v3816_v26 }
  0xf4   : > { %v1942_v7 = vpack.c.bf16 %v1854_v16, %v5468_v10  ;;  %v1451_v17 = vadd.f32 %v1323_v59, %v5469_v34  ;;  %2037 = vmatpush.bf16.msra.mxu0 %v1939_v35  ;;  %v1326_v32 = vmul.f32 %v5422_v37, %v3816_v26  ;;  %v1091_v41 = vadd.f32 %v3739_v60, %v747_v42 }
  0xf5   : > { %2066 = vmatpush.bf16.msra.mxu1 %v1940_v12  ;;  %v1452_v56 = vadd.f32 %v1324_v2, %v5470_v38  ;;  %v1307_v33 = vmul.f32 %v5419_v45, %v3840_v44  ;;  %v1453_v13 = vadd.f32 %v1325_v30, %v3684_v31  ;;  %v540_v21 = vmul.f32 %v3059_v47, %v3779_v3  ;;  %v3863_v60 = vpop.permute.xlu1 %844 }
  0xf6   : > { %2124 = vmatpush.bf16.msra.mxu3 %v1942_v7  ;;  %vm1579_vm0 = vcmp.ge.f32.partialorder %v1451_v17, 0.0  ;;  %v1707_v0 = vmul.f32 0.01, %v1451_v17  ;;  %v1454_v36 = vadd.f32 %v1326_v32, %v3696_v22  ;;  %v1300_v50 = vmul.f32 %v5420_v18, %v3786_v63  ;;  %5471 = vst [vmem:[#allocation40_spill] sm:$0xff] %v3863_v60 }
  0xf7   : > { %2095 = vmatpush.bf16.msra.mxu2 %v1941_v14  ;;  %vm1580_vm1 = vcmp.ge.f32.partialorder %v1452_v56, 0.0  ;;  %v1708_v55 = vmul.f32 0.01, %v1452_v56  ;;  %v1435_v4 = vadd.f32 %v1307_v33, %v1091_v41  ;;  %vm1581_vm2 = vcmp.ge.f32.partialorder %v1453_v13, 0.0  ;;  %v3866_v31 = vpop.permute.xlu2 %840 }
  0xf8   : > { %v1835_v42 = vsel %vm1579_vm0, %v1451_v17, %v1707_v0  ;;  %v1709_v57 = vmul.f32 0.01, %v1453_v13  ;;  %vm1582_vm3 = vcmp.ge.f32.partialorder %v1454_v36, 0.0  ;;  %5472 = vst [vmem:[#allocation41_spill] sm:$0xff] %v3866_v31  ;;  %v1710_v51 = vmul.f32 0.01, %v1454_v36 }
  0xf9   : > { %v1931_v6 = vpack.c.bf16 %v1835_v42, %v3788_v20  ;;  %v1836_v22 = vsel %vm1580_vm1, %v1452_v56, %v1708_v55  ;;  %v955_v24 = vmul.f32 %v3068_v52, %v3863_v60  ;;  %vm1563_vm4 = vcmp.ge.f32.partialorder %v1435_v4, 0.0  ;;  %v5475_v42 = vld [vmem:[#allocation4_spill] sm:$0xff] }
  0xfa   : > { %v1932_v9 = vpack.c.bf16 %v1836_v22, %v3790_v29  ;;  %v1837_v23 = vsel %vm1581_vm2, %v1453_v13, %v1709_v57  ;;  %v1691_v39 = vmul.f32 0.01, %v1435_v4  ;;  %v748_v19 = vadd.f32 %v5461_v1, %v540_v21  ;;  %v5476_v57 = vld [vmem:[#allocation80_spill] sm:$0xff] }
  0xfb   : > { %2038 = vmatpush.bf16.msra.mxu0 %v1931_v6  ;;  %v1933_v20 = vpack.c.bf16 %v1837_v23, %v3792_v61  ;;  %v1838_v59 = vsel %vm1582_vm3, %v1454_v36, %v1710_v51  ;;  %v1083_v35 = vadd.f32 %v955_v24, %v3705_v43  ;;  %v956_v12 = vmul.f32 %v3070_v53, %v3863_v60 }
  0xfc   : > { %2067 = vmatpush.bf16.msra.mxu1 %v1932_v9  ;;  %v1934_v27 = vpack.c.bf16 %v1838_v59, %v3821_v15  ;;  %v1819_v16 = vsel %vm1563_vm4, %v1435_v4, %v1691_v39  ;;  %v1092_v14 = vadd.f32 %v3755_v5, %v748_v19  ;;  %v1308_v29 = vmul.f32 %v5420_v18, %v3840_v44  ;;  %v5477_v9 = vld [vmem:[#allocation58_spill] sm:$0xff] }
  0xfd   : > { %2096 = vmatpush.bf16.msra.mxu2 %v1933_v20  ;;  %v1427_v10 = vadd.f32 %v3814_v58, %v1083_v35  ;;  %v1084_v61 = vadd.f32 %v956_v12, %v3709_v62  ;;  %v541_v43 = vmul.f32 %v3061_v48, %v3779_v3  ;;  %v957_v7 = vmul.f32 %v3072_v54, %v3863_v60 }
  0xfe   : > { %2125 = vmatpush.bf16.msra.mxu3 %v1934_v27  ;;  %v1436_v34 = vadd.f32 %v1308_v29, %v1092_v14  ;;  %v1301_v15 = vmul.f32 %v5421_v28, %v3786_v63  ;;  %v1309_v5 = vmul.f32 %v5421_v28, %v3840_v44  ;;  %v542_v17 = vmul.f32 %v3063_v49, %v3779_v3  ;;  %v3893_v30 = vpop.permute.xlu1 %402  ;;  %v5478_v27 = vld [vmem:[#allocation75_spill] sm:$0xff] }
  0xff   : > { %vm1555_vm5 = vcmp.ge.f32.partialorder %v1427_v10, 0.0  ;;  %v1683_v58 = vmul.f32 0.01, %v1427_v10  ;;  %v1428_v62 = vadd.f32 %v1300_v50, %v1084_v61  ;;  %v749_v2 = vadd.f32 %v5461_v1, %v541_v43  ;;  %5473 = vst [vmem:[#allocation42_spill] sm:$0xff] %v3893_v30 }
 0x100   : > { %vm1564_vm6 = vcmp.ge.f32.partialorder %v1436_v34, 0.0  ;;  %v1692_v32 = vmul.f32 0.01, %v1436_v34  ;;  %v1085_v41 = vadd.f32 %v957_v7, %v3725_v8  ;;  %v750_v0 = vadd.f32 %v5461_v1, %v542_v17  ;;  %v3897_v38 = vpop.permute.xlu2 %1180 }
 0x101   : > { %5474 = vst [vmem:[#allocation70_spill] sm:$0xff] %v3897_v38  ;;  %v1811_v56 = vsel %vm1555_vm5, %v1427_v10, %v1683_v58  ;;  %vm1556_vm7 = vcmp.ge.f32.partialorder %v1428_v62, 0.0  ;;  %v1684_v33 = vmul.f32 0.01, %v1428_v62  ;;  %v1093_v13 = vadd.f32 %v3759_v11, %v749_v2 }
 0x102   : > { %v1923_v36 = vpack.c.bf16 %v1819_v16, %v1811_v56  ;;  %v1820_v21 = vsel %vm1564_vm6, %v1436_v34, %v1692_v32  ;;  %v1429_v50 = vadd.f32 %v1301_v15, %v1085_v41  ;;  %v958_v55 = vmul.f32 %v5475_v42, %v3863_v60  ;;  %v5481_v32 = vld [vmem:[#allocation2_spill] sm:$0xff] }
 0x103   : > { %v1812_v4 = vsel %vm1556_vm7, %v1428_v62, %v1684_v33  ;;  %v1437_v6 = vadd.f32 %v1309_v5, %v1093_v13  ;;  %v1094_v22 = vadd.f32 %v5476_v57, %v750_v0  ;;  %v1302_v8 = vmul.f32 %v5422_v37, %v3786_v63  ;;  %v5480_v5 = vld [vmem:[#allocation65_spill] sm:$0xff] }
 0x104   : > { %2039 = vmatpush.bf16.msra.mxu0 %v1923_v36  ;;  %v1924_v51 = vpack.c.bf16 %v1820_v21, %v1812_v4  ;;  %vm1557_vm8 = vcmp.ge.f32.partialorder %v1429_v50, 0.0  ;;  %v1685_v24 = vmul.f32 0.01, %v1429_v50  ;;  %v1086_v23 = vadd.f32 %v958_v55, %v5477_v9  ;;  %v5483_v4 = vld [vmem:[#allocation66_spill] sm:$0xff] }
 0x105   : > { %vm1565_vm9 = vcmp.ge.f32.partialorder %v1437_v6, 0.0  ;;  %v1693_v11 = vmul.f32 0.01, %v1437_v6  ;;  %v1310_v39 = vmul.f32 %v5422_v37, %v3840_v44  ;;  %v523_v19 = vmul.f32 %v3057_v46, %v3893_v30 }
 0x106   : > { %2068 = vmatpush.bf16.msra.mxu1 %v1924_v51  ;;  %v1813_v20 = vsel %vm1557_vm8, %v1429_v50, %v1685_v24  ;;  %v1430_v59 = vadd.f32 %v1302_v8, %v1086_v23  ;;  %v947_v35 = vmul.f32 %v3068_v52, %v3866_v31  ;;  %v524_v12 = vmul.f32 %v3059_v47, %v3893_v30  ;;  %v3918_v7 = vpop.permute.xlu1 %633  ;;  %v5484_v8 = vld [vmem:[#allocation67_spill] sm:$0xff] }
 0x107   : > { %vm1607_vm10 = vcmp.ge.f32.partialorder %v5478_v27, 0.0  ;;  %v1821_v16 = vsel %vm1565_vm9, %v1437_v6, %v1693_v11  ;;  %v1438_v14 = vadd.f32 %v1310_v39, %v1094_v22  ;;  %v731_v29 = vadd.f32 %v3824_v40, %v523_v19  ;;  %5479 = vst [vmem:[#allocation7_spill] sm:$0xff] %v3918_v7  ;;  %v5485_v19 = vld [vmem:[#allocation69_spill] sm:$0xff] }
 0x108   : > { %v948_v10 = vmul.f32 %v3070_v53, %v3866_v31  ;;  %v1925_v61 = vpack.c.bf16 %v1821_v16, %v1813_v20  ;;  %vm1558_vm11 = vcmp.ge.f32.partialorder %v1430_v59, 0.0  ;;  %v1686_v43 = vmul.f32 0.01, %v1430_v59  ;;  %v5487_v16 = vld [vmem:[#allocation71_spill] sm:$0xff] }
 0x109   : > { %v732_v34 = vadd.f32 %v3824_v40, %v524_v12  ;;  %vm1566_vm12 = vcmp.ge.f32.partialorder %v1438_v14, 0.0  ;;  %v1694_v15 = vmul.f32 0.01, %v1438_v14  ;;  %v723_v17 = vadd.f32 %v3918_v7, %v5480_v5  ;;  %v3930_v33 = vpop.permute.xlu2 %623 }
 0x10a   : > { %v1735_v58 = vmul.f32 0.01, %v5478_v27  ;;  %2097 = vmatpush.bf16.msra.mxu2 %v1925_v61  ;;  %v1814_v62 = vsel %vm1558_vm11, %v1430_v59, %v1686_v43  ;;  %v3924_v2 = vadd.f32 %v947_v35, %v731_v29  ;;  %v724_v41 = vadd.f32 %v3918_v7, %v5481_v32  ;;  %5482 = vst [vmem:[#allocation8_spill] sm:$0xff] %v3930_v33  ;;  %v5486_v35 = vld [vmem:[#allocation5_spill] sm:$0xff]  ;;  %v5488_v29 = vld [vmem:[#allocation79_spill] sm:$0xff]  ;;  %v5490_v43 = vld [vmem:[#allocation72_spill] sm:$0xff] }
 0x10b   : > { %v525_v0 = vmul.f32 %v3061_v48, %v3893_v30  ;;  %v1822_v56 = vsel %vm1566_vm12, %v1438_v14, %v1694_v15  ;;  %v3932_v13 = vadd.f32 %v948_v10, %v732_v34  ;;  %v949_v36 = vmul.f32 %v3072_v54, %v3866_v31  ;;  %v5489_v10 = vld [vmem:[#allocation13_spill] sm:$0xff]  ;;  %v5491_v15 = vld [vmem:[#allocation23_spill] sm:$0xff] }
 0x10c   : > { %v526_v21 = vmul.f32 %v3063_v49, %v3893_v30  ;;  %v1926_v50 = vpack.c.bf16 %v1822_v56, %v1814_v62  ;;  %v1283_v55 = vmul.f32 %v5419_v45, %v3897_v38  ;;  %v725_v6 = vadd.f32 %v3918_v7, %v5483_v4  ;;  %v5492_v62 = vld [vmem:[#allocation28_spill] sm:$0xff]  ;;  %v5496_v4 = vld [vmem:[#allocation73_spill] sm:$0xff] }
 0x10d   : > { %v733_v57 = vadd.f32 %v3824_v40, %v525_v0  ;;  %v1284_v22 = vmul.f32 %v5420_v18, %v3897_v38  ;;  %v726_v51 = vadd.f32 %v3918_v7, %v5484_v8  ;;  %v950_v9 = vmul.f32 %v5475_v42, %v3866_v31  ;;  %v5493_v0 = vld [vmem:[#allocation34_spill] sm:$0xff] }
 0x10e   : > { %v734_v24 = vadd.f32 %v3824_v40, %v526_v21  ;;  %2126 = vmatpush.bf16.msra.mxu3 %v1926_v50  ;;  %v1285_v11 = vmul.f32 %v5421_v28, %v3897_v38  ;;  %v1286_v39 = vmul.f32 %v5422_v37, %v3897_v38  ;;  %v3958_v20 = vadd.f32 %v3930_v33, %v5485_v19  ;;  %v5495_v21 = vld [vmem:[#allocation24_spill] sm:$0xff] }
 0x10f   : > { %v3950_v23 = vadd.f32 %v949_v36, %v733_v57  ;;  %v3964_v12 = vadd.f32 %v3930_v33, %v5486_v35  ;;  %v3968_v14 = vadd.f32 %v3930_v33, %v5487_v16  ;;  %v1375_v61 = vmul.f32 %v5489_v10, %v5488_v29  ;;  %v3984_v36 = vpop.permute.xlu1 %836  ;;  %v5497_v57 = vld [vmem:[#allocation81_spill] sm:$0xff]  ;;  %v5499_v19 = vld [vmem:[#allocation12_spill] sm:$0xff]  ;;  %v4000_v16 = vpop.permute.xlu0 %1176 }
 0x110   : > { %v3960_v59 = vadd.f32 %v950_v9, %v734_v24  ;;  %v3974_v34 = vadd.f32 %v3930_v33, %v5490_v43  ;;  %v1376_v5 = vmul.f32 %v5491_v15, %v5488_v29  ;;  %v1377_v32 = vmul.f32 %v5492_v62, %v5488_v29  ;;  %5494 = vst [vmem:[#allocation4_spill] sm:$0xff] %v3984_v36  ;;  %v5498_v9 = vld [vmem:[#allocation14_spill] sm:$0xff]  ;;  %v5503_v33 = vld [vmem:[#allocation37_spill] sm:$0xff] }
 0x111   : > { %v3982_v56 = vmul.f32 %v5493_v0, %v5488_v29  ;;  %v1503_v50 = vadd.f32 %v1375_v61, %v5495_v21  ;;  %v3989_v8 = vadd.f32 %v5497_v57, %v5496_v4  ;;  %v3994_v24 = vsel %vm1607_vm10, %v5478_v27, %v1735_v58  ;;  %5500 = vst [vmem:[#allocation80_spill] sm:$0xff] %v4000_v16  ;;  %v5502_v4 = vld [vmem:[#allocation31_spill] sm:$0xff] }
 0x112   : > { %v3998_v35 = vmul.f32 %v5499_v19, %v5498_v9  ;;  %v939_v29 = vmul.f32 %v3068_v52, %v3984_v36  ;;  %v940_v61 = vmul.f32 %v3070_v53, %v3984_v36  ;;  %v941_v43 = vmul.f32 %v3072_v54, %v3984_v36  ;;  %v4010_v27 = vpop.permute.xlu2 %832 }
 0x113   : > { %v942_v21 = vmul.f32 %v5475_v42, %v3984_v36  ;;  %5501 = vst [vmem:[#allocation58_spill] sm:$0xff] %v4010_v27  ;;  %vm1631_vm13 = vcmp.ge.f32.partialorder %v1503_v50, 0.0  ;;  %v1759_v58 = vmul.f32 0.01, %v1503_v50  ;;  %v1504_v57 = vadd.f32 %v1376_v5, %v5502_v4  ;;  %v5505_v36 = vld [vmem:[#allocation21_spill] sm:$0xff] }
 0x114   : > { %v1505_v38 = vadd.f32 %v1377_v32, %v5503_v33  ;;  %v1067_v40 = vadd.f32 %v939_v29, %v723_v17  ;;  %v1068_v7 = vadd.f32 %v940_v61, %v724_v41  ;;  %v1069_v31 = vadd.f32 %v941_v43, %v725_v6 }
 0x115   : > { %v1070_v30 = vadd.f32 %v942_v21, %v726_v51  ;;  %v931_v44 = vmul.f32 %v3068_v52, %v4010_v27  ;;  %v1275_v63 = vmul.f32 %v5419_v45, %v4000_v16  ;;  %v4018_v1 = vsel %vm1631_vm13, %v1503_v50, %v1759_v58 }
 0x116   : > { %5504 = vst [vmem:[#allocation75_spill] sm:$0xff] %v4018_v1  ;;  %v4022_v60 = vmul.f32 %v5499_v19, %v5505_v36  ;;  %v1411_v3 = vadd.f32 %v1283_v55, %v1067_v40  ;;  %v1412_v5 = vadd.f32 %v1284_v22, %v1068_v7  ;;  %v1413_v4 = vadd.f32 %v1285_v11, %v1069_v31  ;;  %v5510_v19 = vld [vmem:[#allocation51_spill] sm:$0xff]  ;;  %v5511_v36 = vld [vmem:[#allocation45_spill] sm:$0xff] }
 0x117   : > { %v1414_v33 = vadd.f32 %v1286_v39, %v1070_v30  ;;  %v932_v17 = vmul.f32 %v3070_v53, %v4010_v27  ;;  %v933_v41 = vmul.f32 %v3072_v54, %v4010_v27  ;;  %vm1632_vm14 = vcmp.ge.f32.partialorder %v1504_v57, 0.0 }
 0x118   : > { %vm1539_vm15 = vcmp.ge.f32.partialorder %v1411_v3, 0.0  ;;  %v1667_v32 = vmul.f32 0.01, %v1411_v3  ;;  %vm1540_vm0 = vcmp.ge.f32.partialorder %v1412_v5, 0.0  ;;  %v1668_v50 = vmul.f32 0.01, %v1412_v5  ;;  %v4030_v31 = vpop.permute.xlu1 %392 }
 0x119   : > { %vm1541_vm1 = vcmp.ge.f32.partialorder %v1413_v4, 0.0  ;;  %v1669_v29 = vmul.f32 0.01, %v1413_v4  ;;  %vm1542_vm2 = vcmp.ge.f32.partialorder %v1414_v33, 0.0  ;;  %v1670_v40 = vmul.f32 0.01, %v1414_v33 }
 0x11a   : > { %5507 = vst [vmem:[#allocation65_spill] sm:$0xff] %v4030_v31  ;;  %v4032_v30 = vsel %vm1539_vm15, %v1411_v3, %v1667_v32  ;;  %v4034_v7 = vsel %vm1540_vm0, %v1412_v5, %v1668_v50  ;;  %v1276_v55 = vmul.f32 %v5420_v18, %v4000_v16  ;;  %v934_v22 = vmul.f32 %v5475_v42, %v4010_v27  ;;  %v5509_v32 = vld [vmem:[#allocation63_spill] sm:$0xff] }
 0x11b   : > { %v4040_v11 = vsel %vm1541_vm1, %v1413_v4, %v1669_v29  ;;  %v507_v39 = vmul.f32 %v3057_v46, %v4030_v31  ;;  %v508_v61 = vmul.f32 %v3059_v47, %v4030_v31  ;;  %v1277_v3 = vmul.f32 %v5421_v28, %v4000_v16  ;;  %v4048_v43 = vpop.permute.xlu2 %1172 }
 0x11c   : > { %5508 = vst [vmem:[#allocation2_spill] sm:$0xff] %v4048_v43  ;;  %v4050_v21 = vsel %vm1542_vm2, %v1414_v33, %v1670_v40  ;;  %v509_v58 = vmul.f32 %v3061_v48, %v4030_v31  ;;  %v510_v5 = vmul.f32 %v3063_v49, %v4030_v31  ;;  %v1760_v4 = vmul.f32 0.01, %v1504_v57 }
 0x11d   : > { %v715_v50 = vadd.f32 %v5509_v32, %v507_v39  ;;  %v4059_v29 = vmul.f32 %v5419_v45, %v4048_v43  ;;  %v716_v51 = vadd.f32 %v5509_v32, %v508_v61  ;;  %v1278_v27 = vmul.f32 %v5422_v37, %v4000_v16 }
 0x11e   : > { %v4066_v33 = vmul.f32 %v5420_v18, %v4048_v43  ;;  %v717_v40 = vadd.f32 %v5509_v32, %v509_v58  ;;  %v4071_v31 = vmul.f32 %v5421_v28, %v4048_v43  ;;  %v718_v39 = vadd.f32 %v5509_v32, %v510_v5 }
 0x11f   : > { %v1059_v26 = vadd.f32 %v931_v44, %v715_v50  ;;  %v1060_v6 = vadd.f32 %v932_v17, %v716_v51  ;;  %v4075_v1 = vsel %vm1632_vm14, %v1504_v57, %v1760_v4  ;;  %vm1633_vm3 = vcmp.ge.f32.partialorder %v1505_v38, 0.0 }
 0x120   : > { %v1061_v61 = vadd.f32 %v933_v41, %v717_v40  ;;  %v1062_v16 = vadd.f32 %v934_v22, %v718_v39  ;;  %v1761_v10 = vmul.f32 0.01, %v1505_v38  ;;  %v4081_v62 = vmul.f32 %v5422_v37, %v4048_v43  ;;  %v4111_v40 = vpop.permute.xlu0 %1164 }
 0x121   : > { %v1403_v0 = vadd.f32 %v1275_v63, %v1059_v26  ;;  %v1404_v58 = vadd.f32 %v1276_v55, %v1060_v6  ;;  %v4085_v44 = vadd.f32 %v3982_v56, %v5511_v36  ;;  %v1743_v41 = vmul.f32 0.01, %v3989_v8  ;;  %v4090_v22 = vpop.permute.xlu1 %1184  ;;  %5514 = vst [vmem:[#allocation69_spill] sm:$0xff] %v4111_v40 }
 0x122   : > { %v1405_v17 = vadd.f32 %v1277_v3, %v1061_v61  ;;  %v1406_v57 = vadd.f32 %v1278_v27, %v1062_v16  ;;  %v4087_v51 = vsel %vm1633_vm3, %v1505_v38, %v1761_v10  ;;  %5512 = vst [vmem:[#allocation66_spill] sm:$0xff] %v4090_v22  ;;  %vm1615_vm6 = vcmp.ge.f32.partialorder %v3989_v8, 0.0 }
 0x123   : > { %vm1531_vm4 = vcmp.ge.f32.partialorder %v1403_v0, 0.0  ;;  %v1659_v5 = vmul.f32 0.01, %v1403_v0  ;;  %vm1532_vm5 = vcmp.ge.f32.partialorder %v1404_v58, 0.0  ;;  %v1660_v63 = vmul.f32 0.01, %v1404_v58 }
 0x124   : > { %v1291_v26 = vmul.f32 %v5419_v45, %v4090_v22  ;;  %v1292_v56 = vmul.f32 %v5420_v18, %v4090_v22  ;;  %v1293_v38 = vmul.f32 %v5421_v28, %v4090_v22  ;;  %v1294_v10 = vmul.f32 %v5422_v37, %v4090_v22  ;;  %v4101_v36 = vpop.permute.xlu2 %618 }
 0x125   : > { %5513 = vst [vmem:[#allocation67_spill] sm:$0xff] %v4101_v36  ;;  %v4103_v16 = vsel %vm1531_vm4, %v1403_v0, %v1659_v5  ;;  %v4105_v27 = vsel %vm1532_vm5, %v1404_v58, %v1660_v63  ;;  %vm1533_vm7 = vcmp.ge.f32.partialorder %v1405_v17, 0.0  ;;  %v1661_v6 = vmul.f32 0.01, %v1405_v17  ;;  %v5515_v0 = vld [vmem:[#allocation52_spill] sm:$0xff] }
 0x126   : > { %v1419_v55 = vadd.f32 %v1291_v26, %v3924_v2  ;;  %v1420_v3 = vadd.f32 %v1292_v56, %v3932_v13  ;;  %v1421_v4 = vadd.f32 %v1293_v38, %v3950_v23  ;;  %v1422_v50 = vadd.f32 %v1294_v10, %v3960_v59 }
 0x127   : > { %v4113_v39 = vsel %vm1533_vm7, %v1405_v17, %v1661_v6  ;;  %vm1534_vm8 = vcmp.ge.f32.partialorder %v1406_v57, 0.0  ;;  %v1662_v61 = vmul.f32 0.01, %v1406_v57  ;;  %v4121_v17 = vmul.f32 %v5419_v45, %v4111_v40 }
 0x128   : > { %vm1547_vm9 = vcmp.ge.f32.partialorder %v1419_v55, 0.0  ;;  %v1675_v5 = vmul.f32 0.01, %v1419_v55  ;;  %vm1548_vm10 = vcmp.ge.f32.partialorder %v1420_v3, 0.0  ;;  %v1676_v63 = vmul.f32 0.01, %v1420_v3 }
 0x129   : > { %vm1549_vm11 = vcmp.ge.f32.partialorder %v1421_v4, 0.0  ;;  %v1677_v2 = vmul.f32 0.01, %v1421_v4  ;;  %vm1550_vm12 = vcmp.ge.f32.partialorder %v1422_v50, 0.0  ;;  %v1678_v13 = vmul.f32 0.01, %v1422_v50 }
 0x12a   : > { %v1803_v23 = vsel %vm1547_vm9, %v1419_v55, %v1675_v5  ;;  %v1804_v26 = vsel %vm1548_vm10, %v1420_v3, %v1676_v63  ;;  %v4117_v59 = vsel %vm1534_vm8, %v1406_v57, %v1662_v61  ;;  %v4125_v58 = vpop.permute.xlu1 %828  ;;  %v4131_v57 = vmul.f32 %v5420_v18, %v4111_v40 }
 0x12b   : > { %v1915_v56 = vpack.c.bf16 %v1803_v23, %v4032_v30  ;;  %v1916_v38 = vpack.c.bf16 %v1804_v26, %v4034_v7  ;;  %v1805_v10 = vsel %vm1549_vm11, %v1421_v4, %v1677_v2  ;;  %v1806_v6 = vsel %vm1550_vm12, %v1422_v50, %v1678_v13  ;;  %5516 = vst [vmem:[#allocation5_spill] sm:$0xff] %v4125_v58 }
 0x12c   : > { %v1917_v25 = vpack.c.bf16 %v1805_v10, %v4040_v11  ;;  %v1918_v43 = vpack.c.bf16 %v1806_v6, %v4050_v21  ;;  %v4135_v55 = vmul.f32 %v5421_v28, %v4111_v40  ;;  %v923_v30 = vmul.f32 %v3068_v52, %v4125_v58 }
 0x12d   : > { %2040 = vmatpush.bf16.msra.mxu0 %v1915_v56  ;;  %2069 = vmatpush.bf16.msra.mxu1 %v1916_v38  ;;  %v924_v7 = vmul.f32 %v3070_v53, %v4125_v58  ;;  %v925_v11 = vmul.f32 %v3072_v54, %v4125_v58  ;;  %vm1634_vm13 = vcmp.ge.f32.partialorder %v4085_v44, 0.0  ;;  %v4144_v21 = vpop.permute.xlu2 %824  ;;  %v926_v3 = vmul.f32 %v5475_v42, %v4125_v58  ;;  %v5519_v38 = vld [vmem:[#allocation62_spill] sm:$0xff] }
 0x12e   : > { %2098 = vmatpush.bf16.msra.mxu2 %v1917_v25  ;;  %2127 = vmatpush.bf16.msra.mxu3 %v1918_v43  ;;  %5517 = vst [vmem:[#allocation71_spill] sm:$0xff] %v4144_v21  ;;  %v4150_v4 = vmul.f32 %v5422_v37, %v4111_v40  ;;  %v1762_v50 = vmul.f32 0.01, %v4085_v44  ;;  %v4156_v61 = vsel %vm1615_vm6, %v3989_v8, %v1743_v41  ;;  %v5518_v8 = vld [vmem:[#allocation29_spill] sm:$0xff] }
 0x12f   : > { %v1051_v5 = vadd.f32 %v923_v30, %v3958_v20  ;;  %v1052_v25 = vadd.f32 %v924_v7, %v3964_v12  ;;  %v1053_v43 = vadd.f32 %v925_v11, %v3968_v14  ;;  %v915_v63 = vmul.f32 %v3068_v52, %v4144_v21  ;;  %v5521_v7 = vld [vmem:[#allocation9_spill] sm:$0xff] }
 0x130   : > { %v1054_v2 = vadd.f32 %v926_v3, %v3974_v34  ;;  %v4165_v13 = vsel %vm1634_vm13, %v4085_v44, %v1762_v50  ;;  %v792_v41 = vadd.f32 %v5518_v8, %v3998_v35  ;;  %v916_v26 = vmul.f32 %v3070_v53, %v4144_v21  ;;  %v5522_v3 = vld [vmem:[#allocation35_spill] sm:$0xff]  ;;  %v5523_v50 = vld [vmem:[#allocation17_spill] sm:$0xff] }
 0x131   : > { %v1395_v20 = vadd.f32 %v4059_v29, %v1051_v5  ;;  %v1396_v12 = vadd.f32 %v4066_v33, %v1052_v25  ;;  %v1397_v14 = vadd.f32 %v4071_v31, %v1053_v43  ;;  %v917_v44 = vmul.f32 %v3072_v54, %v4144_v21 }
 0x132   : > { %v1398_v34 = vadd.f32 %v4081_v62, %v1054_v2  ;;  %v918_v56 = vmul.f32 %v5475_v42, %v4144_v21  ;;  %v800_v11 = vadd.f32 %v5521_v7, %v4022_v60  ;;  %v1008_v5 = vmul.f32 %v5523_v50, %v5522_v3  ;;  %v5537_v21 = vld [vmem:[#allocation32_spill] sm:$0xff] }
 0x133   : > { %vm1523_vm14 = vcmp.ge.f32.partialorder %v1395_v20, 0.0  ;;  %v1651_v29 = vmul.f32 0.01, %v1395_v20  ;;  %vm1524_vm15 = vcmp.ge.f32.partialorder %v1396_v12, 0.0  ;;  %v1652_v33 = vmul.f32 0.01, %v1396_v12  ;;  %v4183_v6 = vpop.permute.xlu1 %382 }
 0x134   : > { %vm1525_vm0 = vcmp.ge.f32.partialorder %v1397_v14, 0.0  ;;  %v1653_v31 = vmul.f32 0.01, %v1397_v14  ;;  %vm1526_vm1 = vcmp.ge.f32.partialorder %v1398_v34, 0.0  ;;  %v1654_v10 = vmul.f32 0.01, %v1398_v34 }
 0x135   : > { %5520 = vst [vmem:[#allocation79_spill] sm:$0xff] %v4183_v6  ;;  %v1779_v62 = vsel %vm1523_vm14, %v1395_v20, %v1651_v29  ;;  %v1780_v30 = vsel %vm1524_vm15, %v1396_v12, %v1652_v33  ;;  %v491_v20 = vmul.f32 %v3057_v46, %v4183_v6  ;;  %v492_v12 = vmul.f32 %v3059_v47, %v4183_v6  ;;  %v5525_v29 = vld [vmem:[#allocation20_spill] sm:$0xff] }
 0x136   : > { %v1907_v25 = vpack.c.bf16 %v4103_v16, %v1779_v62  ;;  %v1908_v43 = vpack.c.bf16 %v4105_v27, %v1780_v30  ;;  %v1781_v2 = vsel %vm1525_vm0, %v1397_v14, %v1653_v31  ;;  %v1782_v23 = vsel %vm1526_vm1, %v1398_v34, %v1654_v10  ;;  %v5524_v27 = vld [vmem:[#allocation11_spill] sm:$0xff]  ;;  %v5526_v31 = vld [vmem:[#allocation48_spill] sm:$0xff] }
 0x137   : > { %v1909_v35 = vpack.c.bf16 %v4113_v39, %v1781_v2  ;;  %v1910_v40 = vpack.c.bf16 %v4117_v59, %v1782_v23  ;;  %v493_v60 = vmul.f32 %v3061_v48, %v4183_v6  ;;  %v494_v16 = vmul.f32 %v3063_v49, %v4183_v6 }
 0x138   : > { %2041 = vmatpush.bf16.msra.mxu0 %v1907_v25  ;;  %2070 = vmatpush.bf16.msra.mxu1 %v1908_v43  ;;  %v1016_v14 = vmul.f32 %v5523_v50, %v5524_v27  ;;  %v699_v39 = vadd.f32 %v4101_v36, %v491_v20  ;;  %v700_v46 = vadd.f32 %v4101_v36, %v492_v12  ;;  %v5530_v43 = vld [vmem:[#allocation27_spill] sm:$0xff]  ;;  %v5531_v12 = vld [vmem:[#allocation74_spill] sm:$0xff] }
 0x139   : > { %2099 = vmatpush.bf16.msra.mxu2 %v1909_v35  ;;  %2128 = vmatpush.bf16.msra.mxu3 %v1910_v40  ;;  %v1136_v59 = vadd.f32 %v1008_v5, %v792_v41  ;;  %v701_v47 = vadd.f32 %v4101_v36, %v493_v60  ;;  %v702_v23 = vadd.f32 %v4101_v36, %v494_v16  ;;  %v5527_v35 = vld [vmem:[#allocation22_spill] sm:$0xff]  ;;  %v5528_v5 = vld [vmem:[#allocation21_spill] sm:$0xff] }
 0x13a   : > { %v1144_v34 = vadd.f32 %v1016_v14, %v800_v11  ;;  %v1352_v48 = vmul.f32 %v5491_v15, %v5525_v29  ;;  %v4209_v33 = vadd.f32 %v915_v63, %v699_v39  ;;  %v4211_v49 = vadd.f32 %v916_v26, %v700_v46  ;;  %v5533_v16 = vld [vmem:[#allocation77_spill] sm:$0xff]  ;;  %v5534_v39 = vld [vmem:[#allocation78_spill] sm:$0xff] }
 0x13b   : > { %v1360_v40 = vmul.f32 %v5491_v15, %v5526_v31  ;;  %v585_v10 = vmul.f32 %v5527_v35, %v5498_v9  ;;  %v4217_v62 = vadd.f32 %v917_v44, %v701_v47  ;;  %v4219_v41 = vadd.f32 %v918_v56, %v702_v23  ;;  %v4223_v25 = vpop.permute.xlu1 %613  ;;  %v5532_v56 = vld [vmem:[#allocation76_spill] sm:$0xff] }
 0x13c   : > { %v1480_v30 = vadd.f32 %v1352_v48, %v1136_v59  ;;  %v593_v11 = vmul.f32 %v5527_v35, %v5528_v5  ;;  %5529 = vst [vmem:[#allocation72_spill] sm:$0xff] %v4223_v25  ;;  %v1009_v2 = vmul.f32 %v5530_v43, %v5522_v3  ;;  %v1017_v20 = vmul.f32 %v5530_v43, %v5524_v27  ;;  %v5535_v48 = vld [vmem:[#allocation28_spill] sm:$0xff] }
 0x13d   : > { %v1488_v63 = vadd.f32 %v1360_v40, %v1144_v34  ;;  %v793_v26 = vadd.f32 %v5518_v8, %v585_v10  ;;  %v691_v44 = vadd.f32 %v4223_v25, %v5531_v12  ;;  %v692_v60 = vadd.f32 %v4223_v25, %v5532_v56  ;;  %v1967_v12 = vld [vmem:[%s5174_s4 + $0x20] sm:$0xff] }
 0x13e   : > { %v693_v14 = vadd.f32 %v4223_v25, %v5533_v16  ;;  %v694_v46 = vadd.f32 %v4223_v25, %v5534_v39  ;;  %vm1608_vm2 = vcmp.ge.f32.partialorder %v1480_v30, 0.0  ;;  %v1736_v59 = vmul.f32 0.01, %v1480_v30  ;;  %v5536_v39 = vld [vmem:[#allocation26_spill] sm:$0xff]  ;;  %1993 = vperm.xlu1 %2849, %v1967_v12  }
 0x13f   : > { %vm1616_vm3 = vcmp.ge.f32.partialorder %v1488_v63, 0.0  ;;  %v1744_v47 = vmul.f32 0.01, %v1488_v63  ;;  %v801_v23 = vadd.f32 %v5521_v7, %v593_v11  ;;  %v1137_v34 = vadd.f32 %v1009_v2, %v793_v26 }
 0x140   : > { %v1353_v40 = vmul.f32 %v5535_v48, %v5525_v29  ;;  %v1361_v10 = vmul.f32 %v5535_v48, %v5526_v31  ;;  %v4246_v56 = vsel %vm1608_vm2, %v1480_v30, %v1736_v59  ;;  %v586_v36 = vmul.f32 %v5536_v39, %v5498_v9  ;;  %v5538_v9 = vld [vmem:[#allocation34_spill] sm:$0xff] }
 0x141   : > { %v4248_v16 = vsel %vm1616_vm3, %v1488_v63, %v1744_v47  ;;  %v594_v11 = vmul.f32 %v5536_v39, %v5528_v5  ;;  %v1145_v2 = vadd.f32 %v1017_v20, %v801_v23  ;;  %v1010_v6 = vmul.f32 %v5537_v21, %v5522_v3  ;;  %v5540_v3 = vld [vmem:[#allocation3_spill] sm:$0xff] }
 0x142   : > { %v1481_v25 = vadd.f32 %v1353_v40, %v1137_v34  ;;  %v794_v30 = vadd.f32 %v5518_v8, %v586_v36  ;;  %v1018_v59 = vmul.f32 %v5537_v21, %v5524_v27  ;;  %v1354_v47 = vmul.f32 %v5538_v9, %v5525_v29  ;;  %v5539_v40 = vld [vmem:[#allocation25_spill] sm:$0xff]  ;;  %v5541_v36 = vld [vmem:[#allocation43_spill] sm:$0xff]  ;;  %v5542_v29 = vld [vmem:[#allocation54_spill] sm:$0xff] }
 0x143   : > { %v802_v63 = vadd.f32 %v5521_v7, %v594_v11  ;;  %v1489_v5 = vadd.f32 %v1361_v10, %v1145_v2  ;;  %v1362_v20 = vmul.f32 %v5538_v9, %v5526_v31  ;;  %v567_v26 = vmul.f32 %v5540_v3, %v5539_v40  ;;  %v5543_v10 = vld [vmem:[#allocation10_spill] sm:$0xff] }
 0x144   : > { %vm1609_vm4 = vcmp.ge.f32.partialorder %v1481_v25, 0.0  ;;  %v1737_v12 = vmul.f32 0.01, %v1481_v25  ;;  %v1138_v23 = vadd.f32 %v1010_v6, %v794_v30  ;;  %v575_v8 = vmul.f32 %v5540_v3, %v5541_v36  ;;  %v4270_v7 = vpop.permute.xlu1 %820 }
 0x145   : > { %v1146_v34 = vadd.f32 %v1018_v59, %v802_v63  ;;  %vm1617_vm5 = vcmp.ge.f32.partialorder %v1489_v5, 0.0  ;;  %v1745_v27 = vmul.f32 0.01, %v1489_v5  ;;  %v991_v2 = vmul.f32 %v5543_v10, %v5542_v29 }
 0x146   : > { %v4272_v11 = vsel %vm1609_vm4, %v1481_v25, %v1737_v12  ;;  %v907_v31 = vmul.f32 %v3068_v52, %v4270_v7  ;;  %v908_v6 = vmul.f32 %v3070_v53, %v4270_v7  ;;  %v909_v30 = vmul.f32 %v3072_v54, %v4270_v7  ;;  %v5544_v12 = vld [vmem:[#allocation30_spill] sm:$0xff] }
 0x147   : > { %v910_v63 = vmul.f32 %v5475_v42, %v4270_v7  ;;  %v4284_v59 = vsel %vm1617_vm5, %v1489_v5, %v1745_v27  ;;  %v1482_v32 = vadd.f32 %v1354_v47, %v1138_v23  ;;  %v1490_v25 = vadd.f32 %v1362_v20, %v1146_v34 }
 0x148   : > { %v775_v58 = vadd.f32 %v5544_v12, %v567_v26  ;;  %v1035_v22 = vadd.f32 %v907_v31, %v691_v44  ;;  %v1036_v3 = vadd.f32 %v908_v6, %v692_v60  ;;  %v1037_v9 = vadd.f32 %v909_v30, %v693_v14  ;;  %v5545_v44 = vld [vmem:[#allocation33_spill] sm:$0xff]  ;;  %v5546_v14 = vld [vmem:[#allocation36_spill] sm:$0xff] }
 0x149   : > { %v1038_v21 = vadd.f32 %v910_v63, %v694_v46  ;;  %v1953_v52 = vpack.c.bf16 %v4284_v59, %v4272_v11  ;;  %vm1610_vm6 = vcmp.ge.f32.partialorder %v1482_v32, 0.0  ;;  %vm1618_vm7 = vcmp.ge.f32.partialorder %v1490_v25, 0.0  ;;  %v5560_v59 = vld [vmem:[#allocation32_spill] sm:$0xff] }
 0x14a   : > { %v1738_v53 = vmul.f32 0.01, %v1482_v32  ;;  %v1379_v54 = vadd.f32 %v4121_v17, %v1035_v22  ;;  %v1380_v42 = vadd.f32 %v4131_v57, %v1036_v3  ;;  %v1381_v5 = vadd.f32 %v4135_v55, %v1037_v9  ;;  %v1970_v9 = vld [vmem:[%s5174_s4 + $0x38] sm:$0xff] }
 0x14b   : > { %v1382_v47 = vadd.f32 %v4150_v4, %v1038_v21  ;;  %v1746_v20 = vmul.f32 0.01, %v1490_v25  ;;  %v783_v60 = vadd.f32 %v5545_v44, %v575_v8  ;;  %v999_v46 = vmul.f32 %v5543_v10, %v5546_v14  ;;  %2008 = vperm.xlu0 %2848, %v1970_v9  }
 0x14c   : > { %v4293_v26 = vsel %vm1610_vm6, %v1482_v32, %v1738_v53  ;;  %vm1507_vm8 = vcmp.ge.f32.partialorder %v1379_v54, 0.0  ;;  %v1635_v23 = vmul.f32 0.01, %v1379_v54  ;;  %vm1508_vm9 = vcmp.ge.f32.partialorder %v1380_v42, 0.0  ;;  %v5548_v53 = vld [vmem:[#allocation13_spill] sm:$0xff] }
 0x14d   : > { %v1636_v34 = vmul.f32 0.01, %v1380_v42  ;;  %vm1509_vm10 = vcmp.ge.f32.partialorder %v1381_v5, 0.0  ;;  %v1637_v22 = vmul.f32 0.01, %v1381_v5  ;;  %vm1510_vm11 = vcmp.ge.f32.partialorder %v1382_v47, 0.0  ;;  %v4298_v57 = vpop.permute.xlu1 %1168 }
 0x14e   : > { %v1638_v17 = vmul.f32 0.01, %v1382_v47  ;;  %v1763_v55 = vsel %vm1507_vm8, %v1379_v54, %v1635_v23  ;;  %v4301_v32 = vsel %vm1618_vm7, %v1490_v25, %v1746_v20  ;;  %v1119_v4 = vadd.f32 %v991_v2, %v775_v58 }
 0x14f   : > { %v1764_v21 = vsel %vm1508_vm9, %v1380_v42, %v1636_v34  ;;  %v1259_v3 = vmul.f32 %v5419_v45, %v4298_v57  ;;  %v1260_v8 = vmul.f32 %v5420_v18, %v4298_v57  ;;  %v1261_v27 = vmul.f32 %v5421_v28, %v4298_v57  ;;  %v5547_v18 = vld [vmem:[#allocation44_spill] sm:$0xff] }
 0x150   : > { %v1765_v31 = vsel %vm1509_vm10, %v1381_v5, %v1637_v22  ;;  %v1262_v6 = vmul.f32 %v5422_v37, %v4298_v57  ;;  %v1766_v30 = vsel %vm1510_vm11, %v1382_v47, %v1638_v17  ;;  %v1127_v2 = vadd.f32 %v999_v46, %v783_v60  ;;  %v5549_v42 = vld [vmem:[#allocation16_spill] sm:$0xff] }
 0x151   : > { %v1387_v63 = vadd.f32 %v1259_v3, %v4209_v33  ;;  %v1388_v45 = vadd.f32 %v1260_v8, %v4211_v49  ;;  %v1389_v25 = vadd.f32 %v1261_v27, %v4217_v62  ;;  %v1335_v54 = vmul.f32 %v5548_v53, %v5547_v18  ;;  %v5550_v37 = vld [vmem:[#allocation12_spill] sm:$0xff] }
 0x152   : > { %v1390_v28 = vadd.f32 %v1262_v6, %v4219_v41  ;;  %v1343_v5 = vmul.f32 %v5548_v53, %v5549_v42  ;;  %v568_v47 = vmul.f32 %v5550_v37, %v5539_v40  ;;  %v576_v20 = vmul.f32 %v5550_v37, %v5541_v36  ;;  %v4331_v6 = vld [vmem:[%s5173_s3] sm:$0xff] }
 0x153   : > { %vm1515_vm12 = vcmp.ge.f32.partialorder %v1387_v63, 0.0  ;;  %v1643_v33 = vmul.f32 0.01, %v1387_v63  ;;  %vm1516_vm13 = vcmp.ge.f32.partialorder %v1388_v45, 0.0  ;;  %v1644_v49 = vmul.f32 0.01, %v1388_v45 }
 0x154   : > { %vm1517_vm14 = vcmp.ge.f32.partialorder %v1389_v25, 0.0  ;;  %v1645_v62 = vmul.f32 0.01, %v1389_v25  ;;  %vm1518_vm15 = vcmp.ge.f32.partialorder %v1390_v28, 0.0  ;;  %v1646_v60 = vmul.f32 0.01, %v1390_v28 }
 0x155   : > { %v1771_v46 = vsel %vm1515_vm12, %v1387_v63, %v1643_v33  ;;  %v1772_v23 = vsel %vm1516_vm13, %v1388_v45, %v1644_v49  ;;  %v1463_v41 = vadd.f32 %v1335_v54, %v1119_v4  ;;  %v1471_v34 = vadd.f32 %v1343_v5, %v1127_v2  ;;  %v5551_v2 = vld [vmem:[#allocation75_spill] sm:$0xff] }
 0x156   : > { %v1899_v22 = vpack.c.bf16 %v1771_v46, %v1763_v55  ;;  %v1900_v17 = vpack.c.bf16 %v1772_v23, %v1764_v21  ;;  %v1773_v9 = vsel %vm1517_vm14, %v1389_v25, %v1645_v62  ;;  %v1774_v3 = vsel %vm1518_vm15, %v1390_v28, %v1646_v60  ;;  %v5552_v45 = vld [vmem:[#allocation47_spill] sm:$0xff] }
 0x157   : > { %v1901_v8 = vpack.c.bf16 %v1773_v9, %v1765_v31  ;;  %v1902_v27 = vpack.c.bf16 %v1774_v3, %v1766_v30  ;;  %vm1591_vm0 = vcmp.ge.f32.partialorder %v1463_v41, 0.0  ;;  %vm1599_vm1 = vcmp.ge.f32.partialorder %v1471_v34, 0.0 }
 0x158   : > { %2042 = vmatpush.bf16.msra.mxu0 %v1899_v22  ;;  %2071 = vmatpush.bf16.msra.mxu1 %v1900_v17  ;;  %v1719_v58 = vmul.f32 0.01, %v1463_v41  ;;  %v1727_v63 = vmul.f32 0.01, %v1471_v34  ;;  %v776_v4 = vadd.f32 %v5544_v12, %v568_v47  ;;  %v784_v55 = vadd.f32 %v5545_v44, %v576_v20 }
 0x159   : > { %2100 = vmatpush.bf16.msra.mxu2 %v1901_v8  ;;  %2129 = vmatpush.bf16.msra.mxu3 %v1902_v27  ;;  %v992_v21 = vmul.f32 %v5523_v50, %v5542_v29  ;;  %v1000_v31 = vmul.f32 %v5523_v50, %v5546_v14  ;;  %v1336_v30 = vmul.f32 %v5491_v15, %v5547_v18 }
 0x15a   : > { %v5553_v25 = vpack.c.bf16 %v5551_v2, %v5552_v45  ;;  %v5554_v54 = vpack.c.bf16 %v4075_v1, %v5510_v19  ;;  %v1847_v28 = vsel %vm1591_vm0, %v1463_v41, %v1719_v58  ;;  %v1855_v5 = vsel %vm1599_vm1, %v1471_v34, %v1727_v63  ;;  %v5562_v45 = vld [vmem:[#allocation38_spill] sm:$0xff] }
 0x15b   : > { %v1344_v47 = vmul.f32 %v5491_v15, %v5549_v42  ;;  %v5555_v20 = vpack.c.bf16 %v4087_v51, %v5515_v0  ;;  %v5556_v33 = vpack.c.bf16 %v4165_v13, %v5519_v38  ;;  %v1943_v49 = vpack.c.bf16 %v1855_v5, %v1847_v28  ;;  %2043 = vmatmul.bf16.vlgmr.msra.gmra.mxu0 %v4331_v6 }
 0x15c   : > { %2151 = vmatpush.bf16.msrb.mxu0 %v5553_v25  ;;  %2180 = vmatpush.bf16.msrb.mxu1 %v5554_v54  ;;  %v1120_v62 = vadd.f32 %v992_v21, %v776_v4  ;;  %v1128_v60 = vadd.f32 %v1000_v31, %v784_v55  ;;  %v569_v1 = vmul.f32 %v5527_v35, %v5539_v40  ;;  %v1965_v4 = vld [vmem:[%s5174_s4 + $0x10] sm:$0xff]  ;;  %v5563_v25 = vld [vmem:[#allocation3_spill] sm:$0xff] }
 0x15d   : > { %2209 = vmatpush.bf16.msrb.mxu2 %v5555_v20  ;;  %2238 = vmatpush.bf16.msrb.mxu3 %v5556_v33  ;;  %v577_v19 = vmul.f32 %v5527_v35, %v5541_v36  ;;  %v993_v51 = vmul.f32 %v5530_v43, %v5542_v29  ;;  %v1001_v38 = vmul.f32 %v5530_v43, %v5546_v14  ;;  %v5564_v54 = vld [vmem:[#allocation60_spill] sm:$0xff] }
 0x15e   : > { %2072 = vmatmul.bf16.vlgmr.msra.gmra.mxu1 %v4331_v6  ;;  %2101 = vmatmul.bf16.vlgmr.msra.gmra.mxu2 %v4331_v6  ;;  %v1464_v0 = vadd.f32 %v1336_v30, %v1120_v62  ;;  %v1472_v13 = vadd.f32 %v1344_v47, %v1128_v60  ;;  %v5557_v58 = vpack.c.bf16 %v4156_v61, %v3994_v24  ;;  %v5567_v60 = vld [vmem:[#allocation64_spill] sm:$0xff] }
 0x15f   : > { %2130 = vmatmul.bf16.vlgmr.msra.gmra.mxu3 %v4331_v6  ;;  %v5558_v46 = vpack.c.bf16 %v4248_v16, %v4246_v56  ;;  %v777_v23 = vadd.f32 %v5544_v12, %v569_v1  ;;  %v785_v41 = vadd.f32 %v5545_v44, %v577_v19  ;;  %v1337_v34 = vmul.f32 %v5535_v48, %v5547_v18  ;;  %v5568_v19 = vld [vmem:[#allocation50_spill] sm:$0xff] }
 0x160   : > { %2152 = vmatpush.bf16.msrb.mxu0 %v5557_v58  ;;  %v5559_v22 = vpack.c.bf16 %v4301_v32, %v4293_v26  ;;  %vm1592_vm2 = vcmp.ge.f32.partialorder %v1464_v0, 0.0  ;;  %vm1600_vm3 = vcmp.ge.f32.partialorder %v1472_v13, 0.0  ;;  %v1720_v24 = vmul.f32 0.01, %v1464_v0  ;;  %1983 = vperm.xlu1 %2849, %v1965_v4  }
 0x161   : > { %2181 = vmatpush.bf16.msrb.mxu1 %v5558_v46  ;;  %2210 = vmatpush.bf16.msrb.mxu2 %v1953_v52  ;;  %v1728_v61 = vmul.f32 0.01, %v1472_v13  ;;  %v1121_v56 = vadd.f32 %v993_v51, %v777_v23  ;;  %v1129_v16 = vadd.f32 %v1001_v38, %v785_v41  ;;  %v1345_v17 = vmul.f32 %v5535_v48, %v5549_v42  ;;  %v5570_v38 = vld [vmem:[#allocation18_spill] sm:$0xff] }
 0x162   : > { %2239 = vmatpush.bf16.msrb.mxu3 %v5559_v22  ;;  %v570_v9 = vmul.f32 %v5536_v39, %v5539_v40  ;;  %v1848_v3 = vsel %vm1592_vm2, %v1464_v0, %v1720_v24  ;;  %v578_v11 = vmul.f32 %v5536_v39, %v5541_v36  ;;  %v994_v52 = vmul.f32 %v5560_v59, %v5542_v29  ;;  %v5561_v36 = vld [vmem:[#allocation34_spill] sm:$0xff]  ;;  %v5569_v0 = vld [vmem:[#allocation61_spill] sm:$0xff] }
 0x163   : > { %v1856_v8 = vsel %vm1600_vm3, %v1472_v13, %v1728_v61  ;;  %v1465_v32 = vadd.f32 %v1337_v34, %v1121_v56  ;;  %v1473_v27 = vadd.f32 %v1345_v17, %v1129_v16  ;;  %v1002_v55 = vmul.f32 %v5560_v59, %v5546_v14 }
 0x164   : > { %2153 = vmatpush.bf16.msrb.mxu0 %v1943_v49  ;;  %v1944_v26 = vpack.c.bf16 %v1856_v8, %v1848_v3  ;;  %v778_v63 = vadd.f32 %v5544_v12, %v570_v9  ;;  %v786_v40 = vadd.f32 %v5545_v44, %v578_v11  ;;  %v1338_v21 = vmul.f32 %v5561_v36, %v5547_v18  ;;  %v5565_v18 = vld [vmem:[#allocation56_spill] sm:$0xff] }
 0x165   : > { %v1346_v29 = vmul.f32 %v5561_v36, %v5549_v42  ;;  %vm1593_vm4 = vcmp.ge.f32.partialorder %v1465_v32, 0.0  ;;  %vm1601_vm5 = vcmp.ge.f32.partialorder %v1473_v27, 0.0  ;;  %v1721_v12 = vmul.f32 0.01, %v1465_v32  ;;  %v5566_v42 = vld [vmem:[#allocation55_spill] sm:$0xff] }
 0x166   : > { %2182 = vmatpush.bf16.msrb.mxu1 %v1944_v26  ;;  %v1729_v31 = vmul.f32 0.01, %v1473_v27  ;;  %v1122_v30 = vadd.f32 %v994_v52, %v778_v63  ;;  %v1130_v2 = vadd.f32 %v1002_v55, %v786_v40  ;;  %v551_v44 = vmul.f32 %v5563_v25, %v5562_v45 }
 0x167   : > { %v559_v14 = vmul.f32 %v5563_v25, %v5564_v54  ;;  %v1849_v28 = vsel %vm1593_vm4, %v1465_v32, %v1721_v12  ;;  %v975_v47 = vmul.f32 %v5543_v10, %v5565_v18  ;;  %v983_v20 = vmul.f32 %v5543_v10, %v5566_v42 }
 0x168   : > { %v1857_v5 = vsel %vm1601_vm5, %v1473_v27, %v1729_v31  ;;  %v1466_v49 = vadd.f32 %v1338_v21, %v1122_v30  ;;  %v1474_v62 = vadd.f32 %v1346_v29, %v1130_v2  ;;  %v759_v1 = vadd.f32 %v5567_v60, %v551_v44 }
 0x169   : > { %v1945_v33 = vpack.c.bf16 %v1857_v5, %v1849_v28  ;;  %v767_v51 = vadd.f32 %v5568_v19, %v559_v14  ;;  %v1319_v13 = vmul.f32 %v5548_v53, %v5569_v0  ;;  %v1327_v58 = vmul.f32 %v5548_v53, %v5570_v38 }
 0x16a   : > { %v552_v46 = vmul.f32 %v5550_v37, %v5562_v45  ;;  %vm1594_vm6 = vcmp.ge.f32.partialorder %v1466_v49, 0.0  ;;  %vm1602_vm7 = vcmp.ge.f32.partialorder %v1474_v62, 0.0  ;;  %v1722_v23 = vmul.f32 0.01, %v1466_v49 }
 0x16b   : > { %2211 = vmatpush.bf16.msrb.mxu2 %v1945_v33  ;;  %v1730_v41 = vmul.f32 0.01, %v1474_v62  ;;  %v1103_v34 = vadd.f32 %v975_v47, %v759_v1  ;;  %v1111_v22 = vadd.f32 %v983_v20, %v767_v51  ;;  %v560_v24 = vmul.f32 %v5550_v37, %v5564_v54 }
 0x16c   : > { %v760_v61 = vadd.f32 %v5567_v60, %v552_v46  ;;  %v1850_v56 = vsel %vm1594_vm6, %v1466_v49, %v1722_v23  ;;  %v976_v17 = vmul.f32 %v5523_v50, %v5565_v18  ;;  %v984_v9 = vmul.f32 %v5523_v50, %v5566_v42 }
 0x16d   : > { %v1858_v16 = vsel %vm1602_vm7, %v1474_v62, %v1730_v41  ;;  %v1447_v8 = vadd.f32 %v1319_v13, %v1103_v34  ;;  %v1455_v11 = vadd.f32 %v1327_v58, %v1111_v22  ;;  %v768_v52 = vadd.f32 %v5568_v19, %v560_v24  ;;  %v4455_v41 = vld [vmem:[%s5173_s3 + $0x8] sm:$0xff]  ;;  %v1963_v34 = vld [vmem:[%s5174_s4] sm:$0xff] }
 0x16e   : > { %v1946_v3 = vpack.c.bf16 %v1858_v16, %v1850_v56  ;;  %v1104_v26 = vadd.f32 %v976_v17, %v760_v61  ;;  %v1320_v32 = vmul.f32 %v5491_v15, %v5569_v0  ;;  %v1328_v27 = vmul.f32 %v5491_v15, %v5570_v38  ;;  %1973 = vperm.xlu0 %2848, %v1963_v34  }
 0x16f   : > { %v553_v63 = vmul.f32 %v5527_v35, %v5562_v45  ;;  %vm1575_vm8 = vcmp.ge.f32.partialorder %v1447_v8, 0.0  ;;  %vm1583_vm9 = vcmp.ge.f32.partialorder %v1455_v11, 0.0  ;;  %v1703_v4 = vmul.f32 0.01, %v1447_v8  ;;  %2048 = vmatmul.bf16.gmra.mxu0 %v4455_v41  ;;  %2077 = vmatmul.bf16.gmra.mxu1 %v4455_v41 }
 0x170   : > { %2240 = vmatpush.bf16.msrb.mxu3 %v1946_v3  ;;  %v1711_v40 = vmul.f32 0.01, %v1455_v11  ;;  %v1112_v55 = vadd.f32 %v984_v9, %v768_v52  ;;  %v1448_v21 = vadd.f32 %v1320_v32, %v1104_v26  ;;  %v561_v29 = vmul.f32 %v5527_v35, %v5564_v54  ;;  %v5571_v9 = vld [vmem:[#allocation46_spill] sm:$0xff]  ;;  %2106 = vmatmul.bf16.gmra.mxu2 %v4455_v41  ;;  %v5573_v26 = vld [vmem:[#allocation68_spill] sm:$0xff] }
 0x171   : > { %v761_v12 = vadd.f32 %v5567_v60, %v553_v63  ;;  %v1831_v31 = vsel %vm1575_vm8, %v1447_v8, %v1703_v4  ;;  %v977_v2 = vmul.f32 %v5530_v43, %v5565_v18  ;;  %v985_v44 = vmul.f32 %v5530_v43, %v5566_v42  ;;  %v5572_v8 = vld [vmem:[#allocation82_spill] sm:$0xff]  ;;  %2135 = vmatmul.bf16.gmra.mxu3 %v4455_v41  ;;  %v5575_v4 = vld [vmem:[#allocation49_spill] sm:$0xff] }
 0x172   : > { %v1839_v30 = vsel %vm1583_vm9, %v1455_v11, %v1711_v40  ;;  %v1456_v28 = vadd.f32 %v1328_v27, %v1112_v55  ;;  %vm1576_vm10 = vcmp.ge.f32.partialorder %v1448_v21, 0.0  ;;  %v1704_v5 = vmul.f32 0.01, %v1448_v21  ;;  %v5574_v27 = vld [vmem:[#allocation40_spill] sm:$0xff]  ;;  %v5576_v55 = vld [vmem:[#allocation57_spill] sm:$0xff] }
 0x173   : > { %v1935_v14 = vpack.c.bf16 %v1839_v30, %v1831_v31  ;;  %v769_v47 = vadd.f32 %v5568_v19, %v561_v29  ;;  %v1105_v20 = vadd.f32 %v977_v2, %v761_v12  ;;  %v1321_v33 = vmul.f32 %v5535_v48, %v5569_v0  ;;  %v5577_v29 = vld [vmem:[#allocation15_spill] sm:$0xff] }
 0x174   : > { %v1329_v49 = vmul.f32 %v5535_v48, %v5570_v38  ;;  %vm1584_vm11 = vcmp.ge.f32.partialorder %v1456_v28, 0.0  ;;  %v1712_v62 = vmul.f32 0.01, %v1456_v28  ;;  %v1832_v1 = vsel %vm1576_vm10, %v1448_v21, %v1704_v5 }
 0x175   : > { %2154 = vmatpush.bf16.msrb.mxu0 %v1935_v14  ;;  %v554_v51 = vmul.f32 %v5536_v39, %v5562_v45  ;;  %v1113_v13 = vadd.f32 %v985_v44, %v769_v47  ;;  %v1449_v58 = vadd.f32 %v1321_v33, %v1105_v20  ;;  %v562_v46 = vmul.f32 %v5536_v39, %v5564_v54 }
 0x176   : > { %v978_v23 = vmul.f32 %v5560_v59, %v5565_v18  ;;  %v1840_v22 = vsel %vm1584_vm11, %v1456_v28, %v1712_v62  ;;  %v986_v24 = vmul.f32 %v5560_v59, %v5566_v42  ;;  %v1322_v54 = vmul.f32 %v5561_v36, %v5569_v0  ;;  %v5578_v28 = vld [vmem:[#allocation39_spill] sm:$0xff] }
 0x177   : > { %v762_v45 = vadd.f32 %v5567_v60, %v554_v51  ;;  %v1936_v18 = vpack.c.bf16 %v1840_v22, %v1832_v1  ;;  %v1457_v61 = vadd.f32 %v1329_v49, %v1113_v13  ;;  %vm1577_vm12 = vcmp.ge.f32.partialorder %v1449_v58, 0.0 }
 0x178   : > { %v1705_v56 = vmul.f32 0.01, %v1449_v58  ;;  %v770_v16 = vadd.f32 %v5568_v19, %v562_v46  ;;  %v1330_v60 = vmul.f32 %v5561_v36, %v5570_v38  ;;  %v535_v42 = vmul.f32 %v5563_v25, %v5571_v9 }
 0x179   : > { %v1106_v17 = vadd.f32 %v978_v23, %v762_v45  ;;  %2183 = vmatpush.bf16.msrb.mxu1 %v1936_v18  ;;  %vm1585_vm13 = vcmp.ge.f32.partialorder %v1457_v61, 0.0  ;;  %v1713_v0 = vmul.f32 0.01, %v1457_v61  ;;  %v543_v11 = vmul.f32 %v5563_v25, %v5572_v8 }
 0x17a   : > { %v1833_v3 = vsel %vm1577_vm12, %v1449_v58, %v1705_v56  ;;  %v1114_v52 = vadd.f32 %v986_v24, %v770_v16  ;;  %v743_v32 = vadd.f32 %v5573_v26, %v535_v42  ;;  %v959_v38 = vmul.f32 %v5543_v10, %v5574_v27 }
 0x17b   : > { %v1450_v19 = vadd.f32 %v1322_v54, %v1106_v17  ;;  %v1841_v63 = vsel %vm1585_vm13, %v1457_v61, %v1713_v0  ;;  %v751_v40 = vadd.f32 %v5575_v4, %v543_v11  ;;  %v967_v21 = vmul.f32 %v5543_v10, %v5576_v55 }
 0x17c   : > { %v1303_v12 = vmul.f32 %v5548_v53, %v5577_v29  ;;  %v1937_v31 = vpack.c.bf16 %v1841_v63, %v1833_v3  ;;  %v1458_v30 = vadd.f32 %v1330_v60, %v1114_v52  ;;  %v1087_v44 = vadd.f32 %v959_v38, %v743_v32 }
 0x17d   : > { %vm1578_vm14 = vcmp.ge.f32.partialorder %v1450_v19, 0.0  ;;  %v1706_v2 = vmul.f32 0.01, %v1450_v19  ;;  %v1095_v14 = vadd.f32 %v967_v21, %v751_v40  ;;  %v1311_v5 = vmul.f32 %v5548_v53, %v5578_v28 }
 0x17e   : > { %v536_v47 = vmul.f32 %v5550_v37, %v5571_v9  ;;  %2212 = vmatpush.bf16.msrb.mxu2 %v1937_v31  ;;  %vm1586_vm15 = vcmp.ge.f32.partialorder %v1458_v30, 0.0  ;;  %v1714_v20 = vmul.f32 0.01, %v1458_v30  ;;  %v544_v49 = vmul.f32 %v5550_v37, %v5572_v8 }
 0x17f   : > { %v1834_v33 = vsel %vm1578_vm14, %v1450_v19, %v1706_v2  ;;  %v1431_v62 = vadd.f32 %v1303_v12, %v1087_v44  ;;  %v1439_v1 = vadd.f32 %v1311_v5, %v1095_v14  ;;  %v960_v13 = vmul.f32 %v5523_v50, %v5574_v27 }
 0x180   : > { %v744_v51 = vadd.f32 %v5573_v26, %v536_v47  ;;  %v1842_v58 = vsel %vm1586_vm15, %v1458_v30, %v1714_v20  ;;  %v752_v46 = vadd.f32 %v5575_v4, %v544_v49  ;;  %v968_v23 = vmul.f32 %v5523_v50, %v5576_v55 }
 0x181   : > { %v1304_v34 = vmul.f32 %v5491_v15, %v5577_v29  ;;  %v1938_v22 = vpack.c.bf16 %v1842_v58, %v1834_v33  ;;  %vm1559_vm0 = vcmp.ge.f32.partialorder %v1431_v62, 0.0  ;;  %vm1567_vm1 = vcmp.ge.f32.partialorder %v1439_v1, 0.0 }
 0x182   : > { %v1687_v45 = vmul.f32 0.01, %v1431_v62  ;;  %v1695_v24 = vmul.f32 0.01, %v1439_v1  ;;  %v1088_v54 = vadd.f32 %v960_v13, %v744_v51  ;;  %v1096_v18 = vadd.f32 %v968_v23, %v752_v46  ;;  %v5579_v46 = vld [vmem:[#allocation53_spill] sm:$0xff]  ;;  %v5580_v23 = vld [vmem:[#allocation42_spill] sm:$0xff] }
 0x183   : > { %v1312_v61 = vmul.f32 %v5491_v15, %v5578_v28  ;;  %2241 = vmatpush.bf16.msrb.mxu3 %v1938_v22  ;;  %v537_v16 = vmul.f32 %v5527_v35, %v5571_v9  ;;  %v545_v17 = vmul.f32 %v5527_v35, %v5572_v8  ;;  %v961_v60 = vmul.f32 %v5530_v43, %v5574_v27 }
 0x184   : > { %v1815_v56 = vsel %vm1559_vm0, %v1431_v62, %v1687_v45  ;;  %v1823_v42 = vsel %vm1567_vm1, %v1439_v1, %v1695_v24  ;;  %v1432_v0 = vadd.f32 %v1304_v34, %v1088_v54  ;;  %v969_v11 = vmul.f32 %v5530_v43, %v5576_v55  ;;  %v1964_v62 = vld [vmem:[%s5174_s4 + $0x8] sm:$0xff] }
 0x185   : > { %v1440_v3 = vadd.f32 %v1312_v61, %v1096_v18  ;;  %v1927_v52 = vpack.c.bf16 %v1823_v42, %v1815_v56  ;;  %v745_v19 = vadd.f32 %v5573_v26, %v537_v16  ;;  %v753_v32 = vadd.f32 %v5575_v4, %v545_v17  ;;  %1978 = vperm.xlu1 %2849, %v1964_v62   ;;  %v5583_v56 = vld [vmem:[#allocation7_spill] sm:$0xff]  ;;  %v5585_v42 = vld [vmem:[#allocation70_spill] sm:$0xff] }
 0x186   : > { %v1305_v38 = vmul.f32 %v5535_v48, %v5577_v29  ;;  %vm1560_vm2 = vcmp.ge.f32.partialorder %v1432_v0, 0.0  ;;  %v1688_v63 = vmul.f32 0.01, %v1432_v0  ;;  %v1313_v31 = vmul.f32 %v5535_v48, %v5578_v28  ;;  %v5584_v17 = vld [vmem:[#allocation19_spill] sm:$0xff] }
 0x187   : > { %vm1568_vm3 = vcmp.ge.f32.partialorder %v1440_v3, 0.0  ;;  %v1696_v40 = vmul.f32 0.01, %v1440_v3  ;;  %2155 = vmatpush.bf16.msrb.mxu0 %v1927_v52  ;;  %v1089_v21 = vadd.f32 %v961_v60, %v745_v19  ;;  %v1097_v12 = vadd.f32 %v969_v11, %v753_v32 }
 0x188   : > { %v538_v30 = vmul.f32 %v5536_v39, %v5571_v9  ;;  %v1816_v2 = vsel %vm1560_vm2, %v1432_v0, %v1688_v63  ;;  %v546_v14 = vmul.f32 %v5536_v39, %v5572_v8  ;;  %v962_v5 = vmul.f32 %v5560_v59, %v5574_v27 }
 0x189   : > { %v1824_v44 = vsel %vm1568_vm3, %v1440_v3, %v1696_v40  ;;  %v1433_v20 = vadd.f32 %v1305_v38, %v1089_v21  ;;  %v1441_v33 = vadd.f32 %v1313_v31, %v1097_v12  ;;  %v970_v9 = vmul.f32 %v5560_v59, %v5576_v55  ;;  %v5586_v3 = vld [vmem:[#allocation66_spill] sm:$0xff] }
 0x18a   : > { %v1928_v47 = vpack.c.bf16 %v1824_v44, %v1816_v2  ;;  %v746_v49 = vadd.f32 %v5573_v26, %v538_v30  ;;  %v754_v1 = vadd.f32 %v5575_v4, %v546_v14  ;;  %v1306_v8 = vmul.f32 %v5561_v36, %v5577_v29  ;;  %v5581_v29 = vld [vmem:[#allocation4_spill] sm:$0xff] }
 0x18b   : > { %v1314_v27 = vmul.f32 %v5561_v36, %v5578_v28  ;;  %vm1561_vm4 = vcmp.ge.f32.partialorder %v1433_v20, 0.0  ;;  %vm1569_vm5 = vcmp.ge.f32.partialorder %v1441_v33, 0.0  ;;  %v1689_v26 = vmul.f32 0.01, %v1433_v20  ;;  %v5582_v28 = vld [vmem:[#allocation41_spill] sm:$0xff] }
 0x18c   : > { %2184 = vmatpush.bf16.msrb.mxu1 %v1928_v47  ;;  %v1697_v51 = vmul.f32 0.01, %v1441_v33  ;;  %v1090_v13 = vadd.f32 %v962_v5, %v746_v49  ;;  %v1098_v58 = vadd.f32 %v970_v9, %v754_v1  ;;  %v519_v4 = vmul.f32 %v5563_v25, %v5579_v46 }
 0x18d   : > { %v527_v55 = vmul.f32 %v5563_v25, %v5580_v23  ;;  %v1817_v34 = vsel %vm1561_vm4, %v1433_v20, %v1689_v26  ;;  %v943_v45 = vmul.f32 %v5543_v10, %v5581_v29  ;;  %v951_v24 = vmul.f32 %v5543_v10, %v5582_v28 }
 0x18e   : > { %v1825_v22 = vsel %vm1569_vm5, %v1441_v33, %v1697_v51  ;;  %v1434_v18 = vadd.f32 %v1306_v8, %v1090_v13  ;;  %v1442_v61 = vadd.f32 %v1314_v27, %v1098_v58  ;;  %v727_v16 = vadd.f32 %v5583_v56, %v519_v4 }
 0x18f   : > { %v1929_v54 = vpack.c.bf16 %v1825_v22, %v1817_v34  ;;  %v735_v60 = vadd.f32 %v5584_v17, %v527_v55  ;;  %v1287_v0 = vmul.f32 %v5548_v53, %v5585_v42  ;;  %v1295_v11 = vmul.f32 %v5548_v53, %v5586_v3 }
 0x190   : > { %v520_v52 = vmul.f32 %v5550_v37, %v5579_v46  ;;  %vm1562_vm6 = vcmp.ge.f32.partialorder %v1434_v18, 0.0  ;;  %vm1570_vm7 = vcmp.ge.f32.partialorder %v1442_v61, 0.0  ;;  %v1690_v19 = vmul.f32 0.01, %v1434_v18 }
 0x191   : > { %2213 = vmatpush.bf16.msrb.mxu2 %v1929_v54  ;;  %v1698_v32 = vmul.f32 0.01, %v1442_v61  ;;  %v1071_v38 = vadd.f32 %v943_v45, %v727_v16  ;;  %v1079_v63 = vadd.f32 %v951_v24, %v735_v60  ;;  %v528_v40 = vmul.f32 %v5550_v37, %v5580_v23 }
 0x192   : > { %v728_v21 = vadd.f32 %v5583_v56, %v520_v52  ;;  %v1818_v12 = vsel %vm1562_vm6, %v1434_v18, %v1690_v19  ;;  %v944_v30 = vmul.f32 %v5523_v50, %v5581_v29  ;;  %v952_v2 = vmul.f32 %v5523_v50, %v5582_v28 }
 0x193   : > { %v1826_v31 = vsel %vm1570_vm7, %v1442_v61, %v1698_v32  ;;  %v1415_v14 = vadd.f32 %v1287_v0, %v1071_v38  ;;  %v1423_v5 = vadd.f32 %v1295_v11, %v1079_v63  ;;  %v736_v47 = vadd.f32 %v5584_v17, %v528_v40 }
 0x194   : > { %v1930_v44 = vpack.c.bf16 %v1826_v31, %v1818_v12  ;;  %v1072_v20 = vadd.f32 %v944_v30, %v728_v21  ;;  %v1288_v33 = vmul.f32 %v5491_v15, %v5585_v42  ;;  %v1296_v49 = vmul.f32 %v5491_v15, %v5586_v3 }
 0x195   : > { %v521_v62 = vmul.f32 %v5527_v35, %v5579_v46  ;;  %vm1543_vm8 = vcmp.ge.f32.partialorder %v1415_v14, 0.0  ;;  %vm1551_vm9 = vcmp.ge.f32.partialorder %v1423_v5, 0.0  ;;  %v1671_v1 = vmul.f32 0.01, %v1415_v14 }
 0x196   : > { %2242 = vmatpush.bf16.msrb.mxu3 %v1930_v44  ;;  %v1679_v9 = vmul.f32 0.01, %v1423_v5  ;;  %v1080_v8 = vadd.f32 %v952_v2, %v736_v47  ;;  %v1416_v27 = vadd.f32 %v1288_v33, %v1072_v20  ;;  %v529_v26 = vmul.f32 %v5527_v35, %v5580_v23  ;;  %v5589_v20 = vld [vmem:[#allocation8_spill] sm:$0xff] }
 0x197   : > { %v729_v51 = vadd.f32 %v5583_v56, %v521_v62  ;;  %v1799_v13 = vsel %vm1543_vm8, %v1415_v14, %v1671_v1  ;;  %v945_v4 = vmul.f32 %v5530_v43, %v5581_v29  ;;  %v953_v55 = vmul.f32 %v5530_v43, %v5582_v28  ;;  %v5588_v14 = vld [vmem:[#allocation65_spill] sm:$0xff]  ;;  %v5591_v1 = vld [vmem:[#allocation63_spill] sm:$0xff] }
 0x198   : > { %v1807_v58 = vsel %vm1551_vm9, %v1423_v5, %v1679_v9  ;;  %v1424_v22 = vadd.f32 %v1296_v49, %v1080_v8  ;;  %vm1544_vm10 = vcmp.ge.f32.partialorder %v1416_v27, 0.0  ;;  %v1672_v45 = vmul.f32 0.01, %v1416_v27  ;;  %v5590_v49 = vld [vmem:[#allocation5_spill] sm:$0xff]  ;;  %v5592_v9 = vld [vmem:[#allocation58_spill] sm:$0xff] }
 0x199   : > { %v1919_v34 = vpack.c.bf16 %v1807_v58, %v1799_v13  ;;  %v737_v24 = vadd.f32 %v5584_v17, %v529_v26  ;;  %v1073_v54 = vadd.f32 %v945_v4, %v729_v51  ;;  %v1289_v18 = vmul.f32 %v5535_v48, %v5585_v42 }
 0x19a   : > { %v1297_v61 = vmul.f32 %v5535_v48, %v5586_v3  ;;  %vm1552_vm11 = vcmp.ge.f32.partialorder %v1424_v22, 0.0  ;;  %v1680_v16 = vmul.f32 0.01, %v1424_v22  ;;  %v1800_v60 = vsel %vm1544_vm10, %v1416_v27, %v1672_v45  ;;  %v5593_v27 = vld [vmem:[#allocation2_spill] sm:$0xff] }
 0x19b   : > { %2156 = vmatpush.bf16.msrb.mxu0 %v1919_v34  ;;  %v522_v0 = vmul.f32 %v5536_v39, %v5579_v46  ;;  %v1081_v11 = vadd.f32 %v953_v55, %v737_v24  ;;  %v1417_v52 = vadd.f32 %v1289_v18, %v1073_v54  ;;  %v530_v19 = vmul.f32 %v5536_v39, %v5580_v23  ;;  %v5594_v34 = vld [vmem:[#allocation80_spill] sm:$0xff] }
 0x19c   : > { %v946_v32 = vmul.f32 %v5560_v59, %v5581_v29  ;;  %v1808_v38 = vsel %vm1552_vm11, %v1424_v22, %v1680_v16  ;;  %v954_v40 = vmul.f32 %v5560_v59, %v5582_v28  ;;  %v1290_v21 = vmul.f32 %v5561_v36, %v5585_v42  ;;  %v5587_v29 = vld [vmem:[#allocation59_spill] sm:$0xff] }
 0x19d   : > { %v730_v63 = vadd.f32 %v5583_v56, %v522_v0  ;;  %v1920_v12 = vpack.c.bf16 %v1808_v38, %v1800_v60  ;;  %v1425_v31 = vadd.f32 %v1297_v61, %v1081_v11  ;;  %vm1545_vm12 = vcmp.ge.f32.partialorder %v1417_v52, 0.0 }
 0x19e   : > { %v1673_v46 = vmul.f32 0.01, %v1417_v52  ;;  %v738_v30 = vadd.f32 %v5584_v17, %v530_v19  ;;  %v1298_v23 = vmul.f32 %v5561_v36, %v5586_v3  ;;  %v503_v44 = vmul.f32 %v5563_v25, %v5587_v29 }
 0x19f   : > { %v1074_v2 = vadd.f32 %v946_v32, %v730_v63  ;;  %2185 = vmatpush.bf16.msrb.mxu1 %v1920_v12  ;;  %vm1553_vm13 = vcmp.ge.f32.partialorder %v1425_v31, 0.0  ;;  %v1681_v56 = vmul.f32 0.01, %v1425_v31  ;;  %v511_v42 = vmul.f32 %v5563_v25, %v5588_v14 }
 0x1a0   : > { %v1801_v28 = vsel %vm1545_vm12, %v1417_v52, %v1673_v46  ;;  %v1082_v5 = vadd.f32 %v954_v40, %v738_v30  ;;  %v711_v33 = vadd.f32 %v5589_v20, %v503_v44  ;;  %v927_v17 = vmul.f32 %v5543_v10, %v5590_v49 }
 0x1a1   : > { %v1418_v47 = vadd.f32 %v1290_v21, %v1074_v2  ;;  %v1809_v62 = vsel %vm1553_vm13, %v1425_v31, %v1681_v56  ;;  %v719_v3 = vadd.f32 %v5591_v1, %v511_v42  ;;  %v935_v8 = vmul.f32 %v5543_v10, %v5592_v9 }
 0x1a2   : > { %v1271_v26 = vmul.f32 %v5548_v53, %v5593_v27  ;;  %v1921_v51 = vpack.c.bf16 %v1809_v62, %v1801_v28  ;;  %v1426_v13 = vadd.f32 %v1298_v23, %v1082_v5  ;;  %v1055_v4 = vadd.f32 %v927_v17, %v711_v33 }
 0x1a3   : > { %vm1546_vm14 = vcmp.ge.f32.partialorder %v1418_v47, 0.0  ;;  %v1674_v58 = vmul.f32 0.01, %v1418_v47  ;;  %v1063_v55 = vadd.f32 %v935_v8, %v719_v3  ;;  %v1279_v22 = vmul.f32 %v5548_v53, %v5594_v34 }
 0x1a4   : > { %v504_v45 = vmul.f32 %v5550_v37, %v5587_v29  ;;  %2214 = vmatpush.bf16.msrb.mxu2 %v1921_v51  ;;  %vm1554_vm15 = vcmp.ge.f32.partialorder %v1426_v13, 0.0  ;;  %v1682_v24 = vmul.f32 0.01, %v1426_v13  ;;  %v512_v18 = vmul.f32 %v5550_v37, %v5588_v14 }
 0x1a5   : > { %v1802_v54 = vsel %vm1546_vm14, %v1418_v47, %v1674_v58  ;;  %v1399_v61 = vadd.f32 %v1271_v26, %v1055_v4  ;;  %v1407_v16 = vadd.f32 %v1279_v22, %v1063_v55  ;;  %v928_v0 = vmul.f32 %v5523_v50, %v5590_v49 }
 0x1a6   : > { %v712_v60 = vadd.f32 %v5589_v20, %v504_v45  ;;  %v1810_v11 = vsel %vm1554_vm15, %v1426_v13, %v1682_v24  ;;  %v720_v52 = vadd.f32 %v5591_v1, %v512_v18  ;;  %v936_v19 = vmul.f32 %v5523_v50, %v5592_v9 }
 0x1a7   : > { %v1272_v32 = vmul.f32 %v5491_v15, %v5593_v27  ;;  %v1922_v38 = vpack.c.bf16 %v1810_v11, %v1802_v54  ;;  %vm1527_vm0 = vcmp.ge.f32.partialorder %v1399_v61, 0.0  ;;  %vm1535_vm1 = vcmp.ge.f32.partialorder %v1407_v16, 0.0 }
 0x1a8   : > { %v1655_v63 = vmul.f32 0.01, %v1399_v61  ;;  %v1663_v40 = vmul.f32 0.01, %v1407_v16  ;;  %v1056_v21 = vadd.f32 %v928_v0, %v712_v60  ;;  %v1064_v12 = vadd.f32 %v936_v19, %v720_v52 }
 0x1a9   : > { %v1280_v31 = vmul.f32 %v5491_v15, %v5594_v34  ;;  %2243 = vmatpush.bf16.msrb.mxu3 %v1922_v38  ;;  %v505_v30 = vmul.f32 %v5527_v35, %v5587_v29  ;;  %v513_v2 = vmul.f32 %v5527_v35, %v5588_v14  ;;  %v929_v23 = vmul.f32 %v5530_v43, %v5590_v49 }
 0x1aa   : > { %v1783_v46 = vsel %vm1527_vm0, %v1399_v61, %v1655_v63  ;;  %v1791_v44 = vsel %vm1535_vm1, %v1407_v16, %v1663_v40  ;;  %v1400_v56 = vadd.f32 %v1272_v32, %v1056_v21  ;;  %v937_v42 = vmul.f32 %v5530_v43, %v5592_v9  ;;  %v4639_v61 = vld [vmem:[%s5173_s3 + $0x10] sm:$0xff]  ;;  %v5597_v63 = vld [vmem:[#allocation71_spill] sm:$0xff] }
 0x1ab   : > { %v1408_v28 = vadd.f32 %v1280_v31, %v1064_v12  ;;  %v1911_v5 = vpack.c.bf16 %v1791_v44, %v1783_v46  ;;  %v713_v47 = vadd.f32 %v5589_v20, %v505_v30  ;;  %v721_v33 = vadd.f32 %v5591_v1, %v513_v2  ;;  %2053 = vmatmul.bf16.gmra.mxu0 %v4639_v61  ;;  %v5598_v46 = vld [vmem:[#allocation72_spill] sm:$0xff] }
 0x1ac   : > { %v1273_v17 = vmul.f32 %v5535_v48, %v5593_v27  ;;  %vm1528_vm2 = vcmp.ge.f32.partialorder %v1400_v56, 0.0  ;;  %v1656_v62 = vmul.f32 0.01, %v1400_v56  ;;  %v1281_v51 = vmul.f32 %v5535_v48, %v5594_v34  ;;  %2082 = vmatmul.bf16.gmra.mxu1 %v4639_v61  ;;  %2111 = vmatmul.bf16.gmra.mxu2 %v4639_v61 }
 0x1ad   : > { %vm1536_vm3 = vcmp.ge.f32.partialorder %v1408_v28, 0.0  ;;  %v1664_v3 = vmul.f32 0.01, %v1408_v28  ;;  %2157 = vmatpush.bf16.msrb.mxu0 %v1911_v5  ;;  %v1057_v8 = vadd.f32 %v929_v23, %v713_v47  ;;  %v1065_v26 = vadd.f32 %v937_v42, %v721_v33  ;;  %2140 = vmatmul.bf16.gmra.mxu3 %v4639_v61  ;;  %v5600_v23 = vld [vmem:[#allocation69_spill] sm:$0xff] }
 0x1ae   : > { %v506_v13 = vmul.f32 %v5536_v39, %v5587_v29  ;;  %v1784_v58 = vsel %vm1528_vm2, %v1400_v56, %v1656_v62  ;;  %v514_v55 = vmul.f32 %v5536_v39, %v5588_v14  ;;  %v930_v22 = vmul.f32 %v5560_v59, %v5590_v49  ;;  %v1969_v29 = vld [vmem:[%s5174_s4 + $0x30] sm:$0xff] }
 0x1af   : > { %v1792_v4 = vsel %vm1536_vm3, %v1408_v28, %v1664_v3  ;;  %v1401_v24 = vadd.f32 %v1273_v17, %v1057_v8  ;;  %v1409_v54 = vadd.f32 %v1281_v51, %v1065_v26  ;;  %v938_v14 = vmul.f32 %v5560_v59, %v5592_v9  ;;  %2003 = vperm.xlu2 %2847, %v1969_v29   ;;  %v5596_v9 = vld [vmem:[#allocation79_spill] sm:$0xff] }
 0x1b0   : > { %v1912_v45 = vpack.c.bf16 %v1792_v4, %v1784_v58  ;;  %v714_v18 = vadd.f32 %v5589_v20, %v506_v13  ;;  %v722_v16 = vadd.f32 %v5591_v1, %v514_v55  ;;  %v1274_v49 = vmul.f32 %v5561_v36, %v5593_v27  ;;  %v5595_v1 = vld [vmem:[#allocation6_spill] sm:$0xff]  ;;  %v1968_v28 = vld [vmem:[%s5174_s4 + $0x28] sm:$0xff] }
 0x1b1   : > { %v1282_v20 = vmul.f32 %v5561_v36, %v5594_v34  ;;  %vm1529_vm4 = vcmp.ge.f32.partialorder %v1401_v24, 0.0  ;;  %vm1537_vm5 = vcmp.ge.f32.partialorder %v1409_v54, 0.0  ;;  %v1657_v60 = vmul.f32 0.01, %v1401_v24 }
 0x1b2   : > { %2186 = vmatpush.bf16.msrb.mxu1 %v1912_v45  ;;  %v1665_v0 = vmul.f32 0.01, %v1409_v54  ;;  %v1058_v11 = vadd.f32 %v930_v22, %v714_v18  ;;  %v1066_v52 = vadd.f32 %v938_v14, %v722_v16  ;;  %v487_v19 = vmul.f32 %v5563_v25, %v5595_v1 }
 0x1b3   : > { %v495_v32 = vmul.f32 %v5563_v25, %v5596_v9  ;;  %v1785_v27 = vsel %vm1529_vm4, %v1401_v24, %v1657_v60  ;;  %v911_v38 = vmul.f32 %v5543_v10, %v4270_v7  ;;  %v919_v40 = vmul.f32 %v5543_v10, %v5597_v63  ;;  %v5599_v25 = vld [vmem:[#allocation67_spill] sm:$0xff]  ;;  %v4698_v60 = vld [vmem:[%s5173_s3 + $0x18] sm:$0xff] }
 0x1b4   : > { %v1793_v34 = vsel %vm1537_vm5, %v1409_v54, %v1665_v0  ;;  %v1402_v12 = vadd.f32 %v1274_v49, %v1058_v11  ;;  %v1410_v31 = vadd.f32 %v1282_v20, %v1066_v52  ;;  %v695_v30 = vadd.f32 %v5598_v46, %v487_v19  ;;  %v1966_v0 = vld [vmem:[%s5174_s4 + $0x18] sm:$0xff] }
 0x1b5   : > { %v1913_v21 = vpack.c.bf16 %v1793_v34, %v1785_v27  ;;  %v703_v2 = vadd.f32 %v5599_v25, %v495_v32  ;;  %v1255_v44 = vmul.f32 %v5548_v53, %v5600_v23  ;;  %v1263_v56 = vmul.f32 %v5548_v53, %v4298_v57 }
 0x1b6   : > { %v488_v10 = vmul.f32 %v5550_v37, %v5595_v1  ;;  %vm1530_vm6 = vcmp.ge.f32.partialorder %v1402_v12, 0.0  ;;  %vm1538_vm7 = vcmp.ge.f32.partialorder %v1410_v31, 0.0  ;;  %v1658_v42 = vmul.f32 0.01, %v1402_v12 }
 0x1b7   : > { %2215 = vmatpush.bf16.msrb.mxu2 %v1913_v21  ;;  %v1666_v5 = vmul.f32 0.01, %v1410_v31  ;;  %v1039_v47 = vadd.f32 %v911_v38, %v695_v30  ;;  %v1047_v33 = vadd.f32 %v919_v40, %v703_v2  ;;  %v496_v17 = vmul.f32 %v5550_v37, %v5596_v9  ;;  %1998 = vperm.xlu2 %2847, %v1968_v28  }
 0x1b8   : > { %v696_v62 = vadd.f32 %v5598_v46, %v488_v10  ;;  %v1786_v53 = vsel %vm1530_vm6, %v1402_v12, %v1658_v42  ;;  %v912_v8 = vmul.f32 %v5523_v50, %v4270_v7  ;;  %v920_v26 = vmul.f32 %v5523_v50, %v5597_v63 }
 0x1b9   : > { %v1794_v3 = vsel %vm1538_vm7, %v1410_v31, %v1666_v5  ;;  %v1383_v13 = vadd.f32 %v1255_v44, %v1039_v47  ;;  %v1391_v58 = vadd.f32 %v1263_v56, %v1047_v33  ;;  %v704_v4 = vadd.f32 %v5599_v25, %v496_v17 }
 0x1ba   : > { %v1914_v51 = vpack.c.bf16 %v1794_v3, %v1786_v53  ;;  %v1040_v55 = vadd.f32 %v912_v8, %v696_v62  ;;  %v1256_v37 = vmul.f32 %v5491_v15, %v5600_v23  ;;  %v1264_v22 = vmul.f32 %v5491_v15, %v4298_v57 }
 0x1bb   : > { %v489_v45 = vmul.f32 %v5527_v35, %v5595_v1  ;;  %vm1511_vm8 = vcmp.ge.f32.partialorder %v1383_v13, 0.0  ;;  %vm1519_vm9 = vcmp.ge.f32.partialorder %v1391_v58, 0.0  ;;  %v1639_v50 = vmul.f32 0.01, %v1383_v13  ;;  %2058 = vmatmul.bf16.gmra.mxu0 %v4698_v60 }
 0x1bc   : > { %2244 = vmatpush.bf16.msrb.mxu3 %v1914_v51  ;;  %v1647_v24 = vmul.f32 0.01, %v1391_v58  ;;  %v1048_v54 = vadd.f32 %v920_v26, %v704_v4  ;;  %v1384_v18 = vadd.f32 %v1256_v37, %v1040_v55  ;;  %v497_v29 = vmul.f32 %v5527_v35, %v5596_v9  ;;  %2087 = vmatmul.bf16.gmra.mxu1 %v4698_v60 }
 0x1bd   : > { %v697_v16 = vadd.f32 %v5598_v46, %v489_v45  ;;  %v1767_v14 = vsel %vm1511_vm8, %v1383_v13, %v1639_v50  ;;  %v913_v15 = vmul.f32 %v5530_v43, %v4270_v7  ;;  %v921_v20 = vmul.f32 %v5530_v43, %v5597_v63  ;;  %2116 = vmatmul.bf16.gmra.mxu2 %v4698_v60  ;;  %v4756_v50 = vpop.permute.xlu1 %1993 }
 0x1be   : > { %v1775_v49 = vsel %vm1519_vm9, %v1391_v58, %v1647_v24  ;;  %v1392_v11 = vadd.f32 %v1264_v22, %v1048_v54  ;;  %vm1512_vm10 = vcmp.ge.f32.partialorder %v1384_v18, 0.0  ;;  %v1640_v52 = vmul.f32 0.01, %v1384_v18  ;;  %2145 = vmatmul.bf16.gmra.mxu3 %v4698_v60 }
 0x1bf   : > { %v1903_v35 = vpack.c.bf16 %v1775_v49, %v1767_v14  ;;  %v705_v19 = vadd.f32 %v5599_v25, %v497_v29  ;;  %v1041_v32 = vadd.f32 %v913_v15, %v697_v16  ;;  %v1257_v27 = vmul.f32 %v5535_v48, %v5600_v23  ;;  %1988 = vperm.xlu2 %2847, %v1966_v0   ;;  %v4758_v16 = vpop.permute.xlu0 %2008 }
 0x1c0   : > { %v1265_v43 = vmul.f32 %v5535_v48, %v4298_v57  ;;  %vm1520_vm11 = vcmp.ge.f32.partialorder %v1392_v11, 0.0  ;;  %v1648_v34 = vmul.f32 0.01, %v1392_v11  ;;  %v490_v38 = vmul.f32 %v5536_v39, %v5595_v1 }
 0x1c1   : > { %2158 = vmatpush.bf16.msrb.mxu0 %v1903_v35  ;;  %v1049_v40 = vadd.f32 %v921_v20, %v705_v19  ;;  %v1385_v21 = vadd.f32 %v1257_v27, %v1041_v32  ;;  %v498_v12 = vmul.f32 %v5536_v39, %v5596_v9  ;;  %v914_v31 = vmul.f32 %v5560_v59, %v4270_v7 }
 0x1c2   : > { %v1768_v30 = vsel %vm1512_vm10, %v1384_v18, %v1640_v52  ;;  %v1776_v48 = vsel %vm1520_vm11, %v1392_v11, %v1648_v34  ;;  %v698_v2 = vadd.f32 %v5598_v46, %v490_v38  ;;  %v922_v44 = vmul.f32 %v5560_v59, %v5597_v63 }
 0x1c3   : > { %v1904_v1 = vpack.c.bf16 %v1776_v48, %v1768_v30  ;;  %v1393_v56 = vadd.f32 %v1265_v43, %v1049_v40  ;;  %v1641_v10 = vmul.f32 0.01, %v1385_v21  ;;  %v1258_v39 = vmul.f32 %v5561_v36, %v5600_v23 }
 0x1c4   : > { %vm1513_vm12 = vcmp.ge.f32.partialorder %v1385_v21, 0.0  ;;  %v706_v7 = vadd.f32 %v5599_v25, %v498_v12  ;;  %v1042_v9 = vadd.f32 %v914_v31, %v698_v2  ;;  %v1266_v46 = vmul.f32 %v5561_v36, %v4298_v57  ;;  %v2492_v57 = vld [vmem:[%s5176_s6] sm:$0x7] }
 0x1c5   : > { %2187 = vmatpush.bf16.msrb.mxu1 %v1904_v1  ;;  %vm1521_vm13 = vcmp.ge.f32.partialorder %v1393_v56, 0.0  ;;  %v1649_v59 = vmul.f32 0.01, %v1393_v56  ;;  %v1769_v42 = vsel %vm1513_vm12, %v1385_v21, %v1641_v10 }
 0x1c6   : > { %v1050_v63 = vadd.f32 %v922_v44, %v706_v7  ;;  %v1386_v28 = vadd.f32 %v1258_v39, %v1042_v9 }
 0x1c7   : > { %v1777_v5 = vsel %vm1521_vm13, %v1393_v56, %v1649_v59  ;;  %2495 = vperm.xlu2 %2847, %v2492_v57  }
 0x1c8   : > { %v1905_v47 = vpack.c.bf16 %v1777_v5, %v1769_v42  ;;  %v1394_v23 = vadd.f32 %v1266_v46, %v1050_v63  ;;  %v1642_v33 = vmul.f32 0.01, %v1386_v28  ;;  %vm1514_vm14 = vcmp.ge.f32.partialorder %v1386_v28, 0.0 }
 0x1ca   : > { %2216 = vmatpush.bf16.msrb.mxu2 %v1905_v47  ;;  %vm1522_vm15 = vcmp.ge.f32.partialorder %v1394_v23, 0.0  ;;  %v1650_v25 = vmul.f32 0.01, %v1394_v23  ;;  %v1770_v17 = vsel %vm1514_vm14, %v1386_v28, %v1642_v33 }
 0x1cb   : > { %2159 = vmatmul.bf16.vlgmr.msrb.gmra.mxu0 %v4331_v6 }
 0x1cc   : > { %v1778_v62 = vsel %vm1522_vm15, %v1394_v23, %v1650_v25  ;;  %2188 = vmatmul.bf16.vlgmr.msrb.gmra.mxu1 %v4331_v6 }
 0x1cd   : > { %v1906_v53 = vpack.c.bf16 %v1778_v62, %v1770_v17  ;;  %2217 = vmatmul.bf16.vlgmr.msrb.gmra.mxu2 %v4331_v6 }
 0x1cf   : > { %2245 = vmatpush.bf16.msrb.mxu3 %v1906_v53 }
 0x1d2   : > { %2246 = vmatmul.bf16.vlgmr.msrb.gmra.mxu3 %v4331_v6  ;;  %v4762_v49 = vpop.permute.xlu1 %1983 }
 0x1d8   : > { %v4746_v6 = vpop.f32.mrf.mxu0 }
 0x1db   : > { %2164 = vmatmul.bf16.gmra.mxu0 %v4455_v41  ;;  %v4748_v36 = vpop.f32.mrf.mxu1 }
 0x1dc   : > { %2193 = vmatmul.bf16.gmra.mxu1 %v4455_v41 }
 0x1dd   : > { %2222 = vmatmul.bf16.gmra.mxu2 %v4455_v41 }
 0x1e0   : > { %v4750_v8 = vpop.f32.mrf.mxu0  ;;  %v4765_v11 = vpop.permute.xlu0 %1973 }
 0x1e2   : > { %2251 = vmatmul.bf16.gmra.mxu3 %v4455_v41  ;;  %v2102_v41 = vpop.f32.mrf.mxu2  ;;  %v2131_v3 = vpop.f32.mrf.mxu3 }
 0x1e3   : > { %v4752_v26 = vpop.f32.mrf.mxu1  ;;  %v4773_v34 = vadd.f32 %v2102_v41, %v4765_v11  ;;  %v4776_v38 = vadd.f32 %v2131_v3, %v4765_v11 }
 0x1ea   : > { %v2104_v51 = vpop.f32.mrf.mxu2 }
 0x1eb   : > { %2169 = vmatmul.bf16.gmra.mxu0 %v4639_v61 }
 0x1ec   : > { %2198 = vmatmul.bf16.gmra.mxu1 %v4639_v61  ;;  %v2049_v13 = vpop.f32.mrf.mxu0  ;;  %v2078_v58 = vpop.f32.mrf.mxu1 }
 0x1ed   : > { %2227 = vmatmul.bf16.gmra.mxu2 %v4639_v61  ;;  %v2050_v35 = vadd.f32 %v2049_v13, %v4762_v49  ;;  %v2079_v52 = vadd.f32 %v2078_v58, %v4762_v49 }
 0x1ef   : > { %vm2283_vm0 = vcmp.ge.f32.partialorder %v2050_v35, 0.0  ;;  %v2347_v40 = vmul.f32 0.01, %v2050_v35  ;;  %vm2284_vm1 = vcmp.ge.f32.partialorder %v2079_v52, 0.0  ;;  %v2348_v12 = vmul.f32 0.01, %v2079_v52 }
 0x1f1   : > { %v4830_v58 = vsel %vm2283_vm0, %v2050_v35, %v2347_v40 }
 0x1f2   : > { %2256 = vmatmul.bf16.gmra.mxu3 %v4639_v61  ;;  %v2133_v61 = vpop.f32.mrf.mxu3 }
 0x1f3   : > { %v2107_v4 = vpop.f32.mrf.mxu2 }
 0x1f4   : > { %v2051_v37 = vpop.f32.mrf.mxu0  ;;  %v2080_v22 = vpop.f32.mrf.mxu1  ;;  %v4781_v31 = vadd.f32 %v2107_v4, %v4762_v49 }
 0x1f7   : > { %v4789_v46 = vpop.permute.xlu1 %1978 }
 0x1f8   : > { %v4797_v42 = vadd.f32 %v2104_v51, %v4789_v46  ;;  %v4800_v5 = vadd.f32 %v2133_v61, %v4789_v46 }
 0x1fa   : > { %v2136_v55 = vpop.f32.mrf.mxu3 }
 0x1fb   : > { %2174 = vmatmul.bf16.gmra.mxu0 %v4698_v60  ;;  %v2109_v24 = vpop.f32.mrf.mxu2  ;;  %v4803_v47 = vadd.f32 %v2136_v55, %v4762_v49 }
 0x1fc   : > { %2203 = vmatmul.bf16.gmra.mxu1 %v4698_v60 }
 0x1fd   : > { %2232 = vmatmul.bf16.gmra.mxu2 %v4698_v60 }
 0x202   : > { %2261 = vmatmul.bf16.gmra.mxu3 %v4698_v60  ;;  %v2138_v54 = vpop.f32.mrf.mxu3 }
 0x209   : > { %v4754_v45 = vpop.permute.xlu2 %2003 }
 0x211   : > { %v4760_v14 = vpop.permute.xlu2 %1998 }
 0x219   : > { %v4778_v21 = vpop.permute.xlu2 %1988 }
 0x21a   : > { %v4784_v30 = vadd.f32 %v2109_v24, %v4778_v21  ;;  %v2052_v28 = vadd.f32 %v2051_v37, %v4778_v21  ;;  %v4810_v25 = vadd.f32 %v2138_v54, %v4778_v21  ;;  %v2081_v3 = vadd.f32 %v2080_v22, %v4778_v21 }
 0x21c   : > { %v4807_v33 = vmul.f32 0.01, %v4784_v30  ;;  %v2355_v13 = vmul.f32 0.01, %v2052_v28  ;;  %vm2291_vm7 = vcmp.ge.f32.partialorder %v2052_v28, 0.0  ;;  %vm2292_vm9 = vcmp.ge.f32.partialorder %v2081_v3, 0.0 }
 0x21d   : > { %vm2293_vm15 = vcmp.ge.f32.partialorder %v4784_v30, 0.0 }
 0x228   : > { %v2054_v18 = vpop.f32.mrf.mxu0 }
 0x229   : > { %v2083_v29 = vpop.f32.mrf.mxu1  ;;  %v2055_v19 = vadd.f32 %v2054_v18, %v4756_v50 }
 0x22a   : > { %v2084_v32 = vadd.f32 %v2083_v29, %v4756_v50 }
 0x22b   : > { %vm2299_vm2 = vcmp.ge.f32.partialorder %v2055_v19, 0.0  ;;  %v2363_v44 = vmul.f32 0.01, %v2055_v19 }
 0x22c   : > { %vm2300_vm3 = vcmp.ge.f32.partialorder %v2084_v32, 0.0  ;;  %v2364_v39 = vmul.f32 0.01, %v2084_v32 }
 0x22d   : > { %v4813_v17 = vsel %vm2299_vm2, %v2055_v19, %v2363_v44  ;;  %vm2285_vm2 = vcmp.ge.f32.partialorder %v4781_v31, 0.0 }
 0x22e   : > { %v4821_v57 = vsel %vm2300_vm3, %v2084_v32, %v2364_v39  ;;  %v4845_v32 = vsel %vm2291_vm7, %v2052_v28, %v2355_v13 }
 0x22f   : > { %v2112_v15 = vpop.f32.mrf.mxu2 }
 0x230   : > { %v2056_v20 = vpop.f32.mrf.mxu0  ;;  %v2141_v60 = vpop.f32.mrf.mxu3  ;;  %v4787_v7 = vadd.f32 %v2112_v15, %v4756_v50  ;;  %v4838_v15 = vsel %vm2284_vm1, %v2079_v52, %v2348_v12 }
 0x231   : > { %v2085_v0 = vpop.f32.mrf.mxu1  ;;  %v2057_v27 = vadd.f32 %v2056_v20, %v4760_v14  ;;  %v4792_v59 = vadd.f32 %v2141_v60, %v4756_v50 }
 0x232   : > { %v2086_v43 = vadd.f32 %v2085_v0, %v4760_v14  ;;  %v4818_v53 = vmul.f32 0.01, %v4787_v7  ;;  %v2356_v0 = vmul.f32 0.01, %v2081_v3  ;;  %vm2301_vm12 = vcmp.ge.f32.partialorder %v4787_v7, 0.0 }
 0x233   : > { %v2371_v1 = vmul.f32 0.01, %v2057_v27  ;;  %vm2307_vm4 = vcmp.ge.f32.partialorder %v2057_v27, 0.0  ;;  %v4827_v51 = vmul.f32 0.01, %v4792_v59  ;;  %vm2302_vm13 = vcmp.ge.f32.partialorder %v4792_v59, 0.0 }
 0x234   : > { %v2372_v9 = vmul.f32 0.01, %v2086_v43  ;;  %vm2308_vm5 = vcmp.ge.f32.partialorder %v2086_v43, 0.0 }
 0x235   : > { %v4815_v62 = vsel %vm2307_vm4, %v2057_v27, %v2371_v1 }
 0x236   : > { %v4823_v41 = vsel %vm2308_vm5, %v2086_v43, %v2372_v9  ;;  %v2476_v24 = vpack.c.bf16 %v4815_v62, %v4813_v17  ;;  %v2420_v9 = vsel %vm2292_vm9, %v2081_v3, %v2356_v0 }
 0x237   : > { %v2114_v48 = vpop.f32.mrf.mxu2  ;;  %v2477_v29 = vpack.c.bf16 %v4823_v41, %v4821_v57 }
 0x238   : > { %v2059_v2 = vpop.f32.mrf.mxu0  ;;  %v2143_v56 = vpop.f32.mrf.mxu3  ;;  %v4841_v20 = vadd.f32 %v2114_v48, %v4760_v14  ;;  %v2045_v48 = vadd.f32 %v4746_v6, %v4765_v11  ;;  %v2468_v6 = vpack.c.bf16 %v4845_v32, %v4830_v58 }
 0x239   : > { %v2088_v10 = vpop.f32.mrf.mxu1  ;;  %v2060_v63 = vadd.f32 %v2059_v2, %v4754_v45  ;;  %v4848_v27 = vadd.f32 %v2143_v56, %v4760_v14  ;;  %v2047_v2 = vadd.f32 %v4750_v8, %v4789_v46  ;;  %v2074_v56 = vadd.f32 %v4748_v36, %v4765_v11 }
 0x23a   : > { %v2089_v23 = vadd.f32 %v2088_v10, %v4754_v45  ;;  %vm2309_vm14 = vcmp.ge.f32.partialorder %v4841_v20, 0.0  ;;  %v2373_v8 = vmul.f32 0.01, %v4841_v20  ;;  %vm2267_vm1 = vcmp.ge.f32.partialorder %v2045_v48, 0.0 }
 0x23b   : > { %v2379_v61 = vmul.f32 0.01, %v2060_v63  ;;  %vm2315_vm6 = vcmp.ge.f32.partialorder %v2060_v63, 0.0  ;;  %vm2310_vm0 = vcmp.ge.f32.partialorder %v4848_v27, 0.0  ;;  %v2331_v3 = vmul.f32 0.01, %v2045_v48 }
 0x23c   : > { %v2380_v4 = vmul.f32 0.01, %v2089_v23  ;;  %vm2316_vm8 = vcmp.ge.f32.partialorder %v2089_v23, 0.0  ;;  %v2339_v58 = vmul.f32 0.01, %v2047_v2  ;;  %vm2275_vm7 = vcmp.ge.f32.partialorder %v2047_v2, 0.0 }
 0x23d   : > { %v2443_v35 = vsel %vm2315_vm6, %v2060_v63, %v2379_v61  ;;  %v2374_v63 = vmul.f32 0.01, %v4848_v27  ;;  %v2437_v32 = vsel %vm2309_vm14, %v4841_v20, %v2373_v8  ;;  %v2341_v20 = vmul.f32 0.01, %v4797_v42 }
 0x23e   : > { %v2444_v43 = vsel %vm2316_vm8, %v2089_v23, %v2380_v4  ;;  %v2076_v23 = vadd.f32 %v4752_v26, %v4789_v46  ;;  %v2332_v26 = vmul.f32 0.01, %v2074_v56  ;;  %vm2268_vm8 = vcmp.ge.f32.partialorder %v2074_v56, 0.0 }
 0x23f   : > { %vm2278_vm14 = vcmp.ge.f32.partialorder %v4800_v5, 0.0 }
 0x240   : > { %v2117_v55 = vpop.f32.mrf.mxu2  ;;  %v2061_v37 = vpop.f32.mrf.mxu0  ;;  %vm2276_vm9 = vcmp.ge.f32.partialorder %v2076_v23, 0.0 }
 0x241   : > { %v2146_v54 = vpop.f32.mrf.mxu3  ;;  %v2062_v22 = vadd.f32 %v2061_v37, %v4758_v16  ;;  %v2090_v18 = vpop.f32.mrf.mxu1  ;;  %v2118_v40 = vadd.f32 %v2117_v55, %v4754_v45  ;;  %v2340_v37 = vmul.f32 0.01, %v2076_v23 }
 0x242   : > { %v2091_v60 = vadd.f32 %v2090_v18, %v4758_v16  ;;  %v2147_v44 = vadd.f32 %v2146_v54, %v4754_v45 }
 0x243   : > { %vm2323_vm10 = vcmp.ge.f32.partialorder %v2062_v22, 0.0  ;;  %v2387_v19 = vmul.f32 0.01, %v2062_v22  ;;  %v2381_v17 = vmul.f32 0.01, %v2118_v40  ;;  %vm2317_vm3 = vcmp.ge.f32.partialorder %v2118_v40, 0.0 }
 0x244   : > { %vm2324_vm11 = vcmp.ge.f32.partialorder %v2091_v60, 0.0  ;;  %v2388_v52 = vmul.f32 0.01, %v2091_v60  ;;  %v2382_v61 = vmul.f32 0.01, %v2147_v44  ;;  %vm2318_vm4 = vcmp.ge.f32.partialorder %v2147_v44, 0.0 }
 0x245   : > { %v2451_v12 = vsel %vm2323_vm10, %v2062_v22, %v2387_v19  ;;  %v2445_v54 = vsel %vm2317_vm3, %v2118_v40, %v2381_v17  ;;  %vm2294_vm10 = vcmp.ge.f32.partialorder %v4810_v25, 0.0 }
 0x246   : > { %v2484_v1 = vpack.c.bf16 %v2451_v12, %v2443_v35  ;;  %v2452_v10 = vsel %vm2324_vm11, %v2091_v60, %v2388_v52  ;;  %v2446_v18 = vsel %vm2318_vm4, %v2147_v44, %v2382_v61  ;;  %v2469_v35 = vpack.c.bf16 %v2420_v9, %v4838_v15 }
 0x247   : > { %v2485_v39 = vpack.c.bf16 %v2452_v10, %v2444_v43  ;;  %v2395_v43 = vsel %vm2267_vm1, %v2045_v48, %v2331_v3  ;;  %v2358_v52 = vmul.f32 0.01, %v4810_v25  ;;  %v2438_v15 = vsel %vm2310_vm0, %v4848_v27, %v2374_v63 }
 0x248   : > { %v2119_v28 = vpop.f32.mrf.mxu2  ;;  %v4868_v36 = vpop.f32.mrf.mxu0  ;;  %2506 = vmatpush.bf16.msra.mxu0 %v2484_v1  ;;  %v2396_v12 = vsel %vm2268_vm8, %v2074_v56, %v2332_v26  ;;  %v2404_v44 = vsel %vm2276_vm9, %v2076_v23, %v2340_v37  ;;  %v2349_v48 = vmul.f32 0.01, %v4781_v31  ;;  %v2429_v27 = vsel %vm2301_vm12, %v4787_v7, %v4818_v53  ;;  %v4919_v53 = vld [vmem:[%s5175_s5] sm:$0x3] }
 0x249   : > { %v2120_v62 = vadd.f32 %v2119_v28, %v4758_v16  ;;  %v2148_v57 = vpop.f32.mrf.mxu3  ;;  %v4873_v41 = vpop.f32.mrf.mxu1  ;;  %2519 = vmatpush.bf16.msra.mxu1 %v2485_v39  ;;  %v2350_v10 = vmul.f32 0.01, %v4803_v47  ;;  %v2478_v56 = vpack.c.bf16 %v2437_v32, %v2429_v27  ;;  %v2430_v39 = vsel %vm2302_vm13, %v4792_v59, %v4827_v51 }
 0x24a   : > { %v2149_v13 = vadd.f32 %v2148_v57, %v4758_v16  ;;  %vm2286_vm11 = vcmp.ge.f32.partialorder %v4803_v47, 0.0  ;;  %v2479_v9 = vpack.c.bf16 %v2438_v15, %v2430_v39  ;;  %v2461_v8 = vpack.c.bf16 %v2404_v44, %v2396_v12 }
 0x24b   : > { %vm2325_vm5 = vcmp.ge.f32.partialorder %v2120_v62, 0.0  ;;  %v2389_v4 = vmul.f32 0.01, %v2120_v62  ;;  %v2421_v63 = vsel %vm2293_vm15, %v4784_v30, %v4807_v33  ;;  %vm2277_vm12 = vcmp.ge.f32.partialorder %v4797_v42, 0.0 }
 0x24c   : > { %vm2326_vm6 = vcmp.ge.f32.partialorder %v2149_v13, 0.0  ;;  %v2390_v55 = vmul.f32 0.01, %v2149_v13  ;;  %2507 = vmatpush.bf16.msra.mxu0 %v2476_v24  ;;  %v2403_v24 = vsel %vm2275_vm7, %v2047_v2, %v2339_v58  ;;  %v2342_v7 = vmul.f32 0.01, %v4800_v5 }
 0x24d   : > { %v2453_v22 = vsel %vm2325_vm5, %v2120_v62, %v2389_v4  ;;  %2520 = vmatpush.bf16.msra.mxu1 %v2477_v29  ;;  %v2422_v59 = vsel %vm2294_vm10, %v4810_v25, %v2358_v52  ;;  %vm2498_vm13 = vcmask 523264   ;;  %v2333_v51 = vmul.f32 0.01, %v4773_v34 }
 0x24e   : > { %v2486_v60 = vpack.c.bf16 %v2453_v22, %v2445_v54  ;;  %v2454_v0 = vsel %vm2326_vm6, %v2149_v13, %v2390_v55  ;;  %v2413_v30 = vsel %vm2285_vm2, %v4781_v31, %v2349_v48  ;;  %vm2269_vm15 = vcmp.ge.f32.partialorder %v4773_v34, 0.0 }
 0x24f   : > { %v2487_v19 = vpack.c.bf16 %v2454_v0, %v2446_v18  ;;  %v2334_v33 = vmul.f32 0.01, %v4776_v38  ;;  %v2470_v25 = vpack.c.bf16 %v2421_v63, %v2413_v30  ;;  %v2414_v28 = vsel %vm2286_vm11, %v4803_v47, %v2350_v10 }
 0x250   : > { %v4883_v40 = vpop.f32.mrf.mxu2  ;;  %2532 = vmatpush.bf16.msra.mxu2 %v2486_v60  ;;  %v4885_v29 = vpop.f32.mrf.mxu0  ;;  %2508 = vmatpush.bf16.msra.mxu0 %v2468_v6  ;;  %v2460_v6 = vpack.c.bf16 %v2403_v24, %v2395_v43  ;;  %vm2270_vm0 = vcmp.ge.f32.partialorder %v4776_v38, 0.0  ;;  %v2471_v23 = vpack.c.bf16 %v2422_v59, %v2414_v28  ;;  %v2405_v17 = vsel %vm2277_vm12, %v4797_v42, %v2341_v20 }
 0x251   : > { %2545 = vmatpush.bf16.msra.mxu3 %v2487_v19  ;;  %v2191_v1 = vpop.f32.mrf.mxu1  ;;  %2521 = vmatpush.bf16.msra.mxu1 %v2469_v35  ;;  %v2406_v47 = vsel %vm2278_vm14, %v4800_v5, %v2342_v7  ;;  %v2397_v61 = vsel %vm2269_vm15, %v4773_v34, %v2333_v51  ;;  %v2398_v42 = vsel %vm2270_vm0, %v4776_v38, %v2334_v33 }
 0x252   : > { %v2462_v13 = vpack.c.bf16 %v2405_v17, %v2397_v61  ;;  %v2463_v58 = vpack.c.bf16 %v2406_v47, %v2398_v42  ;;  %v4952_v35 = vadd.f32 %v4868_v36, %v4765_v11  ;;  %v4956_v19 = vadd.f32 %v4873_v41, %v4765_v11 }
 0x253   : > { %v4960_v32 = vadd.f32 %v4885_v29, %v4789_v46  ;;  %v4963_v43 = vadd.f32 %v2191_v1, %v4789_v46  ;;  %v4985_v1 = vadd.f32 %v4883_v40, %v4765_v11 }
 0x254   : > { %2533 = vmatpush.bf16.msra.mxu2 %v2478_v56  ;;  %2509 = vmatpush.bf16.msra.mxu0 %v2460_v6  ;;  %v4974_v41 = vmul.f32 0.01, %v4952_v35  ;;  %v4977_v12 = vmul.f32 0.01, %v4956_v19  ;;  %vm2271_vm9 = vcmp.ge.f32.partialorder %v4952_v35, 0.0  ;;  %vm2272_vm0 = vcmp.ge.f32.partialorder %v4956_v19, 0.0 }
 0x255   : > { %v4895_v2 = vpop.f32.mrf.mxu3  ;;  %2546 = vmatpush.bf16.msra.mxu3 %v2479_v9  ;;  %2522 = vmatpush.bf16.msra.mxu1 %v2461_v8  ;;  %v4992_v10 = vmul.f32 0.01, %v4960_v32  ;;  %v4995_v56 = vmul.f32 0.01, %v4963_v43  ;;  %vm2279_vm12 = vcmp.ge.f32.partialorder %v4960_v32, 0.0 }
 0x256   : > { %v4989_v27 = vadd.f32 %v4895_v2, %v4765_v11 }
 0x257   : > { %2761 = vmatmul.msk.bf16.vlgmr.msra.gmra.mxu0 %vm2498_vm13, %v4919_v53 }
 0x258   : > { %v2220_v31 = vpop.f32.mrf.mxu2  ;;  %2534 = vmatpush.bf16.msra.mxu2 %v2470_v25  ;;  %2762 = vmatmul.msk.bf16.vlgmr.msra.gmra.mxu1 %vm2498_vm13, %v4919_v53  ;;  %v2165_v62 = vpop.f32.mrf.mxu0 }
 0x259   : > { %2547 = vmatpush.bf16.msra.mxu3 %v2471_v23  ;;  %v2194_v3 = vpop.f32.mrf.mxu1  ;;  %v4966_v24 = vadd.f32 %v2220_v31, %v4789_v46  ;;  %v2166_v52 = vadd.f32 %v2165_v62, %v4762_v49 }
 0x25a   : > { %v4970_v15 = vadd.f32 %v2194_v3, %v4762_v49 }
 0x25b   : > { %v5000_v9 = vmul.f32 0.01, %v4966_v24  ;;  %vm2287_vm1 = vcmp.ge.f32.partialorder %v2166_v52, 0.0  ;;  %v2351_v11 = vmul.f32 0.01, %v2166_v52 }
 0x25c   : > { %2535 = vmatpush.bf16.msra.mxu2 %v2462_v13  ;;  %v2352_v2 = vmul.f32 0.01, %v4970_v15  ;;  %vm2288_vm2 = vcmp.ge.f32.partialorder %v4970_v15, 0.0 }
 0x25d   : > { %v2249_v57 = vpop.f32.mrf.mxu3  ;;  %2548 = vmatpush.bf16.msra.mxu3 %v2463_v58  ;;  %v5039_v13 = vsel %vm2287_vm1, %v2166_v52, %v2351_v11  ;;  %vm2280_vm1 = vcmp.ge.f32.partialorder %v4963_v43, 0.0 }
 0x25e   : > { %v5003_v8 = vadd.f32 %v2249_v57, %v4789_v46 }
 0x25f   : > { %2763 = vmatmul.msk.bf16.vlgmr.msra.gmra.mxu2 %vm2498_vm13, %v4919_v53 }
 0x260   : > { %2764 = vmatmul.msk.bf16.vlgmr.msra.gmra.mxu3 %vm2498_vm13, %v4919_v53  ;;  %v2223_v5 = vpop.f32.mrf.mxu2  ;;  %v2167_v4 = vpop.f32.mrf.mxu0 }
 0x261   : > { %v2196_v55 = vpop.f32.mrf.mxu1  ;;  %v2168_v29 = vadd.f32 %v2167_v4, %v4778_v21  ;;  %v5014_v59 = vadd.f32 %v2223_v5, %v4762_v49 }
 0x262   : > { %v5006_v40 = vadd.f32 %v2196_v55, %v4778_v21 }
 0x263   : > { %v2359_v51 = vmul.f32 0.01, %v2168_v29  ;;  %vm2295_vm4 = vcmp.ge.f32.partialorder %v2168_v29, 0.0 }
 0x264   : > { %vm2296_vm6 = vcmp.ge.f32.partialorder %v5006_v40, 0.0  ;;  %v2360_v28 = vmul.f32 0.01, %v5006_v40 }
 0x265   : > { %v2252_v26 = vpop.f32.mrf.mxu3  ;;  %v5042_v42 = vsel %vm2295_vm4, %v2168_v29, %v2359_v51  ;;  %v2416_v51 = vsel %vm2288_vm2, %v4970_v15, %v2352_v2 }
 0x266   : > { %v5019_v25 = vadd.f32 %v2252_v26, %v4762_v49  ;;  %v2424_v2 = vsel %vm2296_vm6, %v5006_v40, %v2360_v28  ;;  %vm2289_vm6 = vcmp.ge.f32.partialorder %v5014_v59, 0.0 }
 0x268   : > { %v2225_v37 = vpop.f32.mrf.mxu2  ;;  %v2170_v54 = vpop.f32.mrf.mxu0 }
 0x269   : > { %v2199_v34 = vpop.f32.mrf.mxu1  ;;  %v2171_v36 = vadd.f32 %v2170_v54, %v4756_v50  ;;  %v5010_v63 = vadd.f32 %v2225_v37, %v4778_v21 }
 0x26a   : > { %v2200_v44 = vadd.f32 %v2199_v34, %v4756_v50 }
 0x26b   : > { %v2367_v7 = vmul.f32 0.01, %v2171_v36  ;;  %vm2303_vm3 = vcmp.ge.f32.partialorder %v2171_v36, 0.0  ;;  %v5025_v17 = vmul.f32 0.01, %v5010_v63 }
 0x26c   : > { %v2368_v46 = vmul.f32 0.01, %v2200_v44  ;;  %vm2304_vm5 = vcmp.ge.f32.partialorder %v2200_v44, 0.0 }
 0x26d   : > { %v2254_v22 = vpop.f32.mrf.mxu3  ;;  %v5031_v47 = vsel %vm2303_vm3, %v2171_v36, %v2367_v7  ;;  %vm2297_vm3 = vcmp.ge.f32.partialorder %v5010_v63, 0.0 }
 0x26e   : > { %v5028_v31 = vadd.f32 %v2254_v22, %v4778_v21  ;;  %v5036_v61 = vsel %vm2304_vm5, %v2200_v44, %v2368_v46 }
 0x270   : > { %v2228_v18 = vpop.f32.mrf.mxu2  ;;  %v2172_v60 = vpop.f32.mrf.mxu0 }
 0x271   : > { %v2201_v0 = vpop.f32.mrf.mxu1  ;;  %v2173_v30 = vadd.f32 %v2172_v60, %v4760_v14  ;;  %v5034_v57 = vadd.f32 %v2228_v18, %v4756_v50  ;;  %v2472_v18 = vpack.c.bf16 %v5042_v42, %v5039_v13 }
 0x272   : > { %v2202_v62 = vadd.f32 %v2201_v0, %v4760_v14 }
 0x273   : > { %v2375_v58 = vmul.f32 0.01, %v2173_v30  ;;  %vm2311_vm7 = vcmp.ge.f32.partialorder %v2173_v30, 0.0  ;;  %vm2305_vm4 = vcmp.ge.f32.partialorder %v5034_v57, 0.0  ;;  %v2369_v46 = vmul.f32 0.01, %v5034_v57 }
 0x274   : > { %v2376_v22 = vmul.f32 0.01, %v2202_v62  ;;  %vm2312_vm14 = vcmp.ge.f32.partialorder %v2202_v62, 0.0 }
 0x275   : > { %v2257_v38 = vpop.f32.mrf.mxu3  ;;  %v2439_v52 = vsel %vm2311_vm7, %v2173_v30, %v2375_v58 }
 0x276   : > { %v5045_v21 = vadd.f32 %v2257_v38, %v4756_v50  ;;  %v2440_v7 = vsel %vm2312_vm14, %v2202_v62, %v2376_v22  ;;  %v2480_v15 = vpack.c.bf16 %v2439_v52, %v5031_v47 }
 0x278   : > { %v4981_v20 = vpop.f32.mrf.mxu2  ;;  %v2175_v48 = vpop.f32.mrf.mxu0  ;;  %vm2306_vm5 = vcmp.ge.f32.partialorder %v5045_v21, 0.0  ;;  %v2370_v47 = vmul.f32 0.01, %v5045_v21 }
 0x279   : > { %v2204_v6 = vpop.f32.mrf.mxu1  ;;  %v2176_v33 = vadd.f32 %v2175_v48, %v4754_v45 }
 0x27a   : > { %v2205_v23 = vadd.f32 %v2204_v6, %v4754_v45  ;;  %v2231_v6 = vadd.f32 %v4981_v20, %v4760_v14 }
 0x27b   : > { %v2383_v5 = vmul.f32 0.01, %v2176_v33  ;;  %vm2319_vm8 = vcmp.ge.f32.partialorder %v2176_v33, 0.0 }
 0x27c   : > { %v2384_v37 = vmul.f32 0.01, %v2205_v23  ;;  %vm2320_vm10 = vcmp.ge.f32.partialorder %v2205_v23, 0.0 }
 0x27d   : > { %v4997_v39 = vpop.f32.mrf.mxu3  ;;  %v2447_v60 = vsel %vm2319_vm8, %v2176_v33, %v2383_v5 }
 0x27e   : > { %v2448_v36 = vsel %vm2320_vm10, %v2205_v23, %v2384_v37  ;;  %vm2313_vm10 = vcmp.ge.f32.partialorder %v2231_v6, 0.0  ;;  %v2407_v37 = vsel %vm2279_vm12, %v4960_v32, %v4992_v10  ;;  %v2433_v32 = vsel %vm2305_vm4, %v5034_v57, %v2369_v46 }
 0x27f   : > { %v2354_v10 = vmul.f32 0.01, %v5019_v25  ;;  %vm2290_vm12 = vcmp.ge.f32.partialorder %v5019_v25, 0.0  ;;  %v2346_v57 = vmul.f32 0.01, %v5003_v8  ;;  %vm2618_vm4 = vcmask 1043456  }
 0x280   : > { %v2233_v49 = vpop.f32.mrf.mxu2  ;;  %v2177_v3 = vpop.f32.mrf.mxu0 }
 0x281   : > { %v2178_v26 = vadd.f32 %v2177_v3, %v4758_v16  ;;  %v2206_v55 = vpop.f32.mrf.mxu1  ;;  %v2234_v38 = vadd.f32 %v2233_v49, %v4754_v45  ;;  %v2481_v3 = vpack.c.bf16 %v2440_v7, %v5036_v61  ;;  %v2399_v61 = vsel %vm2271_vm9, %v4952_v35, %v4974_v41 }
 0x282   : > { %v2207_v54 = vadd.f32 %v2206_v55, %v4758_v16  ;;  %v2408_v35 = vsel %vm2280_vm1, %v4963_v43, %v4995_v56  ;;  %v2353_v41 = vmul.f32 0.01, %v5014_v59  ;;  %vm2298_vm9 = vcmp.ge.f32.partialorder %v5028_v31, 0.0 }
 0x283   : > { %vm2327_vm11 = vcmp.ge.f32.partialorder %v2178_v26, 0.0  ;;  %v2391_v34 = vmul.f32 0.01, %v2178_v26  ;;  %v2385_v20 = vmul.f32 0.01, %v2234_v38  ;;  %vm2321_vm2 = vcmp.ge.f32.partialorder %v2234_v38, 0.0 }
 0x284   : > { %vm2328_vm15 = vcmp.ge.f32.partialorder %v2207_v54, 0.0  ;;  %v2392_v50 = vmul.f32 0.01, %v2207_v54  ;;  %v2464_v43 = vpack.c.bf16 %v2407_v37, %v2399_v61  ;;  %vm2273_vm1 = vcmp.ge.f32.partialorder %v4985_v1, 0.0 }
 0x285   : > { %v2262_v4 = vpop.f32.mrf.mxu3  ;;  %v2455_v0 = vsel %vm2327_vm11, %v2178_v26, %v2391_v34  ;;  %v2449_v58 = vsel %vm2321_vm2, %v2234_v38, %v2385_v20  ;;  %v2473_v26 = vpack.c.bf16 %v2424_v2, %v2416_v51  ;;  %v2400_v34 = vsel %vm2272_vm0, %v4956_v19, %v4977_v12 }
 0x286   : > { %v2263_v29 = vadd.f32 %v2262_v4, %v4754_v45  ;;  %v2488_v44 = vpack.c.bf16 %v2455_v0, %v2447_v60  ;;  %v2456_v48 = vsel %vm2328_vm15, %v2207_v54, %v2392_v50  ;;  %v2260_v45 = vadd.f32 %v4997_v39, %v4760_v14 }
 0x287   : > { %v2489_v11 = vpack.c.bf16 %v2456_v48, %v2448_v36  ;;  %v2377_v14 = vmul.f32 0.01, %v2231_v6  ;;  %v2362_v54 = vmul.f32 0.01, %v5028_v31  ;;  %v2434_v12 = vsel %vm2306_vm5, %v5045_v21, %v2370_v47 }
 0x288   : > { %v2235_v30 = vpop.f32.mrf.mxu2  ;;  %2558 = vmatpush.bf16.msrb.mxu0 %v2488_v44  ;;  %v2386_v62 = vmul.f32 0.01, %v2263_v29  ;;  %vm2322_vm7 = vcmp.ge.f32.partialorder %v2263_v29, 0.0  ;;  %v2378_v13 = vmul.f32 0.01, %v2260_v45  ;;  %vm2314_vm14 = vcmp.ge.f32.partialorder %v2260_v45, 0.0 }
 0x289   : > { %v2236_v33 = vadd.f32 %v2235_v30, %v4758_v16  ;;  %2571 = vmatpush.bf16.msrb.mxu1 %v2489_v11  ;;  %v2441_v55 = vsel %vm2313_vm10, %v2231_v6, %v2377_v14  ;;  %v2465_v50 = vpack.c.bf16 %v2408_v35, %v2400_v34  ;;  %vm2281_vm15 = vcmp.ge.f32.partialorder %v4966_v24, 0.0  ;;  %v2850_v11 = vld [vmem:[%s3044_s20] sm:$0x77] }
 0x28a   : > { %v2450_v28 = vsel %vm2322_vm7, %v2263_v29, %v2386_v62  ;;  %v2442_v22 = vsel %vm2314_vm14, %v2260_v45, %v2378_v13  ;;  %v2482_v19 = vpack.c.bf16 %v2441_v55, %v2433_v32  ;;  %v2426_v21 = vsel %vm2298_vm9, %v5028_v31, %v2362_v54  ;;  %v2853_v54 = vld [vmem:[%s3044_s20 + $0x18] sm:$0x77] }
 0x28b   : > { %vm2329_vm8 = vcmp.ge.f32.partialorder %v2236_v33, 0.0  ;;  %v2393_v39 = vmul.f32 0.01, %v2236_v33  ;;  %v2483_v56 = vpack.c.bf16 %v2442_v22, %v2434_v12  ;;  %v2337_v60 = vmul.f32 0.01, %v4985_v1 }
 0x28c   : > { %2559 = vmatpush.bf16.msrb.mxu0 %v2480_v15  ;;  %vm2282_vm0 = vcmp.ge.f32.partialorder %v5003_v8, 0.0  ;;  %v2418_v0 = vsel %vm2290_vm12, %v5019_v25, %v2354_v10  ;;  %v2851_v15 = vld [vmem:[%s3044_s20 + $0x8] sm:$0x77] }
 0x28d   : > { %v2264_v23 = vpop.f32.mrf.mxu3  ;;  %v2457_v40 = vsel %vm2329_vm8, %v2236_v33, %v2393_v39  ;;  %2572 = vmatpush.bf16.msrb.mxu1 %v2481_v3  ;;  %v2475_v31 = vpack.c.bf16 %v2426_v21, %v2418_v0  ;;  %v2410_v52 = vsel %vm2282_vm0, %v5003_v8, %v2346_v57  ;;  %v2401_v25 = vsel %vm2273_vm1, %v4985_v1, %v2337_v60 }
 0x28e   : > { %v2265_v49 = vadd.f32 %v2264_v23, %v4758_v16  ;;  %v2490_v5 = vpack.c.bf16 %v2457_v40, %v2449_v58  ;;  %v2852_v58 = vld [vmem:[%s3044_s20 + $0x10] sm:$0x77] }
 0x290   : > { %vm2330_vm11 = vcmp.ge.f32.partialorder %v2265_v49, 0.0  ;;  %v2394_v42 = vmul.f32 0.01, %v2265_v49  ;;  %2584 = vmatpush.bf16.msrb.mxu2 %v2490_v5  ;;  %2560 = vmatpush.bf16.msrb.mxu0 %v2472_v18  ;;  %v2425_v18 = vsel %vm2297_vm3, %v5010_v63, %v5025_v17  ;;  %v2417_v63 = vsel %vm2289_vm6, %v5014_v59, %v2353_v41 }
 0x291   : > { %2573 = vmatpush.bf16.msrb.mxu1 %v2473_v26  ;;  %v2338_v17 = vmul.f32 0.01, %v4989_v27  ;;  %v2474_v38 = vpack.c.bf16 %v2425_v18, %v2417_v63  ;;  %vm2274_vm3 = vcmp.ge.f32.partialorder %v4989_v27, 0.0  ;;  %v2409_v59 = vsel %vm2281_vm15, %v4966_v24, %v5000_v9  ;;  %v2496_v9 = vpop.permute.xlu2 %2495 }
 0x292   : > { %v2458_v16 = vsel %vm2330_vm11, %v2265_v49, %v2394_v42  ;;  %v2466_v36 = vpack.c.bf16 %v2409_v59, %v2401_v25 }
 0x293   : > { %v2491_v4 = vpack.c.bf16 %v2458_v16, %v2450_v28  ;;  %v2402_v29 = vsel %vm2274_vm3, %v4989_v27, %v2338_v17 }
 0x294   : > { %2585 = vmatpush.bf16.msrb.mxu2 %v2482_v19  ;;  %2561 = vmatpush.bf16.msrb.mxu0 %v2464_v43  ;;  %v2467_v44 = vpack.c.bf16 %v2410_v52, %v2402_v29 }
 0x295   : > { %2597 = vmatpush.bf16.msrb.mxu3 %v2491_v4  ;;  %2574 = vmatpush.bf16.msrb.mxu1 %v2465_v50 }
 0x297   : > { %2765 = vmatmul.msk.bf16.vlgmr.msrb.gmra.mxu0 %vm2498_vm13, %v4919_v53 }
 0x298   : > { %2586 = vmatpush.bf16.msrb.mxu2 %v2474_v38  ;;  %2766 = vmatmul.msk.bf16.vlgmr.msrb.gmra.mxu1 %vm2498_vm13, %v4919_v53 }
 0x299   : > { %2598 = vmatpush.bf16.msrb.mxu3 %v2483_v56 }
 0x29c   : > { %2587 = vmatpush.bf16.msrb.mxu2 %v2466_v36 }
 0x29d   : > { %2599 = vmatpush.bf16.msrb.mxu3 %v2475_v31 }
 0x29f   : > { %2767 = vmatmul.msk.bf16.vlgmr.msrb.gmra.mxu2 %vm2498_vm13, %v4919_v53 }
 0x2a1   : > { %2600 = vmatpush.bf16.msrb.mxu3 %v2467_v44 }
 0x2a4   : > { %2768 = vmatmul.msk.bf16.vlgmr.msrb.gmra.mxu3 %vm2498_vm13, %v4919_v53 }
 0x2d4   : > { %v2511_v24 = vpop.f32.mrf.mxu0 }
 0x2d5   : > { %v2524_v8 = vpop.f32.mrf.mxu1  ;;  %v2512_v1 = vadd.f32 %v2511_v24, %v2496_v9 }
 0x2d6   : > { %v2525_v48 = vadd.f32 %v2524_v8, %v2496_v9 }
 0x2d8   : > { %v2614_v6 = vrot.slane %v2525_v48, 4 }
 0x2da   : > { %v2619_v27 = vsel %vm2618_vm4, %v2512_v1, %v2614_v6 }
 0x2db   : > { %v2627_v53 = vadd.f32 %v2850_v11, %v2619_v27 }
 0x2dc   : > { %v2513_v7 = vpop.f32.mrf.mxu0 }
 0x2dd   : > { %2631 = vst [vmem:[%s5147_s23] sm:$0x77] %v2627_v53  ;;  %v2526_v51 = vpop.f32.mrf.mxu1 }
 0x2e2   : > { %v2537_v46 = vpop.f32.mrf.mxu2 }
 0x2e3   : > { %v2550_v45 = vpop.f32.mrf.mxu3  ;;  %v2538_v20 = vadd.f32 %v2537_v46, %v2496_v9 }
 0x2e4   : > { %v2551_v30 = vadd.f32 %v2550_v45, %v2496_v9 }
 0x2e6   : > { %v2615_v33 = vrot.slane %v2551_v30, 4 }
 0x2e8   : > { %v2620_v23 = vsel %vm2618_vm4, %v2538_v20, %v2615_v33 }
 0x2e9   : > { %v2628_v2 = vadd.f32 %v2851_v15, %v2620_v23 }
 0x2ea   : > { %v2539_v62 = vpop.f32.mrf.mxu2 }
 0x2eb   : > { %2632 = vst [vmem:[%s5147_s23 + $0x8] sm:$0x77] %v2628_v2  ;;  %v2552_v49 = vpop.f32.mrf.mxu3 }
 0x314   : > { %v2563_v3 = vpop.f32.mrf.mxu0 }
 0x315   : > { %v2576_v14 = vpop.f32.mrf.mxu1  ;;  %v2564_v13 = vadd.f32 %v2563_v3, %v2496_v9 }
 0x316   : > { %v2577_v39 = vadd.f32 %v2576_v14, %v2496_v9 }
 0x318   : > { %v2616_v42 = vrot.slane %v2577_v39, 4 }
 0x31a   : > { %v2621_v47 = vsel %vm2618_vm4, %v2564_v13, %v2616_v42 }
 0x31b   : > { %v2629_v40 = vadd.f32 %v2852_v58, %v2621_v47 }
 0x31c   : > { %v2565_v28 = vpop.f32.mrf.mxu0 }
 0x31d   : > { %2633 = vst [vmem:[%s5147_s23 + $0x10] sm:$0x77] %v2629_v40  ;;  %v2578_v5 = vpop.f32.mrf.mxu1 }
 0x322   : > { %v2589_v16 = vpop.f32.mrf.mxu2 }
 0x323   : > { %v2590_v26 = vadd.f32 %v2589_v16, %v2496_v9 }
 0x327   : > { %v2602_v61 = vpop.f32.mrf.mxu3 }
 0x328   : > { %v2603_v4 = vadd.f32 %v2602_v61, %v2496_v9 }
 0x32a   : > { %v2617_v55 = vrot.slane %v2603_v4, 4  ;;  %v2591_v34 = vpop.f32.mrf.mxu2 }
 0x32c   : > { %v2622_v37 = vsel %vm2618_vm4, %v2590_v26, %v2617_v55 }
 0x32d   : > { %v2630_v22 = vadd.f32 %v2853_v54, %v2622_v37 }
 0x32f   : > { %2634 = vst [vmem:[%s5147_s23 + $0x18] sm:$0x77] %v2630_v22  ;;  %v2604_v35 = vpop.f32.mrf.mxu3 }
 0x330 PF: > { %s17_s26 = sadd.s32 1, %s2876_s26   ;;  %s5601_s24 = smov %s2872_s25 }
 0x331   : > { %p14_p5 = scmp.ge.s32.totalorder %s17_s26, 4   ;;  %s5602_s25 = smov %s5604_s27 }
 0x333   :  { %16 = sbr.rel (!%p14_p5) target bundleno = 2 (0x2), region = 81 }

</bundles_post_ra>
